<compile_context>
chip_gen: v5e
topology: v5e:2x2
jax: 0.10.0
libtpu: 0.0.40
codegen_flags: <defaults>
</compile_context>

<pallas_src>
import functools

import jax
import jax.numpy as jnp
from jax.experimental import pallas as pl
from jax.experimental.pallas import tpu as pltpu

COMMITMENT_COST = 0.25
LANE = 128


def vqvae_kernel(x_ref, w1_ref, w2_ref, emb_ref, embt_ref, w3_ref, w4_ref,
                 const_ref,
                 latent_ref, quant_ref, recon_ref, losspart_ref,
                 *, true_batch, tile_batch, in_p, hid_p, lat_p, k_p,
                 mask_rows, fuse_decoder):
    # Packed constants: row0=b1, row1=b2, row2=b3, row3=b4, row4=||e_k||^2
    # (padded codes hold +BIG so they never win the argmin).
    b1 = const_ref[0:1, :hid_p]
    b2 = const_ref[1:2, :lat_p]
    b3 = const_ref[2:3, :hid_p]
    b4 = const_ref[3:4, :in_p]
    embsq = const_ref[4:5, :k_p]

    x = x_ref[...]                                              # (TB, in_p) bf16

    # ---- encoder (bf16 MXU operands, f32 accumulate, f32 elementwise) ----
    h = jnp.dot(x, w1_ref[...], preferred_element_type=jnp.float32) + b1
    h = jnp.maximum(h, 0.0)
    latent = jnp.dot(h.astype(jnp.bfloat16), w2_ref[...],
                     preferred_element_type=jnp.float32) + b2
    latent = jnp.maximum(latent, 0.0)
    latent_ref[...] = latent

    # ---- vector quantizer ----
    # argmin_k ||l - e_k||^2 == argmin_k (||e_k||^2 - 2 l.e_k); ||l||^2 dropped.
    lhs = latent if embt_ref.dtype == jnp.float32 else latent.astype(embt_ref.dtype)
    cross = jnp.dot(lhs, embt_ref[...], preferred_element_type=jnp.float32)
    d2 = embsq - 2.0 * cross                                    # (TB, k_p)
    iota_k = jax.lax.broadcasted_iota(jnp.int32, d2.shape, 1)
    min_d = jnp.min(d2, axis=1, keepdims=True)
    idx = jnp.min(jnp.where(d2 <= min_d, iota_k, k_p),
                  axis=1, keepdims=True)                        # first occurrence
    one_hot = (iota_k == idx).astype(jnp.float32)               # (TB, k_p)
    quantized = jnp.dot(one_hot, emb_ref[...],
                        preferred_element_type=jnp.float32)     # exact emb rows
    quant_ref[...] = quantized

    # ---- loss partial: per-column (row-reduced) squared error ----
    # Padded latent/quantized columns are identically zero -> no column mask.
    diff = quantized - latent
    if mask_rows:
        i = pl.program_id(0)
        row_ids = i * tile_batch + jax.lax.broadcasted_iota(jnp.int32, diff.shape, 0)
        diff = jnp.where(row_ids < true_batch, diff, 0.0)
    colsq = jnp.sum(diff * diff, axis=0, keepdims=True)         # (1, lat_p)
    sub = jax.lax.broadcasted_iota(jnp.int32, losspart_ref.shape, 0)
    losspart_ref[...] = jnp.where(
        sub == 0, jnp.broadcast_to(colsq, losspart_ref.shape), 0.0)

    # ---- decoder ----
    # Fused path: one_hot @ (emb @ W3) skips the serial dependency on
    # `quantized` and one f32->bf16 pack.  `quantized` output/loss unaffected.
    dec_in = one_hot if fuse_decoder else quantized
    g = jnp.dot(dec_in.astype(jnp.bfloat16), w3_ref[...],
                preferred_element_type=jnp.float32) + b3
    g = jnp.maximum(g, 0.0)
    logits = jnp.dot(g.astype(jnp.bfloat16), w4_ref[...],
                     preferred_element_type=jnp.float32) + b4
    recon_ref[...] = jax.nn.sigmoid(logits)


def _pad2(a, rows, cols):
    r, c = a.shape
    return jnp.pad(a, ((0, rows - r), (0, cols - c)))


def _round_up(n, m):
    return pl.cdiv(n, m) * m


def vqvae_forward(x, params, *, tile_batch=512, exact_codes=True):
    (w1, b1, w2, b2, emb, w3, b3, w4, b4) = params
    B, input_dim = x.shape
    hidden = w1.shape[1]
    latent_dim = w2.shape[1]
    num_emb = emb.shape[0]

    # Lane-pad every feature axis to a multiple of 128 (zero pad is exact:
    # padded latent / quantized columns stay identically zero).
    in_p = _round_up(input_dim, LANE)
    hid_p = _round_up(hidden, LANE)
    lat_p = _round_up(latent_dim, LANE)
    k_p = _round_up(num_emb, LANE)

    fuse_decoder = k_p <= lat_p   # fusion is FLOP-neutral or better only then

    # ---- host/XLA-side constant prep (once per call, outside the kernel) ----
    w1p = _pad2(w1, in_p, hid_p).astype(jnp.bfloat16)
    w2p = _pad2(w2, hid_p, lat_p).astype(jnp.bfloat16)
    embp = _pad2(emb, k_p, lat_p).astype(jnp.float32)        # (K_P, D_P)
    embt = embp.T                                            # (D_P, K_P)
    embtp = embt if exact_codes else embt.astype(jnp.bfloat16)
    if fuse_decoder:
        embw3 = jnp.dot(emb.astype(jnp.float32), w3.astype(jnp.float32))
        w3slot = _pad2(embw3, k_p, hid_p).astype(jnp.bfloat16)
    else:
        w3slot = _pad2(w3, lat_p, hid_p).astype(jnp.bfloat16)
    w4p = _pad2(w4, hid_p, in_p).astype(jnp.bfloat16)

    # Pack the four bias rows + ||e_k||^2 into one lane-padded constant block.
    cw = max(hid_p, lat_p, in_p, k_p)
    emb_sq = jnp.sum(emb.astype(jnp.float32) ** 2, axis=1)
    emb_sqp = jnp.pad(emb_sq, (0, k_p - num_emb), constant_values=jnp.float32(1e30))
    constp = jnp.zeros((8, cw), jnp.float32)
    constp = constp.at[0, :hidden].set(b1.reshape(-1).astype(jnp.float32))
    constp = constp.at[1, :latent_dim].set(b2.reshape(-1).astype(jnp.float32))
    constp = constp.at[2, :hidden].set(b3.reshape(-1).astype(jnp.float32))
    constp = constp.at[3, :input_dim].set(b4.reshape(-1).astype(jnp.float32))
    constp = constp.at[4, :k_p].set(emb_sqp)

    # ---- batch tile: as large as possible within a ~40 MiB VMEM budget ----
    resident_bytes = ((w1p.size + w2p.size + w3slot.size + w4p.size) * 2
                      + embp.size * 4 + embtp.size * embtp.dtype.itemsize
                      + constp.size * 4)
    per_row = 2 * (in_p * 2          # x (bf16, double-buffered)
                   + 2 * lat_p * 4   # latent + quantized outputs
                   + in_p * 4)       # reconstructed output
    budget = 40 * 2**20 - 2 * resident_bytes
    max_tb = max(8, (budget // per_row) // 8 * 8)
    tb = min(_round_up(min(tile_batch, _round_up(B, 8)), 8), max_tb)
    b_p = _round_up(B, tb)
    num_tiles = b_p // tb
    mask_rows = (b_p != B)

    xp = _pad2(x.astype(jnp.float32), b_p, in_p).astype(jnp.bfloat16)

    tiled_bytes = per_row * tb + 2 * 8 * lat_p * 4
    vmem_limit = int(min(56 * 2**20,
                         max(32 * 2**20, 2 * (2 * resident_bytes + tiled_bytes))))

    kernel = functools.partial(
        vqvae_kernel, true_batch=B, tile_batch=tb,
        in_p=in_p, hid_p=hid_p, lat_p=lat_p, k_p=k_p,
        mask_rows=mask_rows, fuse_decoder=fuse_decoder)

    def tiled(shape):
        return pl.BlockSpec(shape, lambda i: (i, 0))

    def resident(shape):
        return pl.BlockSpec(shape, lambda i: (0, 0))

    in_specs = [
        tiled((tb, in_p)),                                   # x (batch-tiled, bf16)
        resident(w1p.shape), resident(w2p.shape),
        resident(embp.shape), resident(embtp.shape),
        resident(w3slot.shape), resident(w4p.shape),
        resident(constp.shape),
    ]
    out_specs = [
        tiled((tb, lat_p)),                                  # latent
        tiled((tb, lat_p)),                                  # quantized
        tiled((tb, in_p)),                                   # reconstructed
        pl.BlockSpec((8, lat_p), lambda i: (i, 0)),          # per-tile loss partial
    ]
    out_shape = (
        jax.ShapeDtypeStruct((b_p, lat_p), jnp.float32),
        jax.ShapeDtypeStruct((b_p, lat_p), jnp.float32),
        jax.ShapeDtypeStruct((b_p, in_p), jnp.float32),
        jax.ShapeDtypeStruct((num_tiles * 8, lat_p), jnp.float32),
    )

    dec1_k = k_p if fuse_decoder else lat_p
    flops = 2 * b_p * (in_p * hid_p + hid_p * lat_p + lat_p * k_p
                       + k_p * lat_p + dec1_k * hid_p + hid_p * in_p)
    transcendentals = b_p * in_p                              # sigmoid
    bytes_accessed = (
        xp.size * 2
        + (w1p.size + w2p.size + w3slot.size + w4p.size) * 2
        + embp.size * 4 + embtp.size * embtp.dtype.itemsize + constp.size * 4
        + (2 * b_p * lat_p + b_p * in_p + num_tiles * 8 * lat_p) * 4
    )

    latent_p, quant_p, recon_p, loss_parts = pl.pallas_call(
        kernel,
        grid=(num_tiles,),
        in_specs=in_specs,
        out_specs=out_specs,
        out_shape=out_shape,
        compiler_params=pltpu.CompilerParams(
            dimension_semantics=("parallel",),
            vmem_limit_bytes=vmem_limit),
        cost_estimate=pl.CostEstimate(flops=flops,
                                      transcendentals=transcendentals,
                                      bytes_accessed=bytes_accessed),
    )(xp, w1p, w2p, embp, embtp, w3slot, w4p, constp)

    latent = latent_p[:B, :latent_dim]
    quantized = quant_p[:B, :latent_dim]
    reconstructed = recon_p[:B, :input_dim]
    # Every partial block holds the per-column sums in sublane 0 and zeros
    # elsewhere; padded columns/rows are already zero -> plain sum is exact.
    ssq_total = jnp.sum(loss_parts)
    loss = (1.0 + COMMITMENT_COST) * ssq_total / jnp.float32(B * latent_dim)
    return latent, quantized, reconstructed, loss


def init_params(key, input_dim, latent_dim, num_embeddings, hidden=128):
    ks = jax.random.split(key, 9)

    def lin(kw, kb, fan_in, fan_out):
        bound = 1.0 / jnp.sqrt(jnp.float32(fan_in))
        w = jax.random.uniform(kw, (fan_in, fan_out), jnp.float32, -bound, bound)
        b = jax.random.uniform(kb, (1, fan_out), jnp.float32, -bound, bound)
        return w, b

    w1, b1 = lin(ks[0], ks[1], input_dim, hidden)
    w2, b2 = lin(ks[2], ks[3], hidden, latent_dim)
    emb = jax.random.uniform(ks[4], (num_embeddings, latent_dim), jnp.float32,
                             -1.0 / num_embeddings, 1.0 / num_embeddings)
    w3, b3 = lin(ks[5], ks[6], latent_dim, hidden)
    w4, b4 = lin(ks[7], ks[8], hidden, input_dim)
    return (w1, b1, w2, b2, emb, w3, b3, w4, b4)


if __name__ == "__main__":
    key = jax.random.PRNGKey(0)
    k_x, k_p = jax.random.split(key)

    batch, input_dim, latent_dim, num_embeddings = 256, 32, 16, 64
    x = jax.random.uniform(k_x, (batch, input_dim), jnp.float32)
    params = init_params(k_p, input_dim, latent_dim, num_embeddings)

    fwd = jax.jit(vqvae_forward)
    latent, quantized, reconstructed, loss = fwd(x, params)
    jax.block_until_ready((latent, quantized, reconstructed, loss))

    assert latent.shape == (batch, latent_dim)
    assert quantized.shape == (batch, latent_dim)
    assert reconstructed.shape == (batch, input_dim)
    assert loss.shape == ()
    assert bool(jnp.isfinite(loss))
    assert bool(jnp.all(jnp.isfinite(reconstructed)))
    print("KERNEL_OK")
</pallas_src>

<mosaic_0001>
module attributes {stable_mosaic.version = 11 : i64} {
  func.func @vqvae_kernel(%arg0: i32, %arg1: memref<256x128xbf16, #tpu.memory_space<vmem>>, %arg2: memref<128x128xbf16, #tpu.memory_space<vmem>>, %arg3: memref<128x128xbf16, #tpu.memory_space<vmem>>, %arg4: memref<128x128xf32, #tpu.memory_space<vmem>>, %arg5: memref<128x128xf32, #tpu.memory_space<vmem>>, %arg6: memref<128x128xbf16, #tpu.memory_space<vmem>>, %arg7: memref<128x128xbf16, #tpu.memory_space<vmem>>, %arg8: memref<8x128xf32, #tpu.memory_space<vmem>>, %arg9: memref<256x128xf32, #tpu.memory_space<vmem>>, %arg10: memref<256x128xf32, #tpu.memory_space<vmem>>, %arg11: memref<256x128xf32, #tpu.memory_space<vmem>>, %arg12: memref<8x128xf32, #tpu.memory_space<vmem>>) attributes {dimension_semantics = [#tpu.dimension_semantics<parallel>], iteration_bounds = array<i64: 1>, scalar_prefetch = 0 : i64, scratch_operands = 0 : i64, tpu.core_type = #tpu.core_type<tc>, window_params = [{transform_indices = @transform_0, window_bounds = array<i64: 256, 128>}, {pipeline_mode = #tpu.pipeline_mode<synchronous>, transform_indices = @transform_1, window_bounds = array<i64: 128, 128>}, {pipeline_mode = #tpu.pipeline_mode<synchronous>, transform_indices = @transform_2, window_bounds = array<i64: 128, 128>}, {pipeline_mode = #tpu.pipeline_mode<synchronous>, transform_indices = @transform_3, window_bounds = array<i64: 128, 128>}, {pipeline_mode = #tpu.pipeline_mode<synchronous>, transform_indices = @transform_4, window_bounds = array<i64: 128, 128>}, {pipeline_mode = #tpu.pipeline_mode<synchronous>, transform_indices = @transform_5, window_bounds = array<i64: 128, 128>}, {pipeline_mode = #tpu.pipeline_mode<synchronous>, transform_indices = @transform_6, window_bounds = array<i64: 128, 128>}, {pipeline_mode = #tpu.pipeline_mode<synchronous>, transform_indices = @transform_7, window_bounds = array<i64: 8, 128>}, {transform_indices = @transform_8, window_bounds = array<i64: 256, 128>}, {transform_indices = @transform_9, window_bounds = array<i64: 256, 128>}, {transform_indices = @transform_10, window_bounds = array<i64: 256, 128>}, {transform_indices = @transform_11, window_bounds = array<i64: 8, 128>}]} {
    %c0 = arith.constant 0 : index
    %c0_0 = arith.constant 0 : index
    %0 = vector.load %arg8[%c0, %c0_0] : memref<8x128xf32, #tpu.memory_space<vmem>>, vector<1x128xf32>
    %c1 = arith.constant 1 : index
    %c0_1 = arith.constant 0 : index
    %1 = vector.load %arg8[%c1, %c0_1] : memref<8x128xf32, #tpu.memory_space<vmem>>, vector<1x128xf32>
    %c2 = arith.constant 2 : index
    %c0_2 = arith.constant 0 : index
    %2 = vector.load %arg8[%c2, %c0_2] : memref<8x128xf32, #tpu.memory_space<vmem>>, vector<1x128xf32>
    %c3 = arith.constant 3 : index
    %c0_3 = arith.constant 0 : index
    %3 = vector.load %arg8[%c3, %c0_3] : memref<8x128xf32, #tpu.memory_space<vmem>>, vector<1x128xf32>
    %c4 = arith.constant 4 : index
    %c0_4 = arith.constant 0 : index
    %4 = vector.load %arg8[%c4, %c0_4] : memref<8x128xf32, #tpu.memory_space<vmem>>, vector<1x128xf32>
    %c0_5 = arith.constant 0 : index
    %c0_6 = arith.constant 0 : index
    %5 = vector.load %arg1[%c0_5, %c0_6] : memref<256x128xbf16, #tpu.memory_space<vmem>>, vector<256x128xbf16>
    %c0_7 = arith.constant 0 : index
    %c0_8 = arith.constant 0 : index
    %6 = vector.load %arg2[%c0_7, %c0_8] : memref<128x128xbf16, #tpu.memory_space<vmem>>, vector<128x128xbf16>
    %cst = arith.constant dense<0.000000e+00> : vector<256x128xf32>
    %7 = tpu.matmul %5, %6, %cst {dimension_numbers = #tpu.dot_dimension_numbers<[1], [0], [0], [1], [0, 0, 1, 1], [], []>} : vector<256x128xbf16>, vector<128x128xbf16>, vector<256x128xf32> -> vector<256x128xf32>
    %8 = vector.broadcast %0 : vector<1x128xf32> to vector<256x128xf32>
    %9 = arith.addf %7, %8 : vector<256x128xf32>
    %cst_9 = arith.constant 0.000000e+00 : f32
    %10 = vector.broadcast %cst_9 : f32 to vector<256x128xf32>
    %11 = arith.maximumf %9, %10 : vector<256x128xf32>
    %12 = arith.truncf %11 : vector<256x128xf32> to vector<256x128xbf16>
    %c0_10 = arith.constant 0 : index
    %c0_11 = arith.constant 0 : index
    %13 = vector.load %arg3[%c0_10, %c0_11] : memref<128x128xbf16, #tpu.memory_space<vmem>>, vector<128x128xbf16>
    %cst_12 = arith.constant dense<0.000000e+00> : vector<256x128xf32>
    %14 = tpu.matmul %12, %13, %cst_12 {dimension_numbers = #tpu.dot_dimension_numbers<[1], [0], [0], [1], [0, 0, 1, 1], [], []>} : vector<256x128xbf16>, vector<128x128xbf16>, vector<256x128xf32> -> vector<256x128xf32>
    %15 = vector.broadcast %1 : vector<1x128xf32> to vector<256x128xf32>
    %16 = arith.addf %14, %15 : vector<256x128xf32>
    %cst_13 = arith.constant 0.000000e+00 : f32
    %17 = vector.broadcast %cst_13 : f32 to vector<256x128xf32>
    %18 = arith.maximumf %16, %17 : vector<256x128xf32>
    %c0_14 = arith.constant 0 : index
    %c0_15 = arith.constant 0 : index
    %19 = vector.load %arg9[%c0_14, %c0_15] : memref<256x128xf32, #tpu.memory_space<vmem>>, vector<256x128xf32>
    tpu.vector_store %arg9[%c0_14, %c0_15], %18 {strides = array<i32>} : memref<256x128xf32, #tpu.memory_space<vmem>>, vector<256x128xf32>,
    %c0_16 = arith.constant 0 : index
    %c0_17 = arith.constant 0 : index
    %20 = vector.load %arg5[%c0_16, %c0_17] : memref<128x128xf32, #tpu.memory_space<vmem>>, vector<128x128xf32>
    %cst_18 = arith.constant dense<0.000000e+00> : vector<256x128xf32>
    %21 = tpu.matmul %18, %20, %cst_18 {dimension_numbers = #tpu.dot_dimension_numbers<[1], [0], [0], [1], [0, 0, 1, 1], [], []>} : vector<256x128xf32>, vector<128x128xf32>, vector<256x128xf32> -> vector<256x128xf32>
    %cst_19 = arith.constant 2.000000e+00 : f32
    %22 = vector.broadcast %cst_19 : f32 to vector<256x128xf32>
    %23 = arith.mulf %22, %21 : vector<256x128xf32>
    %24 = vector.broadcast %4 : vector<1x128xf32> to vector<256x128xf32>
    %25 = arith.subf %24, %23 : vector<256x128xf32>
    %26 = tpu.iota {dimensions = array<i32: 1>} : vector<256x128xi32>
    %cst_20 = arith.constant dense<0x7F800000> : vector<256xf32>
    %27 = vector.multi_reduction <minimumf>, %25, %cst_20 [1] : vector<256x128xf32> to vector<256xf32>
    %28 = vector.shape_cast %27 : vector<256xf32> to vector<256x1xf32>
    %29 = vector.broadcast %28 : vector<256x1xf32> to vector<256x128xf32>
    %30 = arith.cmpf ole, %25, %29 : vector<256x128xf32>
    %c128_i32 = arith.constant 128 : i32
    %31 = vector.broadcast %c128_i32 : i32 to vector<256x128xi32>
    %32 = arith.select %30, %26, %31 : vector<256x128xi1>, vector<256x128xi32>
    %cst_21 = arith.constant dense<2147483647> : vector<256xi32>
    %33 = vector.multi_reduction <minsi>, %32, %cst_21 [1] : vector<256x128xi32> to vector<256xi32>
    %34 = vector.shape_cast %33 : vector<256xi32> to vector<256x1xi32>
    %35 = vector.broadcast %34 : vector<256x1xi32> to vector<256x128xi32>
    %36 = arith.cmpi eq, %26, %35 : vector<256x128xi32>
    %37 = arith.extui %36 : vector<256x128xi1> to vector<256x128xi32>
    %38 = arith.sitofp %37 : vector<256x128xi32> to vector<256x128xf32>
    %c0_22 = arith.constant 0 : index
    %c0_23 = arith.constant 0 : index
    %39 = vector.load %arg4[%c0_22, %c0_23] : memref<128x128xf32, #tpu.memory_space<vmem>>, vector<128x128xf32>
    %cst_24 = arith.constant dense<0.000000e+00> : vector<256x128xf32>
    %40 = tpu.matmul %38, %39, %cst_24 {dimension_numbers = #tpu.dot_dimension_numbers<[1], [0], [0], [1], [0, 0, 1, 1], [], []>} : vector<256x128xf32>, vector<128x128xf32>, vector<256x128xf32> -> vector<256x128xf32>
    %c0_25 = arith.constant 0 : index
    %c0_26 = arith.constant 0 : index
    %41 = vector.load %arg10[%c0_25, %c0_26] : memref<256x128xf32, #tpu.memory_space<vmem>>, vector<256x128xf32>
    tpu.vector_store %arg10[%c0_25, %c0_26], %40 {strides = array<i32>} : memref<256x128xf32, #tpu.memory_space<vmem>>, vector<256x128xf32>,
    %42 = arith.subf %40, %18 : vector<256x128xf32>
    %43 = arith.mulf %42, %42 : vector<256x128xf32>
    %cst_27 = arith.constant dense<0.000000e+00> : vector<128xf32>
    %44 = vector.multi_reduction <add>, %43, %cst_27 [0] : vector<256x128xf32> to vector<128xf32>
    %45 = vector.shape_cast %44 : vector<128xf32> to vector<1x128xf32>
    %46 = tpu.iota {dimensions = array<i32: 0>} : vector<8x128xi32>
    %c0_i32 = arith.constant 0 : i32
    %47 = vector.broadcast %c0_i32 : i32 to vector<8x128xi32>
    %48 = arith.cmpi eq, %46, %47 : vector<8x128xi32>
    %49 = vector.shape_cast %45 : vector<1x128xf32> to vector<1x128xf32>
    %50 = vector.broadcast %49 : vector<1x128xf32> to vector<8x128xf32>
    %cst_28 = arith.constant 0.000000e+00 : f32
    %51 = vector.broadcast %cst_28 : f32 to vector<8x128xf32>
    %52 = arith.select %48, %50, %51 : vector<8x128xi1>, vector<8x128xf32>
    %c0_29 = arith.constant 0 : index
    %c0_30 = arith.constant 0 : index
    %53 = vector.load %arg12[%c0_29, %c0_30] : memref<8x128xf32, #tpu.memory_space<vmem>>, vector<8x128xf32>
    tpu.vector_store %arg12[%c0_29, %c0_30], %52 {strides = array<i32>} : memref<8x128xf32, #tpu.memory_space<vmem>>, vector<8x128xf32>,
    %54 = arith.truncf %38 : vector<256x128xf32> to vector<256x128xbf16>
    %c0_31 = arith.constant 0 : index
    %c0_32 = arith.constant 0 : index
    %55 = vector.load %arg6[%c0_31, %c0_32] : memref<128x128xbf16, #tpu.memory_space<vmem>>, vector<128x128xbf16>
    %cst_33 = arith.constant dense<0.000000e+00> : vector<256x128xf32>
    %56 = tpu.matmul %54, %55, %cst_33 {dimension_numbers = #tpu.dot_dimension_numbers<[1], [0], [0], [1], [0, 0, 1, 1], [], []>} : vector<256x128xbf16>, vector<128x128xbf16>, vector<256x128xf32> -> vector<256x128xf32>
    %57 = vector.broadcast %2 : vector<1x128xf32> to vector<256x128xf32>
    %58 = arith.addf %56, %57 : vector<256x128xf32>
    %cst_34 = arith.constant 0.000000e+00 : f32
    %59 = vector.broadcast %cst_34 : f32 to vector<256x128xf32>
    %60 = arith.maximumf %58, %59 : vector<256x128xf32>
    %61 = arith.truncf %60 : vector<256x128xf32> to vector<256x128xbf16>
    %c0_35 = arith.constant 0 : index
    %c0_36 = arith.constant 0 : index
    %62 = vector.load %arg7[%c0_35, %c0_36] : memref<128x128xbf16, #tpu.memory_space<vmem>>, vector<128x128xbf16>
    %cst_37 = arith.constant dense<0.000000e+00> : vector<256x128xf32>
    %63 = tpu.matmul %61, %62, %cst_37 {dimension_numbers = #tpu.dot_dimension_numbers<[1], [0], [0], [1], [0, 0, 1, 1], [], []>} : vector<256x128xbf16>, vector<128x128xbf16>, vector<256x128xf32> -> vector<256x128xf32>
    %64 = vector.broadcast %3 : vector<1x128xf32> to vector<256x128xf32>
    %65 = arith.addf %63, %64 : vector<256x128xf32>
    %66 = arith.negf %65 : vector<256x128xf32>
    %67 = math.exp %66 : vector<256x128xf32>
    %cst_38 = arith.constant 1.000000e+00 : f32
    %68 = vector.broadcast %cst_38 : f32 to vector<256x128xf32>
    %69 = arith.addf %68, %67 : vector<256x128xf32>
    %70 = arith.divf %68, %69 : vector<256x128xf32>
    %c0_39 = arith.constant 0 : index
    %c0_40 = arith.constant 0 : index
    %71 = vector.load %arg11[%c0_39, %c0_40] : memref<256x128xf32, #tpu.memory_space<vmem>>, vector<256x128xf32>
    tpu.vector_store %arg11[%c0_39, %c0_40], %70 {strides = array<i32>} : memref<256x128xf32, #tpu.memory_space<vmem>>, vector<256x128xf32>,
    return
  }
  func.func @transform_0(%arg0: i32) -> (i32, i32) {
    %c0_i32 = arith.constant 0 : i32
    %c0_i32_0 = arith.constant 0 : i32
    return %arg0, %c0_i32 : i32, i32
  }
  func.func @transform_1(%arg0: i32) -> (i32, i32) {
    %c0_i32 = arith.constant 0 : i32
    %c0_i32_0 = arith.constant 0 : i32
    %c0_i32_1 = arith.constant 0 : i32
    return %c0_i32, %c0_i32_0 : i32, i32
  }
  func.func @transform_2(%arg0: i32) -> (i32, i32) {
    %c0_i32 = arith.constant 0 : i32
    %c0_i32_0 = arith.constant 0 : i32
    %c0_i32_1 = arith.constant 0 : i32
    return %c0_i32, %c0_i32_0 : i32, i32
  }
  func.func @transform_3(%arg0: i32) -> (i32, i32) {
    %c0_i32 = arith.constant 0 : i32
    %c0_i32_0 = arith.constant 0 : i32
    %c0_i32_1 = arith.constant 0 : i32
    return %c0_i32, %c0_i32_0 : i32, i32
  }
  func.func @transform_4(%arg0: i32) -> (i32, i32) {
    %c0_i32 = arith.constant 0 : i32
    %c0_i32_0 = arith.constant 0 : i32
    %c0_i32_1 = arith.constant 0 : i32
    return %c0_i32, %c0_i32_0 : i32, i32
  }
  func.func @transform_5(%arg0: i32) -> (i32, i32) {
    %c0_i32 = arith.constant 0 : i32
    %c0_i32_0 = arith.constant 0 : i32
    %c0_i32_1 = arith.constant 0 : i32
    return %c0_i32, %c0_i32_0 : i32, i32
  }
  func.func @transform_6(%arg0: i32) -> (i32, i32) {
    %c0_i32 = arith.constant 0 : i32
    %c0_i32_0 = arith.constant 0 : i32
    %c0_i32_1 = arith.constant 0 : i32
    return %c0_i32, %c0_i32_0 : i32, i32
  }
  func.func @transform_7(%arg0: i32) -> (i32, i32) {
    %c0_i32 = arith.constant 0 : i32
    %c0_i32_0 = arith.constant 0 : i32
    %c0_i32_1 = arith.constant 0 : i32
    return %c0_i32, %c0_i32_0 : i32, i32
  }
  func.func @transform_8(%arg0: i32) -> (i32, i32) {
    %c0_i32 = arith.constant 0 : i32
    %c0_i32_0 = arith.constant 0 : i32
    return %arg0, %c0_i32 : i32, i32
  }
  func.func @transform_9(%arg0: i32) -> (i32, i32) {
    %c0_i32 = arith.constant 0 : i32
    %c0_i32_0 = arith.constant 0 : i32
    return %arg0, %c0_i32 : i32, i32
  }
  func.func @transform_10(%arg0: i32) -> (i32, i32) {
    %c0_i32 = arith.constant 0 : i32
    %c0_i32_0 = arith.constant 0 : i32
    return %arg0, %c0_i32 : i32, i32
  }
  func.func @transform_11(%arg0: i32) -> (i32, i32) {
    %c0_i32 = arith.constant 0 : i32
    %c0_i32_0 = arith.constant 0 : i32
    return %arg0, %c0_i32 : i32, i32
  }
}

</mosaic_0001>

<bundles_post_ra>
// kernel: vqvae_forward.1
= control target key start
LH: loop header
LB: loop body
LE: loop exit
PB: predicated region body
PF: predicated region fallthrough
CT: control target
= control target key end

     0   :  { %s4993_s1 = inlined_call_operand.vmem [shape: bf16[128,128], index: 1, kind: input, shape index: {}]   ;;  %s4994_s7 = inlined_call_operand.vmem [shape: f32[8,128], index: 7, kind: input, shape index: {}]   ;;  %s4995_s0 = inlined_call_operand.vmem [shape: bf16[256,128], index: 0, kind: input, shape index: {}]   ;;  %s4996_s2 = inlined_call_operand.vmem [shape: bf16[128,128], index: 2, kind: input, shape index: {}]   ;;  %s4997_s4 = inlined_call_operand.vmem [shape: f32[128,128], index: 4, kind: input, shape index: {}]   ;;  %s4998_s8 = inlined_call_operand.vmem [shape: f32[256,128], index: 8, kind: output, shape index: {0}]   ;;  %s4999_s3 = inlined_call_operand.vmem [shape: f32[128,128], index: 3, kind: input, shape index: {}]   ;;  %s5000_s5 = inlined_call_operand.vmem [shape: bf16[128,128], index: 5, kind: input, shape index: {}]   ;;  %s5001_s6 = inlined_call_operand.vmem [shape: bf16[128,128], index: 6, kind: input, shape index: {}]   ;;  %s5002_s9 = inlined_call_operand.vmem [shape: f32[256,128], index: 9, kind: output, shape index: {1}]   ;;  %s5003_s10 = inlined_call_operand.vmem [shape: f32[256,128], index: 10, kind: output, shape index: {2}]   ;;  %s5004_s11 = inlined_call_operand.vmem [shape: f32[8,128], index: 11, kind: output, shape index: {3}]  }
   0x1   :  { %v3092_v0 = vld [vmem:[%s4993_s1 + $0x38] sm:$0xff]  ;;  %v3091_v1 = vld [vmem:[%s4993_s1 + $0x30] sm:$0xff]  ;;  %v3090_v2 = vld [vmem:[%s4993_s1 + $0x28] sm:$0xff] }
   0x2   :  { %231 = vmatpush.bf16.msra.mxu0 %v3092_v0  ;;  %3117 = vmatpush.bf16.msra.mxu2 %v3092_v0  ;;  %v3089_v3 = vld [vmem:[%s4993_s1 + $0x20] sm:$0xff]  ;;  %v3088_v4 = vld [vmem:[%s4993_s1 + $0x18] sm:$0xff]  ;;  %v3087_v5 = vld [vmem:[%s4993_s1 + $0x10] sm:$0xff] }
   0x3   :  { %v3086_v6 = vld [vmem:[%s4993_s1 + $0x8] sm:$0xff]  ;;  %v3085_v7 = vld [vmem:[%s4993_s1] sm:$0xff]  ;;  %v3071_v10 = vld [vmem:[%s4995_s0 + $0x10] sm:$0xff] }
   0x4   :  { %v3069_v8 = vld [vmem:[%s4995_s0] sm:$0xff]  ;;  %v3070_v9 = vld [vmem:[%s4995_s0 + $0x8] sm:$0xff]  ;;  %v3072_v11 = vld [vmem:[%s4995_s0 + $0x18] sm:$0xff] }
   0x5   :  { %v3073_v12 = vld [vmem:[%s4995_s0 + $0x20] sm:$0xff]  ;;  %v3100_v13 = vld [vmem:[%s4996_s2 + $0x38] sm:$0xff]  ;;  %v3099_v14 = vld [vmem:[%s4996_s2 + $0x30] sm:$0xff] }
   0x6   :  { %232 = vmatpush.bf16.msra.mxu0 %v3091_v1  ;;  %3118 = vmatpush.bf16.msra.mxu2 %v3091_v1  ;;  %v3098_v15 = vld [vmem:[%s4996_s2 + $0x28] sm:$0xff]  ;;  %v3097_v16 = vld [vmem:[%s4996_s2 + $0x20] sm:$0xff]  ;;  %v3096_v18 = vld [vmem:[%s4996_s2 + $0x18] sm:$0xff] }
   0x7   :  { %433 = vmatpush.bf16.msra.mxu1 %v3100_v13  ;;  %3125 = vmatpush.bf16.msra.mxu3 %v3100_v13  ;;  %v3074_v17 = vld [vmem:[%s4995_s0 + $0x28] sm:$0xff]  ;;  %v3075_v19 = vld [vmem:[%s4995_s0 + $0x30] sm:$0xff]  ;;  %v3077_v20 = vld [vmem:[%s4995_s0 + $0x40] sm:$0xff] }
   0x8   :  { %v3095_v21 = vld [vmem:[%s4996_s2 + $0x10] sm:$0xff]  ;;  %v3094_v22 = vld [vmem:[%s4996_s2 + $0x8] sm:$0xff]  ;;  %v3093_v23 = vld [vmem:[%s4996_s2] sm:$0xff] }
   0x9   :  { %v3076_v24 = vld [vmem:[%s4995_s0 + $0x38] sm:$0xff]  ;;  %v3078_v25 = vld [vmem:[%s4995_s0 + $0x48] sm:$0xff]  ;;  %v600_v27 = vld [vmem:[%s4997_s4 + $0x70] sm:$0xff] }
   0xa   :  { %233 = vmatpush.bf16.msra.mxu0 %v3090_v2  ;;  %3119 = vmatpush.bf16.msra.mxu2 %v3090_v2  ;;  %v601_v26 = vld [vmem:[%s4997_s4 + $0x78] sm:$0xff]  ;;  %v3079_v28 = vld [vmem:[%s4995_s0 + $0x50] sm:$0xff]  ;;  %v3457_v30 = vld [vmem:[%s4994_s7] ss:$0 sm:$0xff] }
   0xb   :  { %434 = vmatpush.bf16.msra.mxu1 %v3099_v14  ;;  %3126 = vmatpush.bf16.msra.mxu3 %v3099_v14  ;;  %v599_v31 = vld [vmem:[%s4997_s4 + $0x68] sm:$0xff]  ;;  %v598_v37 = vld [vmem:[%s4997_s4 + $0x60] sm:$0xff]  ;;  %v3080_v39 = vld [vmem:[%s4995_s0 + $0x58] sm:$0xff] }
   0xc   :  { %v597_v41 = vld [vmem:[%s4997_s4 + $0x58] sm:$0xff]  ;;  %v596_v47 = vld [vmem:[%s4997_s4 + $0x50] sm:$0xff]  ;;  %v3081_v49 = vld [vmem:[%s4995_s0 + $0x60] sm:$0xff] }
   0xd   :  { %v595_v50 = vld [vmem:[%s4997_s4 + $0x48] sm:$0xff]  ;;  %v594_v51 = vld [vmem:[%s4997_s4 + $0x40] sm:$0xff]  ;;  %v593_v53 = vld [vmem:[%s4997_s4 + $0x38] sm:$0xff] }
   0xe   :  { %234 = vmatpush.bf16.msra.mxu0 %v3089_v3  ;;  %3120 = vmatpush.bf16.msra.mxu2 %v3089_v3  ;;  %v3082_v60 = vld [vmem:[%s4995_s0 + $0x68] sm:$0xff]  ;;  %v592_v61 = vld [vmem:[%s4997_s4 + $0x30] sm:$0xff] }
   0xf   :  { %435 = vmatpush.bf16.msra.mxu1 %v3098_v15  ;;  %3127 = vmatpush.bf16.msra.mxu3 %v3098_v15  ;;  %v591_v63 = vld [vmem:[%s4997_s4 + $0x28] sm:$0xff] }
  0x12   :  { %235 = vmatpush.bf16.msra.mxu0 %v3088_v4  ;;  %3121 = vmatpush.bf16.msra.mxu2 %v3088_v4 }
  0x13   :  { %436 = vmatpush.bf16.msra.mxu1 %v3097_v16  ;;  %3128 = vmatpush.bf16.msra.mxu3 %v3097_v16  ;;  %v3084_v16 = vld [vmem:[%s4995_s0 + $0x78] sm:$0xff] }
  0x16   :  { %236 = vmatpush.bf16.msra.mxu0 %v3087_v5  ;;  %3122 = vmatpush.bf16.msra.mxu2 %v3087_v5 }
  0x17   :  { %437 = vmatpush.bf16.msra.mxu1 %v3096_v18  ;;  %3129 = vmatpush.bf16.msra.mxu3 %v3096_v18 }
  0x1a   :  { %237 = vmatpush.bf16.msra.mxu0 %v3086_v6  ;;  %3123 = vmatpush.bf16.msra.mxu2 %v3086_v6  ;;  %v3083_v6 = vld [vmem:[%s4995_s0 + $0x70] sm:$0xff] }
  0x1b   :  { %438 = vmatpush.bf16.msra.mxu1 %v3095_v21  ;;  %3130 = vmatpush.bf16.msra.mxu3 %v3095_v21 }
  0x1e   :  { %238 = vmatpush.bf16.msra.mxu0 %v3085_v7  ;;  %3124 = vmatpush.bf16.msra.mxu2 %v3085_v7  ;;  %v590_v7 = vld [vmem:[%s4997_s4 + $0x20] sm:$0xff] }
  0x1f   :  { %439 = vmatpush.bf16.msra.mxu1 %v3094_v22  ;;  %3131 = vmatpush.bf16.msra.mxu3 %v3094_v22 }
  0x21   :  { %239 = vmatmul.bf16.vlgmr.msra.gmra.mxu0 %v3069_v8  ;;  %279 = vmatmul.bf16.vlgmr.msra.gmra.mxu2 %v3077_v20 }
  0x22   :  { %602 = vmatpush.msrb.mxu2 %v601_v26  ;;  %v586_v26 = vld [vmem:[%s4997_s4] sm:$0xff] }
  0x23   :  { %440 = vmatpush.bf16.msra.mxu1 %v3093_v23  ;;  %3132 = vmatpush.bf16.msra.mxu3 %v3093_v23 }
  0x24   :  { %603 = vmatpush.msrb.mxu2 %v600_v27 }
  0x26   :  { %604 = vmatpush.msrb.mxu2 %v599_v31 }
  0x28   :  { %605 = vmatpush.msrb.mxu2 %v598_v37 }
  0x2a   :  { %606 = vmatpush.msrb.mxu2 %v597_v41 }
  0x2c   :  { %607 = vmatpush.msrb.mxu2 %v596_v47 }
  0x2e   :  { %608 = vmatpush.msrb.mxu2 %v595_v50 }
  0x30   :  { %609 = vmatpush.msrb.mxu2 %v594_v51 }
  0x31   :  { %244 = vmatmul.bf16.gmra.mxu0 %v3070_v9  ;;  %284 = vmatmul.bf16.gmra.mxu2 %v3078_v25  ;;  %v589_v9 = vld [vmem:[%s4997_s4 + $0x18] sm:$0xff] }
  0x32   :  { %610 = vmatpush.msrb.mxu2 %v593_v53 }
  0x34   :  { %611 = vmatpush.msrb.mxu2 %v592_v61 }
  0x36   :  { %612 = vmatpush.msrb.mxu2 %v591_v63 }
  0x38   :  { %613 = vmatpush.msrb.mxu2 %v590_v7 }
  0x3a   :  { %614 = vmatpush.msrb.mxu2 %v589_v9 }
  0x41   :  { %249 = vmatmul.bf16.gmra.mxu0 %v3071_v10  ;;  %289 = vmatmul.bf16.gmra.mxu2 %v3079_v28 }
  0x51   :  { %254 = vmatmul.bf16.gmra.mxu0 %v3072_v11  ;;  %294 = vmatmul.bf16.gmra.mxu2 %v3080_v39 }
  0x61   :  { %259 = vmatmul.bf16.gmra.mxu0 %v3073_v12  ;;  %299 = vmatmul.bf16.gmra.mxu2 %v3081_v49 }
  0x71   :  { %264 = vmatmul.bf16.gmra.mxu0 %v3074_v17  ;;  %304 = vmatmul.bf16.gmra.mxu2 %v3082_v60  ;;  %v588_v17 = vld [vmem:[%s4997_s4 + $0x10] sm:$0xff] }
  0x72   :  { %615 = vmatpush.msrb.mxu2 %v588_v17 }
  0x81   :  { %269 = vmatmul.bf16.gmra.mxu0 %v3075_v19  ;;  %309 = vmatmul.bf16.gmra.mxu2 %v3083_v6  ;;  %v587_v19 = vld [vmem:[%s4997_s4 + $0x8] sm:$0xff] }
  0x82   :  { %616 = vmatpush.msrb.mxu2 %v587_v19 }
  0x84   :  { %617 = vmatpush.msrb.mxu2 %v586_v26 }
  0x91   :  { %274 = vmatmul.bf16.gmra.mxu0 %v3076_v24  ;;  %314 = vmatmul.bf16.gmra.mxu2 %v3084_v16 }
  0x9e   :  { %v240_v29 = vpop.f32.mrf.mxu0 }
  0x9f   :  { %v241_v32 = vadd.f32 %v3457_v30, %v240_v29 }
  0xa1   :  { %v320_v35 = vmax.f32 %v241_v32, 0.0 }
  0xa4   :  { %v280_v28 = vpop.f32.mrf.mxu2 }
  0xa6   :  { %v242_v33 = vpop.f32.mrf.mxu0 }
  0xa7   :  { %v243_v34 = vadd.f32 %v3457_v30, %v242_v33 }
  0xa9   :  { %v321_v36 = vmax.f32 %v243_v34, 0.0  ;;  %v281_v34 = vadd.f32 %v3457_v30, %v280_v28 }
  0xab   :  { %v352_v38 = vpack.c.bf16 %v321_v36, %v320_v35 }
  0xac   :  { %v282_v36 = vpop.f32.mrf.mxu2 }
  0xad   :  { %441 = vmatmul.bf16.vlgmr.msra.gmra.mxu1 %v352_v38  ;;  %v336_v38 = vmax.f32 %v281_v34, 0.0  ;;  %v283_v39 = vadd.f32 %v3457_v30, %v282_v36 }
  0xae   :  { %v245_v40 = vpop.f32.mrf.mxu0 }
  0xaf   :  { %v246_v42 = vadd.f32 %v3457_v30, %v245_v40  ;;  %v337_v40 = vmax.f32 %v283_v39, 0.0 }
  0xb1   :  { %v322_v44 = vmax.f32 %v246_v42, 0.0  ;;  %v360_v42 = vpack.c.bf16 %v337_v40, %v336_v38 }
  0xb3   :  { %481 = vmatmul.bf16.vlgmr.msra.gmra.mxu3 %v360_v42 }
  0xb6   :  { %v247_v43 = vpop.f32.mrf.mxu0 }
  0xb7   :  { %v248_v45 = vadd.f32 %v3457_v30, %v247_v43  ;;  %v285_v43 = vpop.f32.mrf.mxu2 }
  0xb9   :  { %v323_v46 = vmax.f32 %v248_v45, 0.0 }
  0xbb   :  { %v353_v48 = vpack.c.bf16 %v323_v46, %v322_v44 }
  0xbd   :  { %446 = vmatmul.bf16.gmra.mxu1 %v353_v48  ;;  %v286_v48 = vadd.f32 %v3457_v30, %v285_v43 }
  0xbe   :  { %v250_v52 = vpop.f32.mrf.mxu0 }
  0xbf   :  { %v251_v54 = vadd.f32 %v3457_v30, %v250_v52  ;;  %v287_v50 = vpop.f32.mrf.mxu2  ;;  %v338_v52 = vmax.f32 %v286_v48, 0.0 }
  0xc0   :  { %v288_v53 = vadd.f32 %v3457_v30, %v287_v50 }
  0xc1   :  { %v324_v56 = vmax.f32 %v251_v54, 0.0 }
  0xc2   :  { %v339_v54 = vmax.f32 %v288_v53, 0.0 }
  0xc6   :  { %v252_v55 = vpop.f32.mrf.mxu0 }
  0xc7   :  { %v253_v57 = vadd.f32 %v3457_v30, %v252_v55  ;;  %v361_v55 = vpack.c.bf16 %v339_v54, %v338_v52 }
  0xc9   :  { %v325_v58 = vmax.f32 %v253_v57, 0.0  ;;  %486 = vmatmul.bf16.gmra.mxu3 %v361_v55  ;;  %v3539_v57 = vld [vmem:[%s4994_s7 + $0x1] ss:$0 sm:$0xff] }
  0xcb   :  { %v354_v59 = vpack.c.bf16 %v325_v58, %v324_v56  ;;  %v290_v56 = vpop.f32.mrf.mxu2 }
  0xcc   :  { %v291_v58 = vadd.f32 %v3457_v30, %v290_v56 }
  0xcd   :  { %451 = vmatmul.bf16.gmra.mxu1 %v354_v59 }
  0xce   :  { %v255_v62 = vpop.f32.mrf.mxu0 }
  0xcf   :  { %v256_v0 = vadd.f32 %v3457_v30, %v255_v62  ;;  %v340_v62 = vmax.f32 %v291_v58, 0.0 }
  0xd1   :  { %v326_v2 = vmax.f32 %v256_v0, 0.0 }
  0xd3   :  { %v292_v60 = vpop.f32.mrf.mxu2 }
  0xd4   :  { %v293_v63 = vadd.f32 %v3457_v30, %v292_v60 }
  0xd6   :  { %v257_v1 = vpop.f32.mrf.mxu0 }
  0xd7   :  { %v258_v3 = vadd.f32 %v3457_v30, %v257_v1  ;;  %v341_v1 = vmax.f32 %v293_v63, 0.0 }
  0xd9   :  { %v327_v4 = vmax.f32 %v258_v3, 0.0 }
  0xdb   :  { %v355_v5 = vpack.c.bf16 %v327_v4, %v326_v2  ;;  %v362_v2 = vpack.c.bf16 %v341_v1, %v340_v62  ;;  %v295_v4 = vpop.f32.mrf.mxu2 }
  0xdc   :  { %v296_v7 = vadd.f32 %v3457_v30, %v295_v4 }
  0xdd   :  { %456 = vmatmul.bf16.gmra.mxu1 %v355_v5  ;;  %491 = vmatmul.bf16.gmra.mxu3 %v362_v2 }
  0xde   :  { %v260_v8 = vpop.f32.mrf.mxu0 }
  0xdf   :  { %v261_v10 = vadd.f32 %v3457_v30, %v260_v8 }
  0xe1   :  { %v328_v12 = vmax.f32 %v261_v10, 0.0 }
  0xe3   :  { %v297_v9 = vpop.f32.mrf.mxu2 }
  0xe6   :  { %v262_v11 = vpop.f32.mrf.mxu0 }
  0xe7   :  { %v263_v13 = vadd.f32 %v3457_v30, %v262_v11  ;;  %v342_v11 = vmax.f32 %v296_v7, 0.0 }
  0xe9   :  { %v329_v14 = vmax.f32 %v263_v13, 0.0 }
  0xeb   :  { %v356_v15 = vpack.c.bf16 %v329_v14, %v328_v12  ;;  %v298_v12 = vadd.f32 %v3457_v30, %v297_v9  ;;  %v300_v17 = vpop.f32.mrf.mxu2 }
  0xed   :  { %461 = vmatmul.bf16.gmra.mxu1 %v356_v15  ;;  %v343_v14 = vmax.f32 %v298_v12, 0.0 }
  0xee   :  { %v265_v18 = vpop.f32.mrf.mxu0 }
  0xef   :  { %v266_v20 = vadd.f32 %v3457_v30, %v265_v18  ;;  %v363_v15 = vpack.c.bf16 %v343_v14, %v342_v11 }
  0xf1   :  { %v330_v22 = vmax.f32 %v266_v20, 0.0  ;;  %496 = vmatmul.bf16.gmra.mxu3 %v363_v15  ;;  %v301_v20 = vadd.f32 %v3457_v30, %v300_v17 }
  0xf6   :  { %v267_v21 = vpop.f32.mrf.mxu0 }
  0xf7   :  { %v268_v23 = vadd.f32 %v3457_v30, %v267_v21 }
  0xf9   :  { %v331_v24 = vmax.f32 %v268_v23, 0.0 }
  0xfb   :  { %v357_v25 = vpack.c.bf16 %v331_v24, %v330_v22  ;;  %v302_v22 = vpop.f32.mrf.mxu2  ;;  %v344_v24 = vmax.f32 %v301_v20, 0.0 }
  0xfd   :  { %466 = vmatmul.bf16.gmra.mxu1 %v357_v25  ;;  %v303_v25 = vadd.f32 %v3457_v30, %v302_v22 }
  0xfe   :  { %v270_v27 = vpop.f32.mrf.mxu0 }
  0xff   :  { %v271_v29 = vadd.f32 %v3457_v30, %v270_v27  ;;  %v345_v27 = vmax.f32 %v303_v25, 0.0 }
 0x101   :  { %v332_v32 = vmax.f32 %v271_v29, 0.0  ;;  %v364_v28 = vpack.c.bf16 %v345_v27, %v344_v24 }
 0x103   :  { %501 = vmatmul.bf16.gmra.mxu3 %v364_v28 }
 0x106   :  { %v272_v31 = vpop.f32.mrf.mxu0 }
 0x107   :  { %v273_v33 = vadd.f32 %v3457_v30, %v272_v31  ;;  %v305_v31 = vpop.f32.mrf.mxu2 }
 0x108   :  { %v306_v34 = vadd.f32 %v3457_v30, %v305_v31 }
 0x109   :  { %v333_v35 = vmax.f32 %v273_v33, 0.0 }
 0x10a   :  { %v346_v38 = vmax.f32 %v306_v34, 0.0 }
 0x10b   :  { %v358_v37 = vpack.c.bf16 %v333_v35, %v332_v32 }
 0x10d   :  { %471 = vmatmul.bf16.gmra.mxu1 %v358_v37 }
 0x10e   :  { %v275_v41 = vpop.f32.mrf.mxu0 }
 0x10f   :  { %v276_v44 = vadd.f32 %v3457_v30, %v275_v41  ;;  %v307_v36 = vpop.f32.mrf.mxu2 }
 0x110   :  { %v308_v39 = vadd.f32 %v3457_v30, %v307_v36 }
 0x111   :  { %v334_v46 = vmax.f32 %v276_v44, 0.0 }
 0x112   :  { %v347_v41 = vmax.f32 %v308_v39, 0.0 }
 0x114   :  { %v365_v42 = vpack.c.bf16 %v347_v41, %v346_v38 }
 0x116   :  { %v277_v45 = vpop.f32.mrf.mxu0  ;;  %506 = vmatmul.bf16.gmra.mxu3 %v365_v42 }
 0x117   :  { %v278_v47 = vadd.f32 %v3457_v30, %v277_v45  ;;  %v310_v44 = vpop.f32.mrf.mxu2 }
 0x119   :  { %v335_v49 = vmax.f32 %v278_v47, 0.0  ;;  %v311_v47 = vadd.f32 %v3457_v30, %v310_v44 }
 0x11b   :  { %v359_v51 = vpack.c.bf16 %v335_v49, %v334_v46 }
 0x11d   :  { %476 = vmatmul.bf16.gmra.mxu1 %v359_v51  ;;  %v348_v51 = vmax.f32 %v311_v47, 0.0 }
 0x11f   :  { %v312_v49 = vpop.f32.mrf.mxu2 }
 0x120   :  { %v313_v52 = vadd.f32 %v3457_v30, %v312_v49 }
 0x122   :  { %v349_v54 = vmax.f32 %v313_v52, 0.0 }
 0x124   :  { %v366_v55 = vpack.c.bf16 %v349_v54, %v348_v51 }
 0x126   :  { %511 = vmatmul.bf16.gmra.mxu3 %v366_v55 }
 0x127   :  { %v315_v58 = vpop.f32.mrf.mxu2 }
 0x12a   :  { %v442_v59 = vpop.f32.mrf.mxu1 }
 0x12b   :  { %v443_v61 = vadd.f32 %v3539_v57, %v442_v59 }
 0x12d   :  { %v522_v0 = vmax.f32 %v443_v61, 0.0  ;;  %v316_v61 = vadd.f32 %v3457_v30, %v315_v58 }
 0x12f   :  { %554 = vst [vmem:[%s4998_s8] sm:$0xff] %v522_v0  ;;  %618 = vmatmul.f32.vlgmr.msrb.gmra.mxu2 %v522_v0  ;;  %v317_v63 = vpop.f32.mrf.mxu2  ;;  %v350_v1 = vmax.f32 %v316_v61, 0.0 }
 0x130   :  { %v318_v2 = vadd.f32 %v3457_v30, %v317_v63 }
 0x132   :  { %v444_v3 = vpop.f32.mrf.mxu1  ;;  %v351_v4 = vmax.f32 %v318_v2, 0.0 }
 0x133   :  { %v445_v5 = vadd.f32 %v3539_v57, %v444_v3 }
 0x135   :  { %v523_v6 = vmax.f32 %v445_v5, 0.0  ;;  %v367_v5 = vpack.c.bf16 %v351_v4, %v350_v1 }
 0x137   :  { %555 = vst [vmem:[%s4998_s8 + $0x8] sm:$0xff] %v523_v6  ;;  %621 = vmatmul.f32.gmra.mxu2 %v523_v6  ;;  %516 = vmatmul.bf16.gmra.mxu3 %v367_v5 }
 0x13a   :  { %v447_v8 = vpop.f32.mrf.mxu1 }
 0x13b   :  { %v448_v10 = vadd.f32 %v3539_v57, %v447_v8 }
 0x13d   :  { %v524_v13 = vmax.f32 %v448_v10, 0.0 }
 0x13f   :  { %556 = vst [vmem:[%s4998_s8 + $0x10] sm:$0xff] %v524_v13  ;;  %624 = vmatmul.f32.gmra.mxu2 %v524_v13  ;;  %v482_v13 = vpop.f32.mrf.mxu3 }
 0x140   :  { %v483_v15 = vadd.f32 %v3539_v57, %v482_v13 }
 0x142   :  { %v449_v16 = vpop.f32.mrf.mxu1 }
 0x143   :  { %v450_v18 = vadd.f32 %v3539_v57, %v449_v16  ;;  %v538_v16 = vmax.f32 %v483_v15, 0.0 }
 0x145   :  { %v525_v19 = vmax.f32 %v450_v18, 0.0  ;;  %570 = vst [vmem:[%s4998_s8 + $0x80] sm:$0xff] %v538_v16 }
 0x147   :  { %557 = vst [vmem:[%s4998_s8 + $0x18] sm:$0xff] %v525_v19  ;;  %627 = vmatmul.f32.gmra.mxu2 %v525_v19  ;;  %v484_v19 = vpop.f32.mrf.mxu3 }
 0x14a   :  { %v452_v21 = vpop.f32.mrf.mxu1 }
 0x14b   :  { %v453_v23 = vadd.f32 %v3539_v57, %v452_v21  ;;  %v485_v21 = vadd.f32 %v3539_v57, %v484_v19 }
 0x14d   :  { %v526_v26 = vmax.f32 %v453_v23, 0.0  ;;  %v539_v22 = vmax.f32 %v485_v21, 0.0 }
 0x14f   :  { %558 = vst [vmem:[%s4998_s8 + $0x20] sm:$0xff] %v526_v26  ;;  %630 = vmatmul.f32.gmra.mxu2 %v526_v26  ;;  %v487_v25 = vpop.f32.mrf.mxu3 }
 0x150   :  { %571 = vst [vmem:[%s4998_s8 + $0x88] sm:$0xff] %v539_v22  ;;  %v488_v27 = vadd.f32 %v3539_v57, %v487_v25 }
 0x152   :  { %v454_v29 = vpop.f32.mrf.mxu1  ;;  %v540_v28 = vmax.f32 %v488_v27, 0.0 }
 0x153   :  { %v455_v32 = vadd.f32 %v3539_v57, %v454_v29 }
 0x154   :  { %572 = vst [vmem:[%s4998_s8 + $0x90] sm:$0xff] %v540_v28 }
 0x155   :  { %v527_v33 = vmax.f32 %v455_v32, 0.0 }
 0x157   :  { %559 = vst [vmem:[%s4998_s8 + $0x28] sm:$0xff] %v527_v33  ;;  %633 = vmatmul.f32.gmra.mxu2 %v527_v33  ;;  %v489_v29 = vpop.f32.mrf.mxu3  ;;  %v3633_v33 = vld [vmem:[%s4994_s7 + $0x4] ss:$0 sm:$0xff] }
 0x158   :  { %v490_v31 = vadd.f32 %v3539_v57, %v489_v29 }
 0x15a   :  { %v457_v35 = vpop.f32.mrf.mxu1  ;;  %v541_v32 = vmax.f32 %v490_v31, 0.0 }
 0x15b   :  { %v458_v37 = vadd.f32 %v3539_v57, %v457_v35 }
 0x15c   :  { %573 = vst [vmem:[%s4998_s8 + $0x98] sm:$0xff] %v541_v32 }
 0x15d   :  { %v528_v40 = vmax.f32 %v458_v37, 0.0 }
 0x15f   :  { %560 = vst [vmem:[%s4998_s8 + $0x30] sm:$0xff] %v528_v40  ;;  %636 = vmatmul.f32.gmra.mxu2 %v528_v40 }
 0x160   :  { %v492_v36 = vpop.f32.mrf.mxu3 }
 0x161   :  { %v493_v38 = vadd.f32 %v3539_v57, %v492_v36 }
 0x162   :  { %v459_v43 = vpop.f32.mrf.mxu1 }
 0x163   :  { %v460_v45 = vadd.f32 %v3539_v57, %v459_v43  ;;  %v542_v39 = vmax.f32 %v493_v38, 0.0 }
 0x165   :  { %v529_v46 = vmax.f32 %v460_v45, 0.0  ;;  %574 = vst [vmem:[%s4998_s8 + $0xa0] sm:$0xff] %v542_v39 }
 0x167   :  { %561 = vst [vmem:[%s4998_s8 + $0x38] sm:$0xff] %v529_v46  ;;  %639 = vmatmul.f32.gmra.mxu2 %v529_v46 }
 0x168   :  { %v494_v42 = vpop.f32.mrf.mxu3 }
 0x169   :  { %v495_v44 = vadd.f32 %v3539_v57, %v494_v42 }
 0x16a   :  { %v462_v48 = vpop.f32.mrf.mxu1 }
 0x16b   :  { %v463_v50 = vadd.f32 %v3539_v57, %v462_v48  ;;  %v543_v45 = vmax.f32 %v495_v44, 0.0 }
 0x16d   :  { %v530_v53 = vmax.f32 %v463_v50, 0.0  ;;  %575 = vst [vmem:[%s4998_s8 + $0xa8] sm:$0xff] %v543_v45 }
 0x16f   :  { %562 = vst [vmem:[%s4998_s8 + $0x40] sm:$0xff] %v530_v53  ;;  %642 = vmatmul.f32.gmra.mxu2 %v530_v53 }
 0x172   :  { %v464_v56 = vpop.f32.mrf.mxu1 }
 0x173   :  { %v465_v59 = vadd.f32 %v3539_v57, %v464_v56 }
 0x174   :  { %v497_v48 = vpop.f32.mrf.mxu3 }
 0x175   :  { %v531_v60 = vmax.f32 %v465_v59, 0.0  ;;  %v498_v50 = vadd.f32 %v3539_v57, %v497_v48 }
 0x177   :  { %563 = vst [vmem:[%s4998_s8 + $0x48] sm:$0xff] %v531_v60  ;;  %645 = vmatmul.f32.gmra.mxu2 %v531_v60  ;;  %v544_v51 = vmax.f32 %v498_v50, 0.0 }
 0x179   :  { %576 = vst [vmem:[%s4998_s8 + $0xb0] sm:$0xff] %v544_v51 }
 0x17a   :  { %v467_v62 = vpop.f32.mrf.mxu1 }
 0x17b   :  { %v468_v0 = vadd.f32 %v3539_v57, %v467_v62 }
 0x17c   :  { %v499_v54 = vpop.f32.mrf.mxu3 }
 0x17d   :  { %v532_v3 = vmax.f32 %v468_v0, 0.0  ;;  %v500_v56 = vadd.f32 %v3539_v57, %v499_v54 }
 0x17f   :  { %564 = vst [vmem:[%s4998_s8 + $0x50] sm:$0xff] %v532_v3  ;;  %648 = vmatmul.f32.gmra.mxu2 %v532_v3  ;;  %v545_v58 = vmax.f32 %v500_v56, 0.0 }
 0x181   :  { %577 = vst [vmem:[%s4998_s8 + $0xb8] sm:$0xff] %v545_v58 }
 0x182   :  { %v469_v6 = vpop.f32.mrf.mxu1 }
 0x183   :  { %v470_v7 = vadd.f32 %v3539_v57, %v469_v6 }
 0x185   :  { %v533_v8 = vmax.f32 %v470_v7, 0.0 }
 0x186   :  { %v502_v61 = vpop.f32.mrf.mxu3 }
 0x187   :  { %565 = vst [vmem:[%s4998_s8 + $0x58] sm:$0xff] %v533_v8  ;;  %651 = vmatmul.f32.gmra.mxu2 %v533_v8  ;;  %v503_v63 = vadd.f32 %v3539_v57, %v502_v61 }
 0x189   :  { %v546_v0 = vmax.f32 %v503_v63, 0.0 }
 0x18a   :  { %v472_v9 = vpop.f32.mrf.mxu1 }
 0x18b   :  { %v473_v30 = vadd.f32 %v3539_v57, %v472_v9  ;;  %578 = vst [vmem:[%s4998_s8 + $0xc0] sm:$0xff] %v546_v0 }
 0x18d   :  { %v534_v10 = vmax.f32 %v473_v30, 0.0 }
 0x18e   :  { %v504_v3 = vpop.f32.mrf.mxu3 }
 0x18f   :  { %566 = vst [vmem:[%s4998_s8 + $0x60] sm:$0xff] %v534_v10  ;;  %654 = vmatmul.f32.gmra.mxu2 %v534_v10  ;;  %v505_v5 = vadd.f32 %v3539_v57, %v504_v3 }
 0x191   :  { %v547_v6 = vmax.f32 %v505_v5, 0.0 }
 0x192   :  { %v474_v11 = vpop.f32.mrf.mxu1 }
 0x193   :  { %v475_v12 = vadd.f32 %v3539_v57, %v474_v11  ;;  %579 = vst [vmem:[%s4998_s8 + $0xc8] sm:$0xff] %v547_v6 }
 0x195   :  { %v535_v14 = vmax.f32 %v475_v12, 0.0 }
 0x197   :  { %567 = vst [vmem:[%s4998_s8 + $0x68] sm:$0xff] %v535_v14  ;;  %657 = vmatmul.f32.gmra.mxu2 %v535_v14 }
 0x199   :  { %v507_v9 = vpop.f32.mrf.mxu3 }
 0x19a   :  { %v477_v17 = vpop.f32.mrf.mxu1  ;;  %v508_v10 = vadd.f32 %v3539_v57, %v507_v9 }
 0x19b   :  { %v478_v18 = vadd.f32 %v3539_v57, %v477_v17 }
 0x19c   :  { %v548_v11 = vmax.f32 %v508_v10, 0.0 }
 0x19d   :  { %v536_v20 = vmax.f32 %v478_v18, 0.0 }
 0x19e   :  { %580 = vst [vmem:[%s4998_s8 + $0xd0] sm:$0xff] %v548_v11 }
 0x19f   :  { %568 = vst [vmem:[%s4998_s8 + $0x70] sm:$0xff] %v536_v20  ;;  %660 = vmatmul.f32.gmra.mxu2 %v536_v20 }
 0x1a1   :  { %v509_v12 = vpop.f32.mrf.mxu3 }
 0x1a2   :  { %v479_v23 = vpop.f32.mrf.mxu1  ;;  %v510_v13 = vadd.f32 %v3539_v57, %v509_v12 }
 0x1a3   :  { %v480_v24 = vadd.f32 %v3539_v57, %v479_v23 }
 0x1a4   :  { %v549_v14 = vmax.f32 %v510_v13, 0.0 }
 0x1a5   :  { %v537_v26 = vmax.f32 %v480_v24, 0.0 }
 0x1a6   :  { %581 = vst [vmem:[%s4998_s8 + $0xd8] sm:$0xff] %v549_v14 }
 0x1a7   :  { %569 = vst [vmem:[%s4998_s8 + $0x78] sm:$0xff] %v537_v26  ;;  %663 = vmatmul.f32.gmra.mxu2 %v537_v26 }
 0x1a9   :  { %v512_v15 = vpop.f32.mrf.mxu3 }
 0x1af   :  { %666 = vmatmul.f32.gmra.mxu2 %v538_v16  ;;  %v513_v16 = vadd.f32 %v3539_v57, %v512_v15 }
 0x1b1   :  { %v550_v17 = vmax.f32 %v513_v16, 0.0  ;;  %v514_v18 = vpop.f32.mrf.mxu3 }
 0x1b2   :  { %v619_v34 = vpop.f32.mrf.mxu2  ;;  %v515_v19 = vadd.f32 %v3539_v57, %v514_v18 }
 0x1b3   :  { %v715_v35 = vmul.f32 2.0, %v619_v34  ;;  %582 = vst [vmem:[%s4998_s8 + $0xe0] sm:$0xff] %v550_v17 }
 0x1b4   :  { %v551_v20 = vmax.f32 %v515_v19, 0.0 }
 0x1b5   :  { %v3639_v37 = vsub.f32 %v3633_v33, %v715_v35 }
 0x1b6   :  { %583 = vst [vmem:[%s4998_s8 + $0xe8] sm:$0xff] %v551_v20 }
 0x1b7   :  { %782 = vmin.xlane.f32.xlu0 %v3639_v37  ;;  %669 = vmatmul.f32.gmra.mxu2 %v539_v22 }
 0x1ba   :  { %v622_v40 = vpop.f32.mrf.mxu2  ;;  %v517_v21 = vpop.f32.mrf.mxu3 }
 0x1bb   :  { %v716_v41 = vmul.f32 2.0, %v622_v40  ;;  %v518_v22 = vadd.f32 %v3539_v57, %v517_v21 }
 0x1bd   :  { %v3647_v43 = vsub.f32 %v3633_v33, %v716_v41  ;;  %v552_v23 = vmax.f32 %v518_v22, 0.0 }
 0x1bf   :  { %784 = vmin.xlane.f32.xlu0 %v3647_v43  ;;  %672 = vmatmul.f32.gmra.mxu2 %v540_v28  ;;  %584 = vst [vmem:[%s4998_s8 + $0xf0] sm:$0xff] %v552_v23  ;;  %v780_v28 = vlaneseq }
 0x1c1   :  { %v3715_v29 = vand.u32 127, %v780_v28 }
 0x1c2   :  { %v625_v46 = vpop.f32.mrf.mxu2  ;;  %v519_v24 = vpop.f32.mrf.mxu3 }
 0x1c3   :  { %v717_v47 = vmul.f32 2.0, %v625_v46  ;;  %v520_v25 = vadd.f32 %v3539_v57, %v519_v24 }
 0x1c5   :  { %v3655_v49 = vsub.f32 %v3633_v33, %v717_v47  ;;  %v553_v26 = vmax.f32 %v520_v25, 0.0 }
 0x1c7   :  { %786 = vmin.xlane.f32.xlu1 %v3655_v49  ;;  %675 = vmatmul.f32.gmra.mxu2 %v541_v32  ;;  %585 = vst [vmem:[%s4998_s8 + $0xf8] sm:$0xff] %v553_v26 }
 0x1ca   :  { %v628_v52 = vpop.f32.mrf.mxu2 }
 0x1cb   :  { %v718_v53 = vmul.f32 2.0, %v628_v52 }
 0x1cd   :  { %v3663_v55 = vsub.f32 %v3633_v33, %v718_v53 }
 0x1cf   :  { %788 = vmin.xlane.f32.xlu1 %v3663_v55  ;;  %678 = vmatmul.f32.gmra.mxu2 %v542_v39 }
 0x1d2   :  { %v631_v59 = vpop.f32.mrf.mxu2 }
 0x1d3   :  { %v719_v60 = vmul.f32 2.0, %v631_v59 }
 0x1d5   :  { %v3671_v62 = vsub.f32 %v3633_v33, %v719_v60 }
 0x1d7   :  { %790 = vmin.xlane.f32.xlu2 %v3671_v62  ;;  %681 = vmatmul.f32.gmra.mxu2 %v543_v45 }
 0x1da   :  { %v634_v1 = vpop.f32.mrf.mxu2 }
 0x1db   :  { %v720_v2 = vmul.f32 2.0, %v634_v1 }
 0x1dd   :  { %v3679_v4 = vsub.f32 %v3633_v33, %v720_v2 }
 0x1df   :  { %792 = vmin.xlane.f32.xlu2 %v3679_v4  ;;  %684 = vmatmul.f32.gmra.mxu2 %v544_v51 }
 0x1e2   :  { %v637_v7 = vpop.f32.mrf.mxu2 }
 0x1e3   :  { %v721_v8 = vmul.f32 2.0, %v637_v7 }
 0x1e5   :  { %v3687_v30 = vsub.f32 %v3633_v33, %v721_v8 }
 0x1e7   :  { %794 = vmin.xlane.f32.xlu2 %v3687_v30  ;;  %687 = vmatmul.f32.gmra.mxu2 %v545_v58 }
 0x1ea   :  { %v640_v27 = vpop.f32.mrf.mxu2 }
 0x1eb   :  { %v722_v38 = vmul.f32 2.0, %v640_v27 }
 0x1ed   :  { %v3733_v41 = vsub.f32 %v3633_v33, %v722_v38 }
 0x1ef   :  { %690 = vmatmul.f32.gmra.mxu2 %v546_v0 }
 0x1f2   :  { %v643_v34 = vpop.f32.mrf.mxu2 }
 0x1f3   :  { %v723_v44 = vmul.f32 2.0, %v643_v34 }
 0x1f5   :  { %v3743_v47 = vsub.f32 %v3633_v33, %v723_v44 }
 0x1f7   :  { %693 = vmatmul.f32.gmra.mxu2 %v547_v6 }
 0x1fa   :  { %v646_v42 = vpop.f32.mrf.mxu2 }
 0x1fb   :  { %v724_v50 = vmul.f32 2.0, %v646_v42 }
 0x1fd   :  { %v3755_v54 = vsub.f32 %v3633_v33, %v724_v50 }
 0x1ff   :  { %696 = vmatmul.f32.gmra.mxu2 %v548_v11 }
 0x202   :  { %v649_v51 = vpop.f32.mrf.mxu2 }
 0x203   :  { %v725_v58 = vmul.f32 2.0, %v649_v51 }
 0x205   :  { %v3767_v63 = vsub.f32 %v3633_v33, %v725_v58 }
 0x207   :  { %699 = vmatmul.f32.gmra.mxu2 %v549_v14 }
 0x20a   :  { %v652_v60 = vpop.f32.mrf.mxu2 }
 0x20b   :  { %v726_v1 = vmul.f32 2.0, %v652_v60  ;;  %v3108_v60 = vld [vmem:[%s5000_s5 + $0x38] sm:$0xff] }
 0x20c   :  { %1802 = vmatpush.bf16.msrb.mxu0 %v3108_v60  ;;  %v3101_v60 = vld [vmem:[%s5000_s5] sm:$0xff] }
 0x20d   :  { %v3779_v5 = vsub.f32 %v3633_v33, %v726_v1 }
 0x20f   :  { %702 = vmatmul.f32.gmra.mxu2 %v550_v17 }
 0x212   :  { %v655_v6 = vpop.f32.mrf.mxu2 }
 0x213   :  { %v727_v25 = vmul.f32 2.0, %v655_v6 }
 0x217   :  { %705 = vmatmul.f32.gmra.mxu2 %v551_v20 }
 0x21a   :  { %v658_v11 = vpop.f32.mrf.mxu2 }
 0x21b   :  { %v728_v12 = vmul.f32 2.0, %v658_v11 }
 0x21d   :  { %v3794_v13 = vsub.f32 %v3633_v33, %v728_v12 }
 0x21f   :  { %708 = vmatmul.f32.gmra.mxu2 %v552_v23 }
 0x222   :  { %v661_v18 = vpop.f32.mrf.mxu2 }
 0x227   :  { %711 = vmatmul.f32.gmra.mxu2 %v553_v26 }
 0x22a   :  { %v783_v31 = vpop.xlane.xlu0 %782  ;;  %v664_v34 = vpop.f32.mrf.mxu2 }
 0x22b   :  { %vm846_vm0 = vcmp.le.f32.partialorder %v3639_v37, %v783_v31 }
 0x22c   :  { %v3719_v32 = vsel %vm846_vm0, %v3715_v29, 128 }
 0x22d   :  { %v911_v57 = vshra.s32 %v3719_v32, 16  ;;  %v910_v14 = vand.u32 65535, %v3719_v32 }
 0x22f   :  { %v3722_v35 = vcvt.s32.f32 %v911_v57  ;;  %v3820_v57 = vsub.f32 %v3633_v33, %v727_v25 }
 0x231   :  { %914 = vmin.xlane.f32.xlu0 %v3722_v35 }
 0x232   :  { %v785_v36 = vpop.xlane.xlu0 %784  ;;  %v667_v51 = vpop.f32.mrf.mxu2 }
 0x233   :  { %vm847_vm1 = vcmp.le.f32.partialorder %v3647_v43, %v785_v36 }
 0x234   :  { %v3727_v39 = vsel %vm847_vm1, %v3715_v29, 128 }
 0x235   :  { %v925_v40 = vshra.s32 %v3727_v39, 16  ;;  %v924_v17 = vand.u32 65535, %v3727_v39 }
 0x237   :  { %v3730_v37 = vcvt.s32.f32 %v925_v40  ;;  %v926_v21 = vcvt.s32.f32 %v924_v17 }
 0x239   :  { %928 = vmin.xlane.f32.xlu1 %v3730_v37  ;;  %796 = vmin.xlane.f32.xlu0 %v3733_v41 }
 0x23a   :  { %v787_v45 = vpop.xlane.xlu1 %786  ;;  %v670_v11 = vpop.f32.mrf.mxu2 }
 0x23b   :  { %vm848_vm2 = vcmp.le.f32.partialorder %v3655_v49, %v787_v45  ;;  %v732_v17 = vmul.f32 2.0, %v670_v11  ;;  %v3305_v11 = vmov 1.0  }
 0x23c   :  { %v3739_v43 = vsel %vm848_vm2, %v3715_v29, 128 }
 0x23d   :  { %v939_v46 = vshra.s32 %v3739_v43, 16  ;;  %v938_v27 = vand.u32 65535, %v3739_v43 }
 0x23f   :  { %v3745_v48 = vcvt.s32.f32 %v939_v46  ;;  %v940_v39 = vcvt.s32.f32 %v938_v27  ;;  %v3915_v27 = vsub.f32 %v3633_v33, %v732_v17 }
 0x241   :  { %942 = vmin.xlane.f32.xlu1 %v3745_v48  ;;  %798 = vmin.xlane.f32.xlu0 %v3743_v47 }
 0x242   :  { %v789_v52 = vpop.xlane.xlu1 %788 }
 0x243   :  { %vm849_vm3 = vcmp.le.f32.partialorder %v3663_v55, %v789_v52 }
 0x244   :  { %v3751_v49 = vsel %vm849_vm3, %v3715_v29, 128 }
 0x245   :  { %v953_v53 = vshra.s32 %v3751_v49, 16  ;;  %v952_v38 = vand.u32 65535, %v3751_v49 }
 0x247   :  { %v3757_v56 = vcvt.s32.f32 %v953_v53  ;;  %v954_v45 = vcvt.s32.f32 %v952_v38  ;;  %v1469_v53 = vld [vmem:[%s4999_s3 + $0x78] sm:$0xff] }
 0x248   :  { %1470 = vmatpush.msrb.mxu3 %v1469_v53  ;;  %v1456_v53 = vld [vmem:[%s4999_s3 + $0x10] sm:$0xff] }
 0x249   :  { %956 = vmin.xlane.f32.xlu2 %v3757_v56  ;;  %800 = vmin.xlane.f32.xlu1 %v3755_v54 }
 0x24a   :  { %v791_v59 = vpop.xlane.xlu2 %790 }
 0x24b   :  { %vm850_vm4 = vcmp.le.f32.partialorder %v3671_v62, %v791_v59 }
 0x24c   :  { %v3763_v55 = vsel %vm850_vm4, %v3715_v29, 128 }
 0x24d   :  { %v967_v61 = vshra.s32 %v3763_v55, 16 }
 0x24f   :  { %v3769_v0 = vcvt.s32.f32 %v967_v61  ;;  %v1467_v61 = vld [vmem:[%s4999_s3 + $0x68] sm:$0xff] }
 0x251   :  { %970 = vmin.xlane.f32.xlu2 %v3769_v0  ;;  %802 = vmin.xlane.f32.xlu1 %v3767_v63 }
 0x252   :  { %v793_v2 = vpop.xlane.xlu2 %792 }
 0x253   :  { %vm851_vm5 = vcmp.le.f32.partialorder %v3679_v4, %v793_v2  ;;  %v1466_v2 = vld [vmem:[%s4999_s3 + $0x60] sm:$0xff] }
 0x254   :  { %v3775_v62 = vsel %vm851_vm5, %v3715_v29, 128 }
 0x255   :  { %v981_v3 = vshra.s32 %v3775_v62, 16 }
 0x257   :  { %v3781_v7 = vcvt.s32.f32 %v981_v3  ;;  %v980_v3 = vand.u32 65535, %v3775_v62  ;;  %v1464_v62 = vld [vmem:[%s4999_s3 + $0x50] sm:$0xff] }
 0x259   :  { %984 = vmin.xlane.f32.xlu0 %v3781_v7  ;;  %804 = vmin.xlane.f32.xlu2 %v3779_v5 }
 0x25a   :  { %v795_v8 = vpop.xlane.xlu2 %794 }
 0x25b   :  { %vm852_vm6 = vcmp.le.f32.partialorder %v3687_v30, %v795_v8  ;;  %v912_v30 = vcvt.s32.f32 %v910_v14 }
 0x25c   :  { %v3787_v4 = vsel %vm852_vm6, %v3715_v29, 128 }
 0x25d   :  { %v995_v9 = vshra.s32 %v3787_v4, 16  ;;  %v994_v38 = vand.u32 65535, %v3787_v4  ;;  %v1458_v4 = vld [vmem:[%s4999_s3 + $0x20] sm:$0xff] }
 0x25f   :  { %v3790_v10 = vcvt.s32.f32 %v995_v9  ;;  %v1465_v9 = vld [vmem:[%s4999_s3 + $0x58] sm:$0xff] }
 0x261   :  { %998 = vmin.xlane.f32.xlu2 %v3790_v10 }
 0x269   :  { %808 = vmin.xlane.f32.xlu2 %v3794_v13 }
 0x2a4   :  { %v3798_v15 = vpop.xlane.xlu0 %914 }
 0x2a5   :  { %vm916_vm7 = vcmp.eq.f32.partialorder %v3722_v35, %v3798_v15 }
 0x2a6   :  { %v917_v16 = vsel %vm916_vm7, %v912_v30, inf }
 0x2a7   :  { %918 = vmin.xlane.f32.xlu0 %v917_v16  ;;  %v982_v16 = vcvt.s32.f32 %v980_v3  ;;  %v673_v3 = vpop.f32.mrf.mxu2 }
 0x2ac   :  { %v3803_v19 = vpop.xlane.xlu1 %928  ;;  %v797_v20 = vpop.xlane.xlu0 %796 }
 0x2ad   :  { %vm853_vm8 = vcmp.le.f32.partialorder %v3733_v41, %v797_v20  ;;  %vm930_vm9 = vcmp.eq.f32.partialorder %v3730_v37, %v3803_v19  ;;  %v730_v41 = vmul.f32 2.0, %v664_v34  ;;  %v3104_v34 = vld [vmem:[%s5000_s5 + $0x18] sm:$0xff] }
 0x2ae   :  { %v3809_v22 = vsel %vm853_vm8, %v3715_v29, 128  ;;  %v931_v23 = vsel %vm930_vm9, %v926_v21, inf }
 0x2af   :  { %932 = vmin.xlane.f32.xlu1 %v931_v23  ;;  %v1009_v24 = vshra.s32 %v3809_v22, 16  ;;  %v3843_v50 = vsub.f32 %v3633_v33, %v730_v41  ;;  %v3105_v23 = vld [vmem:[%s5000_s5 + $0x20] sm:$0xff]  ;;  %v1459_v41 = vld [vmem:[%s4999_s3 + $0x28] sm:$0xff] }
 0x2b1   :  { %v3812_v26 = vcvt.s32.f32 %v1009_v24  ;;  %v731_v24 = vmul.f32 2.0, %v667_v51 }
 0x2b3   :  { %1012 = vmin.xlane.f32.xlu0 %v3812_v26 }
 0x2b4   :  { %v3816_v31 = vpop.xlane.xlu1 %942  ;;  %v799_v32 = vpop.xlane.xlu0 %798 }
 0x2b5   :  { %vm854_vm10 = vcmp.le.f32.partialorder %v3743_v47, %v799_v32  ;;  %vm944_vm11 = vcmp.eq.f32.partialorder %v3745_v48, %v3816_v31  ;;  %v729_v47 = vmul.f32 2.0, %v661_v18  ;;  %v1463_v18 = vld [vmem:[%s4999_s3 + $0x48] sm:$0xff]  ;;  %v1461_v32 = vld [vmem:[%s4999_s3 + $0x38] sm:$0xff] }
 0x2b6   :  { %v3823_v35 = vsel %vm854_vm10, %v3715_v29, 128  ;;  %v945_v37 = vsel %vm944_vm11, %v940_v39, inf }
 0x2b7   :  { %806 = vmin.xlane.f32.xlu1 %v3820_v57  ;;  %v1023_v36 = vshra.s32 %v3823_v35, 16  ;;  %v3850_v49 = vsub.f32 %v3633_v33, %v729_v47 }
 0x2b9   :  { %v3830_v40 = vcvt.s32.f32 %v1023_v36  ;;  %v1460_v36 = vld [vmem:[%s4999_s3 + $0x30] sm:$0xff] }
 0x2bb   :  { %946 = vmin.xlane.f32.xlu0 %v945_v37  ;;  %1026 = vmin.xlane.f32.xlu2 %v3830_v40  ;;  %v3932_v37 = vsub.f32 %v3633_v33, %v731_v24 }
 0x2bc   :  { %v3833_v42 = vpop.xlane.xlu2 %956  ;;  %v801_v44 = vpop.xlane.xlu1 %800 }
 0x2bd   :  { %vm855_vm12 = vcmp.le.f32.partialorder %v3755_v54, %v801_v44  ;;  %vm958_vm13 = vcmp.eq.f32.partialorder %v3757_v56, %v3833_v42  ;;  %v1468_v54 = vld [vmem:[%s4999_s3 + $0x70] sm:$0xff]  ;;  %v966_v56 = vand.u32 65535, %v3763_v55  ;;  %v996_v44 = vcvt.s32.f32 %v994_v38 }
 0x2be   :  { %v3839_v43 = vsel %vm855_vm12, %v3715_v29, 128  ;;  %v959_v46 = vsel %vm958_vm13, %v954_v45, inf  ;;  %1471 = vmatpush.msrb.mxu3 %v1468_v54  ;;  %v3107_v55 = vld [vmem:[%s5000_s5 + $0x30] sm:$0xff]  ;;  %v1457_v45 = vld [vmem:[%s4999_s3 + $0x18] sm:$0xff]  ;;  %v1455_v54 = vld [vmem:[%s4999_s3 + $0x8] sm:$0xff] }
 0x2bf   :  { %960 = vmin.xlane.f32.xlu1 %v959_v46  ;;  %v1037_v48 = vshra.s32 %v3839_v43, 16  ;;  %v968_v6 = vcvt.s32.f32 %v966_v56  ;;  %1803 = vmatpush.bf16.msrb.mxu0 %v3107_v55  ;;  %v1454_v56 = vld [vmem:[%s4999_s3] sm:$0xff] }
 0x2c0   :  { %1472 = vmatpush.msrb.mxu3 %v1467_v61  ;;  %v921_v61 = vcvt.f32.s32 %v3798_v15 }
 0x2c1   :  { %v3845_v52 = vcvt.s32.f32 %v1037_v48 }
 0x2c2   :  { %1473 = vmatpush.msrb.mxu3 %v1466_v2 }
 0x2c3   :  { %1040 = vmin.xlane.f32.xlu0 %v3845_v52  ;;  %812 = vmin.xlane.f32.xlu2 %v3843_v50 }
 0x2c4   :  { %v3859_v58 = vpop.xlane.xlu2 %970  ;;  %v803_v59 = vpop.xlane.xlu1 %802  ;;  %1474 = vmatpush.msrb.mxu3 %v1465_v9  ;;  %v935_v9 = vcvt.f32.s32 %v3803_v19 }
 0x2c5   :  { %vm856_vm14 = vcmp.le.f32.partialorder %v3767_v63, %v803_v59  ;;  %vm972_vm15 = vcmp.eq.f32.partialorder %v3769_v0, %v3859_v58  ;;  %v3106_v0 = vld [vmem:[%s5000_s5 + $0x28] sm:$0xff] }
 0x2c6   :  { %v3869_v1 = vsel %vm856_vm14, %v3715_v29, 128  ;;  %v973_v12 = vsel %vm972_vm15, %v968_v6, inf  ;;  %1475 = vmatpush.msrb.mxu3 %v1464_v62  ;;  %1804 = vmatpush.bf16.msrb.mxu0 %v3106_v0  ;;  %v3102_v59 = vld [vmem:[%s5000_s5 + $0x8] sm:$0xff]  ;;  %v936_v62 = vshll.u32 %v935_v9, 16 }
 0x2c7   :  { %810 = vmin.xlane.f32.xlu1 %v3850_v49  ;;  %v1051_v63 = vshra.s32 %v3869_v1, 16  ;;  %v1050_v9 = vand.u32 65535, %v3869_v1 }
 0x2c8   :  { %1476 = vmatpush.msrb.mxu3 %v1463_v18  ;;  %v676_v18 = vpop.f32.mrf.mxu2 }
 0x2c9   :  { %v3882_v8 = vcvt.s32.f32 %v1051_v63  ;;  %v922_v63 = vshll.u32 %v921_v61, 16 }
 0x2ca   :  { %1805 = vmatpush.bf16.msrb.mxu0 %v3105_v23  ;;  %v1022_v23 = vand.u32 65535, %v3823_v35 }
 0x2cb   :  { %974 = vmin.xlane.f32.xlu0 %v973_v12  ;;  %1054 = vmin.xlane.f32.xlu2 %v3882_v8  ;;  %v1008_v12 = vand.u32 65535, %v3809_v22  ;;  %v949_v22 = vcvt.f32.s32 %v3816_v31 }
 0x2cc   :  { %v3894_v14 = vpop.xlane.xlu0 %984  ;;  %v805_v30 = vpop.xlane.xlu2 %804  ;;  %v1024_v38 = vcvt.s32.f32 %v1022_v23 }
 0x2cd   :  { %vm857_vm0 = vcmp.le.f32.partialorder %v3779_v5, %v805_v30  ;;  %vm986_vm1 = vcmp.eq.f32.partialorder %v3781_v7, %v3894_v14  ;;  %v1462_v7 = vld [vmem:[%s4999_s3 + $0x40] sm:$0xff]  ;;  %v1010_v15 = vcvt.s32.f32 %v1008_v12 }
 0x2ce   :  { %v3903_v20 = vsel %vm857_vm0, %v3715_v29, 128  ;;  %v987_v21 = vsel %vm986_vm1, %v982_v16, inf  ;;  %1477 = vmatpush.msrb.mxu3 %v1462_v7  ;;  %1806 = vmatpush.bf16.msrb.mxu0 %v3104_v34  ;;  %v733_v7 = vmul.f32 2.0, %v673_v3 }
 0x2cf   :  { %988 = vmin.xlane.f32.xlu1 %v987_v21  ;;  %v1065_v5 = vshra.s32 %v3903_v20, 16  ;;  %v3306_v21 = vmov 1.0|1.0   ;;  %v1064_v1 = vand.u32 65535, %v3903_v20  ;;  %v3115_v20 = vld [vmem:[%s5001_s6 + $0x30] sm:$0xff] }
 0x2d0   :  { %1478 = vmatpush.msrb.mxu3 %v1461_v32  ;;  %v950_v32 = vshll.u32 %v949_v22, 16  ;;  %v3999_v35 = vsub.f32 %v3633_v33, %v733_v7 }
 0x2d1   :  { %v3912_v25 = vcvt.s32.f32 %v1065_v5 }
 0x2d2   :  { %1479 = vmatpush.msrb.mxu3 %v1460_v36 }
 0x2d3   :  { %1068 = vmin.xlane.f32.xlu0 %v3912_v25  ;;  %816 = vmin.xlane.f32.xlu2 %v3915_v27 }
 0x2d4   :  { %v3929_v39 = vpop.xlane.xlu2 %998  ;;  %1480 = vmatpush.msrb.mxu3 %v1459_v41  ;;  %v963_v41 = vcvt.f32.s32 %v3833_v42 }
 0x2d5   :  { %vm1000_vm2 = vcmp.eq.f32.partialorder %v3790_v10, %v3929_v39 }
 0x2d6   :  { %v1001_v46 = vsel %vm1000_vm2, %v996_v44, inf  ;;  %1481 = vmatpush.msrb.mxu3 %v1458_v4  ;;  %v679_v44 = vpop.f32.mrf.mxu2 }
 0x2d7   :  { %814 = vmin.xlane.f32.xlu1 %v3932_v37 }
 0x2d8   :  { %1482 = vmatpush.msrb.mxu3 %v1457_v45 }
 0x2da   :  { %1483 = vmatpush.msrb.mxu3 %v1456_v53 }
 0x2db   :  { %1002 = vmin.xlane.f32.xlu0 %v1001_v46  ;;  %v1036_v46 = vand.u32 65535, %v3839_v43 }
 0x2dc   :  { %v809_v47 = vpop.xlane.xlu2 %808  ;;  %1484 = vmatpush.msrb.mxu3 %v1455_v54 }
 0x2dd   :  { %vm859_vm3 = vcmp.le.f32.partialorder %v3794_v13, %v809_v47  ;;  %v3103_v13 = vld [vmem:[%s5000_s5 + $0x10] sm:$0xff]  ;;  %v734_v47 = vmul.f32 2.0, %v676_v18 }
 0x2de   :  { %v3948_v48 = vsel %vm859_vm3, %v3715_v29, 128  ;;  %1807 = vmatpush.bf16.msrb.mxu0 %v3103_v13  ;;  %1485 = vmatpush.msrb.mxu3 %v1454_v56  ;;  %v1038_v56 = vcvt.s32.f32 %v1036_v46 }
 0x2df   :  { %v1093_v10 = vshra.s32 %v3948_v48, 16  ;;  %v4013_v43 = vsub.f32 %v3633_v33, %v734_v47 }
 0x2e1   :  { %v3951_v51 = vcvt.s32.f32 %v1093_v10  ;;  %v964_v10 = vshll.u32 %v963_v41, 16 }
 0x2e2   :  { %1808 = vmatpush.bf16.msrb.mxu0 %v3102_v59 }
 0x2e3   :  { %1096 = vmin.xlane.f32.xlu0 %v3951_v51 }
 0x2e6   :  { %1809 = vmatpush.bf16.msrb.mxu0 %v3101_v60 }
 0x31a   :  { %v919_v55 = vpop.xlane.xlu0 %918 }
 0x31b   :  { %v920_v2 = vcvt.f32.s32 %v919_v55  ;;  %v682_v55 = vpop.f32.mrf.mxu2 }
 0x31c   :  { %v736_v22 = vmul.f32 2.0, %v682_v55 }
 0x31d   :  { %v923_v6 = vadd.s32 %v922_v63, %v920_v2  ;;  %v735_v2 = vmul.f32 2.0, %v679_v44  ;;  %v1005_v44 = vcvt.f32.s32 %v3929_v39 }
 0x31e   :  { %v4066_v41 = vsub.f32 %v3633_v33, %v736_v22 }
 0x31f   :  { %vm1358_vm4 = vcmp.eq.s32.totalorder %v3715_v29, %v923_v6 }
 0x320   :  { %2909 = vmatmul.msk.f32.vlgmr.msrb.gmra.mxu3 %vm1358_vm4, %v3305_v11 }
 0x322   :  { %v933_v0 = vpop.xlane.xlu1 %932 }
 0x323   :  { %v934_v30 = vcvt.f32.s32 %v933_v0  ;;  %v991_v0 = vcvt.f32.s32 %v3894_v14  ;;  %v3116_v14 = vld [vmem:[%s5001_s6 + $0x38] sm:$0xff]  ;;  %v685_v7 = vpop.f32.mrf.mxu2 }
 0x324   :  { %2004 = vmatpush.bf16.msrb.mxu1 %v3116_v14  ;;  %v737_v46 = vmul.f32 2.0, %v685_v7 }
 0x325   :  { %v937_v16 = vadd.s32 %v936_v62, %v934_v30  ;;  %v992_v23 = vshll.u32 %v991_v0, 16  ;;  %v3110_v0 = vld [vmem:[%s5001_s6 + $0x8] sm:$0xff] }
 0x326   :  { %v3977_v17 = vpop.xlane.xlu0 %1012 }
 0x327   :  { %vm1359_vm5 = vcmp.eq.s32.totalorder %v3715_v29, %v937_v16  ;;  %vm1014_vm6 = vcmp.eq.f32.partialorder %v3812_v26, %v3977_v17  ;;  %v4042_v16 = vsub.f32 %v3633_v33, %v735_v2 }
 0x328   :  { %2910 = vmatmul.msk.f32.gmra.mxu3 %vm1359_vm5, %v3305_v11  ;;  %vm2973_vm7 = vmpackc.low %vm1359_vm5, %vm1358_vm4  ;;  %v1015_v19 = vsel %vm1014_vm6, %v1010_v15, inf  ;;  %2005 = vmatpush.bf16.msrb.mxu1 %v3115_v20 }
 0x329   :  { %2974 = vmatmul.msk.bf16.vlgmr.msrb.gmra.mxu0 %vm2973_vm7, %v3306_v21  ;;  %1016 = vmin.xlane.f32.xlu1 %v1015_v19  ;;  %v1052_v19 = vcvt.s32.f32 %v1050_v9 }
 0x32a   :  { %v807_v5 = vpop.xlane.xlu1 %806 }
 0x32b   :  { %vm858_vm8 = vcmp.le.f32.partialorder %v3820_v57, %v807_v5 }
 0x32c   :  { %v3988_v24 = vsel %vm858_vm8, %v3715_v29, 128 }
 0x32d   :  { %v1079_v26 = vshra.s32 %v3988_v24, 16 }
 0x32e   :  { %v947_v34 = vpop.xlane.xlu0 %946  ;;  %v3991_v36 = vpop.xlane.xlu2 %1026 }
 0x32f   :  { %v948_v4 = vcvt.f32.s32 %v947_v34  ;;  %vm1028_vm9 = vcmp.eq.f32.partialorder %v3830_v40, %v3991_v36  ;;  %v3996_v31 = vcvt.s32.f32 %v1079_v26 }
 0x330   :  { %v1029_v57 = vsel %vm1028_vm9, %v1024_v38, inf  ;;  %v1066_v38 = vcvt.s32.f32 %v1064_v1 }
 0x331   :  { %v951_v45 = vadd.s32 %v950_v32, %v948_v4  ;;  %1030 = vmin.xlane.f32.xlu0 %v1029_v57  ;;  %1082 = vmin.xlane.f32.xlu2 %v3996_v31 }
 0x332   :  { %818 = vmin.xlane.f32.xlu1 %v3999_v35  ;;  %v961_v42 = vpop.xlane.xlu1 %960 }
 0x333   :  { %v962_v53 = vcvt.f32.s32 %v961_v42  ;;  %vm1360_vm10 = vcmp.eq.s32.totalorder %v3715_v29, %v951_v45 }
 0x334   :  { %2911 = vmatmul.msk.f32.gmra.mxu3 %vm1360_vm10, %v3305_v11 }
 0x335   :  { %v965_v40 = vadd.s32 %v964_v10, %v962_v53  ;;  %v1006_v53 = vshll.u32 %v1005_v44, 16  ;;  %v4158_v44 = vld [vmem:[%s4994_s7 + $0x2] ss:$0 sm:$0xff] }
 0x336   :  { %v4006_v54 = vpop.xlane.xlu0 %1040  ;;  %v813_v13 = vpop.xlane.xlu2 %812 }
 0x337   :  { %vm861_vm11 = vcmp.le.f32.partialorder %v3843_v50, %v813_v13  ;;  %vm1361_vm12 = vcmp.eq.s32.totalorder %v3715_v29, %v965_v40  ;;  %vm1042_vm13 = vcmp.eq.f32.partialorder %v3845_v52, %v4006_v54  ;;  %v977_v52 = vcvt.f32.s32 %v3859_v58 }
 0x338   :  { %v4016_v59 = vsel %vm861_vm11, %v3715_v29, 128  ;;  %vm2975_vm14 = vmpackc.low %vm1361_vm12, %vm1360_vm10  ;;  %v1043_v60 = vsel %vm1042_vm13, %v1038_v56, inf  ;;  %v4093_v13 = vsub.f32 %v3633_v33, %v737_v46 }
 0x339   :  { %2976 = vmatmul.msk.bf16.gmra.mxu0 %vm2975_vm14, %v3306_v21  ;;  %820 = vmin.xlane.f32.xlu2 %v4013_v43  ;;  %v1121_v50 = vshra.s32 %v4016_v59, 16 }
 0x33a   :  { %1044 = vmin.xlane.f32.xlu1 %v1043_v60  ;;  %v811_v61 = vpop.xlane.xlu1 %810  ;;  %v1092_v60 = vand.u32 65535, %v3948_v48 }
 0x33b   :  { %vm860_vm15 = vcmp.le.f32.partialorder %v3850_v49, %v811_v61  ;;  %v4025_v63 = vcvt.s32.f32 %v1121_v50  ;;  %v978_v49 = vshll.u32 %v977_v52, 16 }
 0x33c   :  { %v4028_v3 = vsel %vm860_vm15, %v3715_v29, 128  ;;  %2912 = vmatmul.msk.f32.gmra.mxu3 %vm1361_vm12, %v3305_v11  ;;  %v1094_v55 = vcvt.s32.f32 %v1092_v60 }
 0x33d   :  { %1124 = vmin.xlane.f32.xlu0 %v4025_v63  ;;  %v1107_v6 = vshra.s32 %v4028_v3, 16 }
 0x33e   :  { %v975_v12 = vpop.xlane.xlu0 %974  ;;  %v4036_v58 = vpop.xlane.xlu2 %1054 }
 0x33f   :  { %v976_v62 = vcvt.f32.s32 %v975_v12  ;;  %v4039_v30 = vcvt.s32.f32 %v1107_v6  ;;  %vm1056_vm0 = vcmp.eq.f32.partialorder %v3882_v8, %v4036_v58  ;;  %v3114_v12 = vld [vmem:[%s5001_s6 + $0x28] sm:$0xff] }
 0x340   :  { %v1057_v8 = vsel %vm1056_vm0, %v1052_v19, inf  ;;  %2006 = vmatpush.bf16.msrb.mxu1 %v3114_v12 }
 0x341   :  { %v979_v15 = vadd.s32 %v978_v49, %v976_v62  ;;  %1110 = vmin.xlane.f32.xlu2 %v4039_v30  ;;  %v3112_v49 = vld [vmem:[%s5001_s6 + $0x18] sm:$0xff]  ;;  %v3109_v62 = vld [vmem:[%s5001_s6] sm:$0xff] }
 0x342   :  { %822 = vmin.xlane.f32.xlu1 %v4042_v16  ;;  %v989_v18 = vpop.xlane.xlu1 %988 }
 0x343   :  { %v990_v5 = vcvt.f32.s32 %v989_v18  ;;  %vm1362_vm1 = vcmp.eq.s32.totalorder %v3715_v29, %v979_v15  ;;  %v1019_v15 = vcvt.f32.s32 %v3977_v17 }
 0x344   :  { %2913 = vmatmul.msk.f32.gmra.mxu3 %vm1362_vm1, %v3305_v11 }
 0x345   :  { %v993_v26 = vadd.s32 %v992_v23, %v990_v5  ;;  %1058 = vmin.xlane.f32.xlu0 %v1057_v8  ;;  %v1020_v18 = vshll.u32 %v1019_v15, 16  ;;  %v1078_v23 = vand.u32 65535, %v3988_v24  ;;  %v1033_v5 = vcvt.f32.s32 %v3991_v36 }
 0x346   :  { %v4059_v32 = vpop.xlane.xlu0 %1068  ;;  %v817_v34 = vpop.xlane.xlu2 %816 }
 0x347   :  { %vm863_vm2 = vcmp.le.f32.partialorder %v3915_v27, %v817_v34  ;;  %vm1363_vm3 = vcmp.eq.s32.totalorder %v3715_v29, %v993_v26  ;;  %vm1070_vm4 = vcmp.eq.f32.partialorder %v3912_v25, %v4059_v32  ;;  %v1080_v36 = vcvt.s32.f32 %v1078_v23 }
 0x348   :  { %v4069_v4 = vsel %vm863_vm2, %v3715_v29, 128  ;;  %vm2977_vm5 = vmpackc.low %vm1363_vm3, %vm1362_vm1  ;;  %v1071_v57 = vsel %vm1070_vm4, %v1066_v38, inf  ;;  %v1034_v20 = vshll.u32 %v1033_v5, 16 }
 0x349   :  { %2978 = vmatmul.msk.bf16.gmra.mxu0 %vm2977_vm5, %v3306_v21  ;;  %824 = vmin.xlane.f32.xlu2 %v4066_v41  ;;  %v1149_v27 = vshra.s32 %v4069_v4, 16 }
 0x34a   :  { %1072 = vmin.xlane.f32.xlu1 %v1071_v57  ;;  %v815_v25 = vpop.xlane.xlu1 %814 }
 0x34b   :  { %vm862_vm6 = vcmp.le.f32.partialorder %v3932_v37, %v815_v25  ;;  %v4080_v45 = vcvt.s32.f32 %v1149_v27  ;;  %v688_v37 = vpop.f32.mrf.mxu2 }
 0x34c   :  { %v4083_v42 = vsel %vm862_vm6, %v3715_v29, 128  ;;  %2914 = vmatmul.msk.f32.gmra.mxu3 %vm1363_vm3, %v3305_v11  ;;  %v738_v50 = vmul.f32 2.0, %v688_v37 }
 0x34d   :  { %1152 = vmin.xlane.f32.xlu0 %v4080_v45  ;;  %v1135_v47 = vshra.s32 %v4083_v42, 16 }
 0x34e   :  { %v1003_v10 = vpop.xlane.xlu0 %1002  ;;  %v4107_v52 = vsub.f32 %v3633_v33, %v738_v50 }
 0x34f   :  { %v1004_v40 = vcvt.f32.s32 %v1003_v10  ;;  %v4090_v39 = vcvt.s32.f32 %v1135_v47  ;;  %v1120_v10 = vand.u32 65535, %v4016_v59 }
 0x351   :  { %v1007_v56 = vadd.s32 %v1006_v53, %v1004_v40  ;;  %1138 = vmin.xlane.f32.xlu2 %v4090_v39  ;;  %v1122_v12 = vcvt.s32.f32 %v1120_v10 }
 0x352   :  { %826 = vmin.xlane.f32.xlu1 %v4093_v13 }
 0x353   :  { %vm1364_vm7 = vcmp.eq.s32.totalorder %v3715_v29, %v1007_v56  ;;  %v691_v48 = vpop.f32.mrf.mxu2 }
 0x354   :  { %2915 = vmatmul.msk.f32.gmra.mxu3 %vm1364_vm7, %v3305_v11  ;;  %v739_v6 = vmul.f32 2.0, %v691_v48 }
 0x356   :  { %v4102_v61 = vpop.xlane.xlu0 %1096  ;;  %v4111_v9 = vsub.f32 %v3633_v33, %v739_v6  ;;  %v3111_v33 = vld [vmem:[%s5001_s6 + $0x10] sm:$0xff] }
 0x357   :  { %vm1098_vm8 = vcmp.eq.f32.partialorder %v3951_v51, %v4102_v61  ;;  %v3113_v51 = vld [vmem:[%s5001_s6 + $0x20] sm:$0xff] }
 0x358   :  { %v1099_v2 = vsel %vm1098_vm8, %v1094_v55, inf  ;;  %2007 = vmatpush.bf16.msrb.mxu1 %v3113_v51 }
 0x359   :  { %828 = vmin.xlane.f32.xlu2 %v4107_v52 }
 0x35a   :  { %1100 = vmin.xlane.f32.xlu1 %v1099_v2 }
 0x35b   :  { %v694_v22 = vpop.f32.mrf.mxu2 }
 0x35c   :  { %2008 = vmatpush.bf16.msrb.mxu1 %v3112_v49  ;;  %v740_v59 = vmul.f32 2.0, %v694_v22 }
 0x360   :  { %2009 = vmatpush.bf16.msrb.mxu1 %v3111_v33 }
 0x362   :  { %830 = vmin.xlane.f32.xlu1 %v4111_v9 }
 0x363   :  { %v697_v46 = vpop.f32.mrf.mxu2 }
 0x364   :  { %2010 = vmatpush.bf16.msrb.mxu1 %v3110_v0  ;;  %v4196_v0 = vld [vmem:[%s4994_s7 + $0x4] ss:$0 sm:$0xff]  ;;  %v741_v22 = vmul.f32 2.0, %v697_v46 }
 0x368   :  { %2011 = vmatpush.bf16.msrb.mxu1 %v3109_v62  ;;  %v4199_v62 = vsub.f32 %v4196_v0, %v740_v59 }
 0x39c   :  { %v1017_v1 = vpop.xlane.xlu1 %1016 }
 0x39d   :  { %v1018_v19 = vcvt.f32.s32 %v1017_v1  ;;  %v1106_v1 = vand.u32 65535, %v4028_v3 }
 0x39f   :  { %v1021_v14 = vadd.s32 %v1020_v18, %v1018_v19  ;;  %v1061_v19 = vcvt.f32.s32 %v4036_v58  ;;  %v1108_v58 = vcvt.s32.f32 %v1106_v1 }
 0x3a1   :  { %vm1365_vm9 = vcmp.eq.s32.totalorder %v3715_v29, %v1021_v14 }
 0x3a2   :  { %2916 = vmatmul.msk.f32.gmra.mxu3 %vm1365_vm9, %v3305_v11  ;;  %vm2979_vm10 = vmpackc.low %vm1365_vm9, %vm1364_vm7 }
 0x3a3   :  { %v4139_v8 = vpop.f32.mrf.mxu3  ;;  %2980 = vmatmul.msk.bf16.gmra.mxu0 %vm2979_vm10, %v3306_v21 }
 0x3a4   :  { %1583 = vst [vmem:[%s5002_s9] sm:$0xff] %v4139_v8  ;;  %v1031_v17 = vpop.xlane.xlu0 %1030  ;;  %v4146_v24 = vpop.xlane.xlu2 %1082 }
 0x3a5   :  { %v1032_v7 = vcvt.f32.s32 %v1031_v17  ;;  %v819_v26 = vpop.xlane.xlu1 %818  ;;  %vm1084_vm11 = vcmp.eq.f32.partialorder %v3996_v31, %v4146_v24  ;;  %v1047_v31 = vcvt.f32.s32 %v4006_v54 }
 0x3a6   :  { %vm864_vm12 = vcmp.le.f32.partialorder %v3999_v35, %v819_v26  ;;  %v1811_v34 = vpop.f32.mrf.mxu0  ;;  %v1085_v38 = vsel %vm1084_vm11, %v1080_v36, inf }
 0x3a7   :  { %v1035_v57 = vadd.s32 %v1034_v20, %v1032_v7  ;;  %v4152_v27 = vsel %vm864_vm12, %v3715_v29, 128  ;;  %1086 = vmin.xlane.f32.xlu0 %v1085_v38  ;;  %v1812_v54 = vadd.f32 %v4158_v44, %v1811_v34  ;;  %v1048_v37 = vshll.u32 %v1047_v31, 16 }
 0x3a8   :  { %v1163_v25 = vshra.s32 %v4152_v27, 16  ;;  %v1062_v20 = vshll.u32 %v1061_v19, 16  ;;  %v1075_v7 = vcvt.f32.s32 %v4059_v32  ;;  %v4224_v38 = vsub.f32 %v4196_v0, %v741_v22 }
 0x3a9   :  { %vm1366_vm13 = vcmp.eq.s32.totalorder %v3715_v29, %v1035_v57  ;;  %v1891_v51 = vmax.f32 %v1812_v54, 0.0  ;;  %v1148_v57 = vand.u32 65535, %v4069_v4 }
 0x3aa   :  { %2917 = vmatmul.msk.f32.gmra.mxu3 %vm1366_vm13, %v3305_v11  ;;  %v4165_v35 = vcvt.s32.f32 %v1163_v25  ;;  %v1076_v10 = vshll.u32 %v1075_v7, 16 }
 0x3ab   :  { %v4167_v47 = vpop.f32.mrf.mxu3 }
 0x3ac   :  { %1584 = vst [vmem:[%s5002_s9 + $0x8] sm:$0xff] %v4167_v47  ;;  %1166 = vmin.xlane.f32.xlu2 %v4165_v35  ;;  %v821_v53 = vpop.xlane.xlu2 %820 }
 0x3ad   :  { %v1045_v40 = vpop.xlane.xlu1 %1044  ;;  %vm865_vm14 = vcmp.le.f32.partialorder %v4013_v43, %v821_v53 }
 0x3ae   :  { %v1046_v56 = vcvt.f32.s32 %v1045_v40  ;;  %v4178_v60 = vsel %vm865_vm14, %v3715_v29, 128  ;;  %v1813_v50 = vpop.f32.mrf.mxu0 }
 0x3af   :  { %v1814_v55 = vadd.f32 %v4158_v44, %v1813_v50  ;;  %v1177_v2 = vshra.s32 %v4178_v60, 16 }
 0x3b0   :  { %v1049_v48 = vadd.s32 %v1048_v37, %v1046_v56  ;;  %v4182_v6 = vpop.xlane.xlu0 %1124 }
 0x3b1   :  { %v1892_v49 = vmax.f32 %v1814_v55, 0.0  ;;  %v4184_v33 = vcvt.s32.f32 %v1177_v2  ;;  %vm1126_vm15 = vcmp.eq.f32.partialorder %v4025_v63, %v4182_v6  ;;  %v700_v63 = vpop.f32.mrf.mxu2  ;;  %v1150_v55 = vcvt.s32.f32 %v1148_v57 }
 0x3b2   :  { %vm1367_vm0 = vcmp.eq.s32.totalorder %v3715_v29, %v1049_v48  ;;  %v1127_v43 = vsel %vm1126_vm15, %v1122_v12, inf  ;;  %v742_v40 = vmul.f32 2.0, %v700_v63 }
 0x3b3   :  { %2918 = vmatmul.msk.f32.gmra.mxu3 %vm1367_vm0, %v3305_v11  ;;  %vm2981_vm1 = vmpackc.low %vm1367_vm0, %vm1366_vm13  ;;  %1180 = vmin.xlane.f32.xlu0 %v4184_v33  ;;  %v1923_v15 = vpack.c.bf16 %v1892_v49, %v1891_v51 }
 0x3b4   :  { %2982 = vmatmul.msk.bf16.gmra.mxu0 %vm2981_vm1, %v3306_v21  ;;  %1128 = vmin.xlane.f32.xlu1 %v1127_v43  ;;  %v4203_v18 = vpop.xlane.xlu2 %1110  ;;  %v4257_v49 = vsub.f32 %v4196_v0, %v742_v40 }
 0x3b5   :  { %832 = vmin.xlane.f32.xlu2 %v4199_v62  ;;  %v823_v14 = vpop.xlane.xlu1 %822  ;;  %2012 = vmatmul.bf16.vlgmr.msrb.gmra.mxu1 %v1923_v15  ;;  %vm1112_vm3 = vcmp.eq.f32.partialorder %v4039_v30, %v4203_v18  ;;  %v1134_v15 = vand.u32 65535, %v4083_v42 }
 0x3b6   :  { %vm866_vm2 = vcmp.le.f32.partialorder %v4042_v16, %v823_v14  ;;  %v1816_v23 = vpop.f32.mrf.mxu0  ;;  %v1113_v26 = vsel %vm1112_vm3, %v1108_v58, inf }
 0x3b7   :  { %v4209_v5 = vsel %vm866_vm2, %v3715_v29, 128  ;;  %v4211_v17 = vpop.f32.mrf.mxu3  ;;  %v1817_v46 = vadd.f32 %v4158_v44, %v1816_v23  ;;  %v1136_v23 = vcvt.s32.f32 %v1134_v15 }
 0x3b8   :  { %1585 = vst [vmem:[%s5002_s9 + $0x10] sm:$0xff] %v4211_v17  ;;  %v1059_v3 = vpop.xlane.xlu0 %1058  ;;  %v1191_v36 = vshra.s32 %v4209_v5, 16 }
 0x3b9   :  { %v1060_v16 = vcvt.f32.s32 %v1059_v3  ;;  %v703_v32 = vpop.f32.mrf.mxu2  ;;  %v1893_v2 = vmax.f32 %v1817_v46, 0.0 }
 0x3ba   :  { %v4221_v34 = vcvt.s32.f32 %v1191_v36  ;;  %v743_v1 = vmul.f32 2.0, %v703_v32 }
 0x3bb   :  { %v1063_v30 = vadd.s32 %v1062_v20, %v1060_v16  ;;  %1114 = vmin.xlane.f32.xlu0 %v1113_v26 }
 0x3bc   :  { %834 = vmin.xlane.f32.xlu1 %v4224_v38  ;;  %v825_v25 = vpop.xlane.xlu2 %824  ;;  %v4281_v36 = vsub.f32 %v4196_v0, %v743_v1 }
 0x3bd   :  { %1194 = vmin.xlane.f32.xlu2 %v4221_v34  ;;  %v1073_v31 = vpop.xlane.xlu1 %1072  ;;  %vm867_vm4 = vcmp.le.f32.partialorder %v4066_v41, %v825_v25  ;;  %vm1368_vm5 = vcmp.eq.s32.totalorder %v3715_v29, %v1063_v30 }
 0x3be   :  { %v1074_v53 = vcvt.f32.s32 %v1073_v31  ;;  %v4233_v54 = vsel %vm867_vm4, %v3715_v29, 128  ;;  %2919 = vmatmul.msk.f32.gmra.mxu3 %vm1368_vm5, %v3305_v11  ;;  %v1818_v4 = vpop.f32.mrf.mxu0 }
 0x3bf   :  { %v1819_v37 = vadd.f32 %v4158_v44, %v1818_v4  ;;  %v4239_v56 = vpop.f32.mrf.mxu3  ;;  %v1205_v41 = vshra.s32 %v4233_v54, 16 }
 0x3c0   :  { %v1077_v50 = vadd.s32 %v1076_v10, %v1074_v53  ;;  %1586 = vst [vmem:[%s5002_s9 + $0x18] sm:$0xff] %v4239_v56  ;;  %v4246_v59 = vpop.xlane.xlu0 %1152 }
 0x3c1   :  { %v1894_v48 = vmax.f32 %v1819_v37, 0.0  ;;  %v4248_v12 = vcvt.s32.f32 %v1205_v41  ;;  %vm1154_vm6 = vcmp.eq.f32.partialorder %v4080_v45, %v4246_v59  ;;  %v706_v42 = vpop.f32.mrf.mxu2 }
 0x3c2   :  { %vm1369_vm7 = vcmp.eq.s32.totalorder %v3715_v29, %v1077_v50  ;;  %v1155_v51 = vsel %vm1154_vm6, %v1150_v55, inf  ;;  %v744_v30 = vmul.f32 2.0, %v706_v42  ;;  %v1162_v42 = vand.u32 65535, %v4152_v27 }
 0x3c3   :  { %vm2983_vm8 = vmpackc.low %vm1369_vm7, %vm1368_vm5  ;;  %1208 = vmin.xlane.f32.xlu0 %v4248_v12  ;;  %v1924_v43 = vpack.c.bf16 %v1894_v48, %v1893_v2 }
 0x3c4   :  { %2984 = vmatmul.msk.bf16.gmra.mxu0 %vm2983_vm8, %v3306_v21  ;;  %1156 = vmin.xlane.f32.xlu1 %v1155_v51  ;;  %v4261_v63 = vpop.xlane.xlu2 %1138  ;;  %v4304_v53 = vsub.f32 %v4196_v0, %v744_v30  ;;  %v1103_v51 = vcvt.f32.s32 %v4102_v61  ;;  %v3270_v30 = vld [vmem:[%s4998_s8] sm:$0xff] }
 0x3c5   :  { %836 = vmin.xlane.f32.xlu2 %v4257_v49  ;;  %v827_v45 = vpop.xlane.xlu1 %826  ;;  %2017 = vmatmul.bf16.gmra.mxu1 %v1924_v43  ;;  %vm1140_vm10 = vcmp.eq.f32.partialorder %v4090_v39, %v4261_v63  ;;  %v1089_v43 = vcvt.f32.s32 %v4146_v24  ;;  %v3269_v24 = vld [vmem:[%s4998_s8 + $0x8] sm:$0xff] }
 0x3c6   :  { %vm868_vm9 = vcmp.le.f32.partialorder %v4093_v13, %v827_v45  ;;  %2920 = vmatmul.msk.f32.gmra.mxu3 %vm1369_vm7, %v3305_v11  ;;  %v1821_v19 = vpop.f32.mrf.mxu0  ;;  %v1141_v3 = vsel %vm1140_vm10, %v1136_v23, inf  ;;  %v1104_v45 = vshll.u32 %v1103_v51, 16  ;;  %v1616_v27 = vsub.f32 %v4167_v47, %v3269_v24 }
 0x3c7   :  { %v4267_v14 = vsel %vm868_vm9, %v3715_v29, 128  ;;  %v4269_v22 = vpop.f32.mrf.mxu3  ;;  %v1822_v39 = vadd.f32 %v4158_v44, %v1821_v19  ;;  %v1090_v19 = vshll.u32 %v1089_v43, 16 }
 0x3c8   :  { %1587 = vst [vmem:[%s5002_s9 + $0x20] sm:$0xff] %v4269_v22  ;;  %v1219_v13 = vshra.s32 %v4267_v14, 16 }
 0x3c9   :  { %v1895_v31 = vmax.f32 %v1822_v39, 0.0  ;;  %v1164_v39 = vcvt.s32.f32 %v1162_v42 }
 0x3ca   :  { %v4278_v58 = vcvt.s32.f32 %v1219_v13 }
 0x3cb   :  { %1142 = vmin.xlane.f32.xlu0 %v1141_v3 }
 0x3cc   :  { %838 = vmin.xlane.f32.xlu1 %v4281_v36  ;;  %v829_v20 = vpop.xlane.xlu2 %828 }
 0x3cd   :  { %1222 = vmin.xlane.f32.xlu2 %v4278_v58  ;;  %v1101_v16 = vpop.xlane.xlu1 %1100  ;;  %vm869_vm11 = vcmp.le.f32.partialorder %v4107_v52, %v829_v20  ;;  %v4300_v52 = vpop.f32.mrf.mxu2 }
 0x3ce   :  { %v4288_v7 = vsel %vm869_vm11, %v3715_v29, 128  ;;  %v1823_v26 = vpop.f32.mrf.mxu0  ;;  %v1102_v15 = vcvt.f32.s32 %v1101_v16 }
 0x3cf   :  { %v1824_v57 = vadd.f32 %v4158_v44, %v1823_v26  ;;  %v4291_v25 = vpop.f32.mrf.mxu3  ;;  %v1233_v46 = vshra.s32 %v4288_v7, 16  ;;  %v1176_v26 = vand.u32 65535, %v4178_v60 }
 0x3d0   :  { %1588 = vst [vmem:[%s5002_s9 + $0x28] sm:$0xff] %v4291_v25  ;;  %v1105_v23 = vadd.s32 %v1104_v45, %v1102_v15 }
 0x3d1   :  { %v1896_v32 = vmax.f32 %v1824_v57, 0.0  ;;  %v4298_v10 = vcvt.s32.f32 %v1233_v46  ;;  %v1615_v57 = vsub.f32 %v4139_v8, %v3270_v30  ;;  %v1178_v8 = vcvt.s32.f32 %v1176_v26 }
 0x3d2   :  { %vm1371_vm14 = vcmp.eq.s32.totalorder %v3715_v29, %v1105_v23 }
 0x3d3   :  { %1236 = vmin.xlane.f32.xlu0 %v4298_v10  ;;  %v1925_v4 = vpack.c.bf16 %v1896_v32, %v1895_v31  ;;  %v1648_v31 = vmul.f32 %v1616_v27, %v1616_v27  ;;  %v3272_v32 = vld [vmem:[%s4998_s8 + $0x18] sm:$0xff] }
 0x3d4   :  { %v1618_v60 = vsub.f32 %v4239_v56, %v3272_v32  ;;  %v3273_v56 = vld [vmem:[%s4998_s8 + $0x20] sm:$0xff] }
 0x3d5   :  { %840 = vmin.xlane.f32.xlu2 %v4304_v53  ;;  %v831_v40 = vpop.xlane.xlu1 %830  ;;  %2022 = vmatmul.bf16.gmra.mxu1 %v1925_v4  ;;  %v712_v2 = vpop.f32.mrf.mxu2  ;;  %v1619_v51 = vsub.f32 %v4269_v22, %v3273_v56  ;;  %v3274_v22 = vld [vmem:[%s4998_s8 + $0x28] sm:$0xff] }
 0x3d6   :  { %vm870_vm12 = vcmp.le.f32.partialorder %v4111_v9, %v831_v40  ;;  %v746_v48 = vmul.f32 2.0, %v712_v2  ;;  %v1647_v40 = vmul.f32 %v1615_v57, %v1615_v57  ;;  %v1620_v42 = vsub.f32 %v4291_v25, %v3274_v22 }
 0x3d7   :  { %v4309_v37 = vsel %vm870_vm12, %v3715_v29, 128  ;;  %v4311_v41 = vpop.f32.mrf.mxu3  ;;  %v1651_v27 = vmul.f32 %v1619_v51, %v1619_v51  ;;  %v3277_v51 = vld [vmem:[%s4998_s8 + $0x40] sm:$0xff] }
 0x3d8   :  { %1589 = vst [vmem:[%s5002_s9 + $0x30] sm:$0xff] %v4311_v41  ;;  %v1247_v50 = vshra.s32 %v4309_v37, 16  ;;  %v4322_v9 = vsub.f32 %v4196_v0, %v746_v48 }
 0x3da   :  { %v4318_v55 = vcvt.s32.f32 %v1247_v50 }
 0x3dd   :  { %1250 = vmin.xlane.f32.xlu2 %v4318_v55 }
 0x3e5   :  { %844 = vmin.xlane.f32.xlu2 %v4322_v9 }
 0x41a   :  { %v1087_v1 = vpop.xlane.xlu0 %1086 }
 0x41b   :  { %v1088_v13 = vcvt.f32.s32 %v1087_v1  ;;  %v745_v1 = vmul.f32 2.0, %v4300_v52 }
 0x41d   :  { %v1091_v3 = vadd.s32 %v1090_v19, %v1088_v13  ;;  %v1679_v19 = vadd.f32 %v1648_v31, %v1647_v40 }
 0x41f   :  { %v4328_v20 = vpop.xlane.xlu2 %1166  ;;  %vm1370_vm13 = vcmp.eq.s32.totalorder %v3715_v29, %v1091_v3  ;;  %v1117_v3 = vcvt.f32.s32 %v4203_v18  ;;  %v3276_v18 = vld [vmem:[%s4998_s8 + $0x38] sm:$0xff] }
 0x420   :  { %2921 = vmatmul.msk.f32.gmra.mxu3 %vm1370_vm13, %v3305_v11  ;;  %v1826_v61 = vpop.f32.mrf.mxu0  ;;  %vm2985_vm15 = vmpackc.low %vm1371_vm14, %vm1370_vm13  ;;  %vm1168_vm0 = vcmp.eq.f32.partialorder %v4165_v35, %v4328_v20  ;;  %v3271_v35 = vld [vmem:[%s4998_s8 + $0x10] sm:$0xff] }
 0x421   :  { %2986 = vmatmul.msk.bf16.gmra.mxu0 %vm2985_vm15, %v3306_v21  ;;  %v1169_v16 = vsel %vm1168_vm0, %v1164_v39, inf  ;;  %v1617_v46 = vsub.f32 %v4211_v17, %v3271_v35  ;;  %v1827_v50 = vadd.f32 %v4158_v44, %v1826_v61  ;;  %v1131_v17 = vcvt.f32.s32 %v4182_v6 }
 0x422   :  { %1170 = vmin.xlane.f32.xlu0 %v1169_v16  ;;  %v3275_v16 = vld [vmem:[%s4998_s8 + $0x30] sm:$0xff] }
 0x423   :  { %v1649_v48 = vmul.f32 %v1617_v46, %v1617_v46  ;;  %v1897_v52 = vmax.f32 %v1827_v50, 0.0  ;;  %v1132_v61 = vshll.u32 %v1131_v17, 16  ;;  %v1621_v26 = vsub.f32 %v4311_v41, %v3275_v16 }
 0x424   :  { %v1652_v46 = vmul.f32 %v1620_v42, %v1620_v42  ;;  %v4399_v50 = vsub.f32 %v4196_v0, %v745_v1 }
 0x425   :  { %v1508_v47 = vpop.f32.mrf.mxu3  ;;  %v1680_v24 = vadd.f32 %v1679_v19, %v1649_v48  ;;  %v1653_v48 = vmul.f32 %v1621_v26, %v1621_v26 }
 0x426   :  { %1590 = vst [vmem:[%s5002_s9 + $0x38] sm:$0xff] %v1508_v47  ;;  %v4358_v4 = vpop.xlane.xlu0 %1180  ;;  %v1622_v31 = vsub.f32 %v1508_v47, %v3276_v18  ;;  %v4404_v47 = vld [vmem:[%s4994_s7 + $0x3] ss:$0 sm:$0xff] }
 0x427   :  { %v1129_v2 = vpop.xlane.xlu1 %1128  ;;  %vm1182_vm1 = vcmp.eq.f32.partialorder %v4184_v33, %v4358_v4  ;;  %v1650_v33 = vmul.f32 %v1618_v60, %v1618_v60 }
 0x428   :  { %v833_v43 = vpop.xlane.xlu2 %832  ;;  %2922 = vmatmul.msk.f32.gmra.mxu3 %vm1371_vm14, %v3305_v11  ;;  %v1828_v15 = vpop.f32.mrf.mxu0  ;;  %v1183_v45 = vsel %vm1182_vm1, %v1178_v8, inf  ;;  %v1130_v13 = vcvt.f32.s32 %v1129_v2  ;;  %v1118_v8 = vshll.u32 %v1117_v3, 16  ;;  %v1190_v2 = vand.u32 65535, %v4209_v5 }
 0x429   :  { %vm871_vm2 = vcmp.le.f32.partialorder %v4199_v62, %v833_v43  ;;  %v1829_v6 = vadd.f32 %v4158_v44, %v1828_v15  ;;  %1184 = vmin.xlane.f32.xlu1 %v1183_v45  ;;  %v1681_v35 = vadd.f32 %v1680_v24, %v1650_v33  ;;  %v1204_v5 = vand.u32 65535, %v4233_v54  ;;  %v3278_v24 = vld [vmem:[%s4998_s8 + $0x48] sm:$0xff] }
 0x42a   :  { %v4379_v23 = vsel %vm871_vm2, %v3715_v29, 128  ;;  %v4392_v32 = vadd.s32 %v1132_v61, %v1130_v13  ;;  %v1654_v19 = vmul.f32 %v1622_v31, %v1622_v31  ;;  %v1192_v54 = vcvt.s32.f32 %v1190_v2 }
 0x42b   :  { %v1898_v39 = vmax.f32 %v1829_v6, 0.0  ;;  %v1261_v62 = vshra.s32 %v4379_v23, 16  ;;  %v1682_v17 = vadd.f32 %v1681_v35, %v1651_v27  ;;  %v1206_v61 = vcvt.s32.f32 %v1204_v5 }
 0x42c   :  { %vm1373_vm4 = vcmp.eq.s32.totalorder %v3715_v29, %v4392_v32  ;;  %v1159_v31 = vcvt.f32.s32 %v4246_v59 }
 0x42d   :  { %v1511_v25 = vpop.f32.mrf.mxu3  ;;  %v4387_v30 = vcvt.s32.f32 %v1261_v62  ;;  %v1926_v57 = vpack.c.bf16 %v1898_v39, %v1897_v52  ;;  %v1683_v1 = vadd.f32 %v1682_v17, %v1652_v46 }
 0x42e   :  { %1591 = vst [vmem:[%s5002_s9 + $0x40] sm:$0xff] %v1511_v25  ;;  %v1115_v60 = vpop.xlane.xlu0 %1114  ;;  %v1623_v43 = vsub.f32 %v1511_v25, %v3277_v51 }
 0x42f   :  { %1264 = vmin.xlane.f32.xlu0 %v4387_v30  ;;  %v1116_v41 = vcvt.f32.s32 %v1115_v60  ;;  %v835_v40 = vpop.xlane.xlu1 %834  ;;  %2027 = vmatmul.bf16.gmra.mxu1 %v1926_v57  ;;  %v1684_v22 = vadd.f32 %v1683_v1, %v1653_v48 }
 0x430   :  { %v4407_v56 = vpop.xlane.xlu2 %1194  ;;  %vm872_vm3 = vcmp.le.f32.partialorder %v4224_v38, %v835_v40  ;;  %v1655_v42 = vmul.f32 %v1623_v43, %v1623_v43  ;;  %v1218_v43 = vand.u32 65535, %v4267_v14 }
 0x431   :  { %v1119_v0 = vadd.s32 %v1118_v8, %v1116_v41  ;;  %v4414_v15 = vsel %vm872_vm3, %v3715_v29, 128  ;;  %v1831_v45 = vpop.f32.mrf.mxu0  ;;  %842 = vmin.xlane.f32.xlu1 %v4399_v50  ;;  %vm1196_vm6 = vcmp.eq.f32.partialorder %v4221_v34, %v4407_v56  ;;  %v1685_v52 = vadd.f32 %v1684_v22, %v1654_v19 }
 0x432   :  { %v2013_v6 = vpop.f32.mrf.mxu1  ;;  %v1275_v33 = vshra.s32 %v4414_v15, 16  ;;  %v1197_v62 = vsel %vm1196_vm6, %v1192_v54, inf  ;;  %v1832_v26 = vadd.f32 %v4158_v44, %v1831_v45 }
 0x433   :  { %v2014_v38 = vadd.f32 %v4404_v47, %v2013_v6  ;;  %vm1372_vm5 = vcmp.eq.s32.totalorder %v3715_v29, %v1119_v0  ;;  %v1686_v35 = vadd.f32 %v1685_v52, %v1655_v42 }
 0x434   :  { %2923 = vmatmul.msk.f32.gmra.mxu3 %vm1372_vm5, %v3305_v11  ;;  %vm2987_vm7 = vmpackc.low %vm1373_vm4, %vm1372_vm5  ;;  %v4430_v3 = vcvt.s32.f32 %v1275_v33  ;;  %v1899_v48 = vmax.f32 %v1832_v26, 0.0 }
 0x435   :  { %v3037_v13 = vmul.f32 -1.442695, %v2014_v38  ;;  %2988 = vmatmul.msk.bf16.gmra.mxu0 %vm2987_vm7, %v3306_v21 }
 0x436   :  { %v1514_v39 = vpop.f32.mrf.mxu3  ;;  %v4432_v34 = vpop.xlane.xlu0 %1208  ;;  %1278 = vmin.xlane.f32.xlu2 %v4430_v3 }
 0x437   :  { %3140 = vpow2.f32 %v3037_v13  ;;  %1592 = vst [vmem:[%s5002_s9 + $0x48] sm:$0xff] %v1514_v39  ;;  %v1624_v27 = vsub.f32 %v1514_v39, %v3278_v24  ;;  %1198 = vmin.xlane.f32.xlu0 %v1197_v62  ;;  %v1157_v16 = vpop.xlane.xlu1 %1156  ;;  %vm1210_vm8 = vcmp.eq.f32.partialorder %v4248_v12, %v4432_v34  ;;  %v1145_v12 = vcvt.f32.s32 %v4261_v63  ;;  %v3279_v62 = vld [vmem:[%s4998_s8 + $0x50] sm:$0xff] }
 0x438   :  { %v837_v25 = vpop.xlane.xlu2 %836  ;;  %v1211_v57 = vsel %vm1210_vm8, %v1206_v61, inf  ;;  %v1158_v51 = vcvt.f32.s32 %v1157_v16  ;;  %v1160_v63 = vshll.u32 %v1159_v31, 16  ;;  %v1220_v13 = vcvt.s32.f32 %v1218_v43 }
 0x439   :  { %v1656_v46 = vmul.f32 %v1624_v27, %v1624_v27  ;;  %vm873_vm9 = vcmp.le.f32.partialorder %v4257_v49, %v837_v25  ;;  %v1833_v18 = vpop.f32.mrf.mxu0  ;;  %1212 = vmin.xlane.f32.xlu1 %v1211_v57  ;;  %v1146_v6 = vshll.u32 %v1145_v12, 16  ;;  %v1232_v16 = vand.u32 65535, %v4288_v7 }
 0x43a   :  { %v4447_v60 = vsel %vm873_vm9, %v3715_v29, 128  ;;  %v1834_v8 = vadd.f32 %v4158_v44, %v1833_v18  ;;  %v2015_v41 = vpop.f32.mrf.mxu1  ;;  %v1161_v32 = vadd.s32 %v1160_v63, %v1158_v51 }
 0x43b   :  { %v1687_v40 = vadd.f32 %v1686_v35, %v1656_v46  ;;  %v2016_v2 = vadd.f32 %v4404_v47, %v2015_v41  ;;  %v1289_v17 = vshra.s32 %v4447_v60, 16 }
 0x43c   :  { %v1900_v49 = vmax.f32 %v1834_v8, 0.0  ;;  %2924 = vmatmul.msk.f32.gmra.mxu3 %vm1373_vm4, %v3305_v11  ;;  %vm1375_vm13 = vcmp.eq.s32.totalorder %v3715_v29, %v1161_v32 }
 0x43d   :  { %v3141_v59 = vpop.eup %3140  ;;  %v3038_v0 = vmul.f32 -1.442695, %v2016_v2  ;;  %v4458_v45 = vcvt.s32.f32 %v1289_v17 }
 0x43e   :  { %v4460_v5 = vadd.f32 1.0, %v3141_v59  ;;  %v1927_v1 = vpack.c.bf16 %v1900_v49, %v1899_v48  ;;  %v1143_v19 = vpop.xlane.xlu0 %1142  ;;  %v1234_v48 = vcvt.s32.f32 %v1232_v16 }
 0x43f   :  { %3142 = vpow2.f32 %v3038_v0  ;;  %1292 = vmin.xlane.f32.xlu0 %v4458_v45  ;;  %v1144_v38 = vcvt.f32.s32 %v1143_v19  ;;  %v839_v33 = vpop.xlane.xlu1 %838 }
 0x440   :  { %3144 = vrcp.f32 %v4460_v5  ;;  %v4464_v22 = vpop.xlane.xlu2 %1222  ;;  %2032 = vmatmul.bf16.gmra.mxu1 %v1927_v1  ;;  %vm874_vm10 = vcmp.le.f32.partialorder %v4281_v36, %v839_v33  ;;  %v2230_v51 = vand.u32 2147483647, %v4460_v5  ;;  %vm2226_vm2 = vweird.f32 %v4460_v5 }
 0x441   :  { %v1147_v14 = vadd.s32 %v1146_v6, %v1144_v38  ;;  %v1836_v54 = vpop.f32.mrf.mxu0  ;;  %v1517_v42 = vpop.f32.mrf.mxu3  ;;  %vm1224_vm11 = vcmp.eq.f32.partialorder %v4278_v58, %v4464_v22  ;;  %v4470_v52 = vsel %vm874_vm10, %v3715_v29, 128  ;;  %v1246_v38 = vand.u32 65535, %v4309_v37 }
 0x442   :  { %1593 = vst [vmem:[%s5002_s9 + $0x50] sm:$0xff] %v1517_v42  ;;  %v2018_v39 = vpop.f32.mrf.mxu1  ;;  %v1625_v61 = vsub.f32 %v1517_v42, %v3279_v62  ;;  %v1225_v36 = vsel %vm1224_vm11, %v1220_v13, inf  ;;  %v1303_v58 = vshra.s32 %v4470_v52, 16  ;;  %v1837_v31 = vadd.f32 %v4158_v44, %v1836_v54 }
 0x443   :  { %1226 = vmin.xlane.f32.xlu1 %v1225_v36  ;;  %v2019_v24 = vadd.f32 %v4404_v47, %v2018_v39  ;;  %vm1374_vm12 = vcmp.eq.s32.totalorder %v3715_v29, %v1147_v14  ;;  %vm2231_vm4 = vcmp.eq.f32.partialorder %v2230_v51, 8.507059e+37 }
 0x444   :  { %v1657_v26 = vmul.f32 %v1625_v61, %v1625_v61  ;;  %2925 = vmatmul.msk.f32.gmra.mxu3 %vm1374_vm12, %v3305_v11  ;;  %vm2989_vm14 = vmpackc.low %vm1375_vm13, %vm1374_vm12  ;;  %v4489_v46 = vcvt.s32.f32 %v1303_v58  ;;  %v1901_v0 = vmax.f32 %v1837_v31, 0.0 }
 0x445   :  { %v3143_v27 = vpop.eup %3142  ;;  %v3039_v35 = vmul.f32 -1.442695, %v2019_v24  ;;  %2990 = vmatmul.msk.bf16.gmra.mxu0 %vm2989_vm14, %v3306_v21  ;;  %v1248_v24 = vcvt.s32.f32 %v1246_v38 }
 0x446   :  { %v3145_v25 = vpop.eup %3144  ;;  %v4486_v57 = vadd.f32 1.0, %v3143_v27  ;;  %v4493_v8 = vadd.f32 %v1687_v40, %v1657_v26  ;;  %v4497_v7 = vpop.xlane.xlu0 %1236  ;;  %v2232_v40 = vand.u32 2147483648, %v4460_v5 }
 0x447   :  { %v2222_v18 = vmul.f32 %v3145_v25, %v4460_v5  ;;  %1306 = vmin.xlane.f32.xlu0 %v4489_v46  ;;  %vm2227_vm0 = vweird.f32 %v3145_v25  ;;  %vm1238_vm1 = vcmp.eq.f32.partialorder %v4298_v10, %v4497_v7 }
 0x448   :  { %3146 = vrcp.f32 %v4486_v57  ;;  %v841_v41 = vpop.xlane.xlu2 %840  ;;  %v1239_v1 = vsel %vm1238_vm1, %v1234_v48, inf  ;;  %vm2228_vm3 = vmor %vm2226_vm2, %vm2227_vm0  ;;  %v2233_v54 = vor.u32 1.1754944e-38, %v2232_v40  ;;  %v2245_v58 = vand.u32 2147483647, %v4486_v57 }
 0x449   :  { %v2223_v12 = vsub.f32 1.0, %v2222_v18  ;;  %3148 = vpow2.f32 %v3039_v35  ;;  %vm875_vm15 = vcmp.le.f32.partialorder %v4304_v53, %v841_v41  ;;  %v1838_v2 = vpop.f32.mrf.mxu0  ;;  %v4500_v17 = vpop.f32.mrf.mxu3  ;;  %1240 = vmin.xlane.f32.xlu2 %v1239_v1  ;;  %v2247_v27 = vand.u32 2147483648, %v4486_v57 }
 0x44a   :  { %v4505_v49 = vsel %vm875_vm15, %v3715_v29, 128  ;;  %v1839_v59 = vadd.f32 %v4158_v44, %v1838_v2  ;;  %1594 = vst [vmem:[%s5002_s9 + $0x58] sm:$0xff] %v4500_v17  ;;  %v2020_v43 = vpop.f32.mrf.mxu1  ;;  %vm2241_vm7 = vweird.f32 %v4486_v57  ;;  %vm2246_vm9 = vcmp.eq.f32.partialorder %v2245_v58, 8.507059e+37 }
 0x44b   :  { %v2224_v53 = vmul.f32 %v3145_v25, %v2223_v12  ;;  %v2021_v19 = vadd.f32 %v4404_v47, %v2020_v43  ;;  %v1317_v6 = vshra.s32 %v4505_v49, 16  ;;  %v2248_v12 = vor.u32 1.1754944e-38, %v2247_v27 }
 0x44c   :  { %v1902_v63 = vmax.f32 %v1839_v59, 0.0  ;;  %2926 = vmatmul.msk.f32.gmra.mxu3 %vm1375_vm13, %v3305_v11 }
 0x44d   :  { %v2225_v33 = vadd.f32 %v3145_v25, %v2224_v53  ;;  %v3040_v42 = vmul.f32 -1.442695, %v2021_v19  ;;  %v4521_v13 = vcvt.s32.f32 %v1317_v6 }
 0x44e   :  { %v3147_v14 = vpop.eup %3146  ;;  %v1928_v10 = vpack.c.bf16 %v1902_v63, %v1901_v0 }
 0x44f   :  { %v3149_v39 = vpop.eup %3148  ;;  %v2229_v62 = vsel %vm2228_vm3, %v3145_v25, %v2225_v33  ;;  %v2237_v37 = vmul.f32 %v3147_v14, %v4486_v57  ;;  %3150 = vpow2.f32 %v3040_v42  ;;  %1320 = vmin.xlane.f32.xlu1 %v4521_v13  ;;  %vm2242_vm6 = vweird.f32 %v3147_v14 }
 0x450   :  { %v2234_v61 = vsel %vm2231_vm4, %v2233_v54, %v2229_v62  ;;  %v2191_v36 = vadd.f32 1.0, %v3149_v39  ;;  %v4525_v5 = vpop.xlane.xlu2 %1250  ;;  %2037 = vmatmul.bf16.gmra.mxu1 %v1928_v10  ;;  %vm2243_vm8 = vmor %vm2241_vm7, %vm2242_vm6 }
 0x451   :  { %2701 = vst [vmem:[%s5003_s10] sm:$0xff] %v2234_v61  ;;  %v2238_v32 = vsub.f32 1.0, %v2237_v37  ;;  %vm1252_vm5 = vcmp.eq.f32.partialorder %v4318_v55, %v4525_v5 }
 0x452   :  { %3152 = vrcp.f32 %v2191_v36  ;;  %v2023_v16 = vpop.f32.mrf.mxu1  ;;  %v1253_v25 = vsel %vm1252_vm5, %v1248_v24, inf  ;;  %v2262_v63 = vand.u32 2147483648, %v2191_v36  ;;  %v2260_v38 = vand.u32 2147483647, %v2191_v36 }
 0x453   :  { %v2239_v26 = vmul.f32 %v3147_v14, %v2238_v32  ;;  %v2024_v35 = vadd.f32 %v4404_v47, %v2023_v16  ;;  %1254 = vmin.xlane.f32.xlu2 %v1253_v25  ;;  %vm2256_vm12 = vweird.f32 %v2191_v36 }
 0x454   :  { %v2263_v42 = vor.u32 1.1754944e-38, %v2262_v63  ;;  %vm2261_vm14 = vcmp.eq.f32.partialorder %v2260_v38, 8.507059e+37 }
 0x455   :  { %v2240_v18 = vadd.f32 %v3147_v14, %v2239_v26  ;;  %v3041_v31 = vmul.f32 -1.442695, %v2024_v35  ;;  %v3151_v41 = vpop.eup %3150 }
 0x456   :  { %v2192_v2 = vadd.f32 1.0, %v3151_v41 }
 0x457   :  { %v2244_v55 = vsel %vm2243_vm8, %v3147_v14, %v2240_v18  ;;  %3154 = vpow2.f32 %v3041_v31 }
 0x458   :  { %v3153_v48 = vpop.eup %3152  ;;  %v2249_v51 = vsel %vm2246_vm9, %v2248_v12, %v2244_v55  ;;  %v845_v40 = vpop.xlane.xlu2 %844  ;;  %3156 = vrcp.f32 %v2192_v2  ;;  %v2277_v32 = vand.u32 2147483648, %v2192_v2  ;;  %v2275_v58 = vand.u32 2147483647, %v2192_v2 }
 0x459   :  { %2702 = vst [vmem:[%s5003_s10 + $0x8] sm:$0xff] %v2249_v51  ;;  %v2252_v59 = vmul.f32 %v3153_v48, %v2191_v36  ;;  %vm877_vm10 = vcmp.le.f32.partialorder %v4322_v9, %v845_v40  ;;  %vm2257_vm11 = vweird.f32 %v3153_v48  ;;  %vm2271_vm0 = vweird.f32 %v2192_v2 }
 0x45a   :  { %v2025_v57 = vpop.f32.mrf.mxu1  ;;  %v4541_v53 = vsel %vm877_vm10, %v3715_v29, 128  ;;  %vm2258_vm13 = vmor %vm2256_vm12, %vm2257_vm11  ;;  %v2278_v25 = vor.u32 1.1754944e-38, %v2277_v32  ;;  %vm2276_vm2 = vcmp.eq.f32.partialorder %v2275_v58, 8.507059e+37  ;;  %v1260_v58 = vand.u32 65535, %v4379_v23  ;;  %v3281_v23 = vld [vmem:[%s4998_s8 + $0x60] sm:$0xff] }
 0x45b   :  { %v2253_v43 = vsub.f32 1.0, %v2252_v59  ;;  %v2026_v0 = vadd.f32 %v4404_v47, %v2025_v57  ;;  %v1345_v1 = vshra.s32 %v4541_v53, 16 }
 0x45d   :  { %v3155_v19 = vpop.eup %3154  ;;  %v2254_v6 = vmul.f32 %v3153_v48, %v2253_v43  ;;  %v3042_v33 = vmul.f32 -1.442695, %v2026_v0  ;;  %v4545_v54 = vcvt.s32.f32 %v1345_v1 }
 0x45e   :  { %v2193_v14 = vadd.f32 1.0, %v3155_v19  ;;  %v3157_v10 = vpop.eup %3156 }
 0x45f   :  { %v2255_v9 = vadd.f32 %v3153_v48, %v2254_v6  ;;  %3158 = vpow2.f32 %v3042_v33  ;;  %v2267_v39 = vmul.f32 %v3157_v10, %v2192_v2  ;;  %1348 = vmin.xlane.f32.xlu2 %v4545_v54  ;;  %vm2272_vm15 = vweird.f32 %v3157_v10 }
 0x460   :  { %3160 = vrcp.f32 %v2193_v14  ;;  %vm2273_vm1 = vmor %vm2271_vm0, %vm2272_vm15  ;;  %v2292_v12 = vand.u32 2147483648, %v2193_v14  ;;  %vm2286_vm4 = vweird.f32 %v2193_v14 }
 0x461   :  { %v2259_v62 = vsel %vm2258_vm13, %v3153_v48, %v2255_v9  ;;  %v2268_v61 = vsub.f32 1.0, %v2267_v39  ;;  %v2290_v48 = vand.u32 2147483647, %v2193_v14 }
 0x462   :  { %v2264_v37 = vsel %vm2261_vm14, %v2263_v42, %v2259_v62  ;;  %v2293_v40 = vor.u32 1.1754944e-38, %v2292_v12 }
 0x463   :  { %2703 = vst [vmem:[%s5003_s10 + $0x10] sm:$0xff] %v2264_v37  ;;  %v2269_v24 = vmul.f32 %v3157_v10, %v2268_v61  ;;  %vm2291_vm6 = vcmp.eq.f32.partialorder %v2290_v48, 8.507059e+37  ;;  %v1187_v37 = vcvt.f32.s32 %v4358_v4 }
 0x465   :  { %v3159_v36 = vpop.eup %3158  ;;  %v2270_v16 = vadd.f32 %v3157_v10, %v2269_v24  ;;  %v1188_v32 = vshll.u32 %v1187_v37, 16 }
 0x466   :  { %v3161_v27 = vpop.eup %3160  ;;  %v2194_v26 = vadd.f32 1.0, %v3159_v36  ;;  %v3280_v36 = vld [vmem:[%s4998_s8 + $0x58] sm:$0xff] }
 0x467   :  { %v2282_v35 = vmul.f32 %v3161_v27, %v2193_v14  ;;  %v2274_v18 = vsel %vm2273_vm1, %v3157_v10, %v2270_v16  ;;  %vm2287_vm3 = vweird.f32 %v3161_v27  ;;  %v1173_v10 = vcvt.f32.s32 %v4328_v20 }
 0x468   :  { %3162 = vrcp.f32 %v2194_v26  ;;  %v2279_v31 = vsel %vm2276_vm2, %v2278_v25, %v2274_v18  ;;  %vm2288_vm5 = vmor %vm2286_vm4, %vm2287_vm3  ;;  %v2307_v63 = vand.u32 2147483648, %v2194_v26  ;;  %v2305_v19 = vand.u32 2147483647, %v2194_v26 }
 0x469   :  { %v2283_v41 = vsub.f32 1.0, %v2282_v35  ;;  %2704 = vst [vmem:[%s5003_s10 + $0x18] sm:$0xff] %v2279_v31  ;;  %vm2301_vm8 = vweird.f32 %v2194_v26  ;;  %v1174_v42 = vshll.u32 %v1173_v10, 16  ;;  %v1626_v20 = vsub.f32 %v4500_v17, %v3280_v36 }
 0x46a   :  { %v2308_v38 = vor.u32 1.1754944e-38, %v2307_v63  ;;  %vm2306_vm10 = vcmp.eq.f32.partialorder %v2305_v19, 8.507059e+37  ;;  %v1262_v25 = vcvt.s32.f32 %v1260_v58 }
 0x46b   :  { %v2284_v55 = vmul.f32 %v3161_v27, %v2283_v41  ;;  %v1658_v4 = vmul.f32 %v1626_v20, %v1626_v20 }
 0x46d   :  { %v2285_v51 = vadd.f32 %v3161_v27, %v2284_v55  ;;  %v1689_v12 = vadd.f32 %v4493_v8, %v1658_v4  ;;  %v1229_v4 = vcvt.f32.s32 %v4464_v22 }
 0x46e   :  { %v3163_v2 = vpop.eup %3162 }
 0x46f   :  { %v2289_v59 = vsel %vm2288_vm5, %v3161_v27, %v2285_v51  ;;  %v2297_v57 = vmul.f32 %v3163_v2, %v2194_v26  ;;  %vm2302_vm7 = vweird.f32 %v3163_v2 }
 0x470   :  { %v2294_v43 = vsel %vm2291_vm6, %v2293_v40, %v2289_v59  ;;  %vm2303_vm9 = vmor %vm2301_vm8, %vm2302_vm7  ;;  %v4593_v40 = vld [vmem:[%s4994_s7 + $0x2] ss:$0 sm:$0xff] }
 0x471   :  { %2705 = vst [vmem:[%s5003_s10 + $0x20] sm:$0xff] %v2294_v43  ;;  %v2298_v0 = vsub.f32 1.0, %v2297_v57 }
 0x473   :  { %v2299_v1 = vmul.f32 %v3163_v2, %v2298_v0 }
 0x475   :  { %v2300_v6 = vadd.f32 %v3163_v2, %v2299_v1 }
 0x477   :  { %v2304_v33 = vsel %vm2303_vm9, %v3163_v2, %v2300_v6  ;;  %v1201_v2 = vcvt.f32.s32 %v4407_v56 }
 0x478   :  { %v2309_v14 = vsel %vm2306_vm10, %v2308_v38, %v2304_v33 }
 0x479   :  { %2706 = vst [vmem:[%s5003_s10 + $0x28] sm:$0xff] %v2309_v14  ;;  %v1202_v1 = vshll.u32 %v1201_v2, 16 }
 0x495   :  { %v1171_v9 = vpop.xlane.xlu0 %1170 }
 0x496   :  { %v1172_v39 = vcvt.f32.s32 %v1171_v9 }
 0x498   :  { %v1175_v62 = vadd.s32 %v1174_v42, %v1172_v39 }
 0x49a   :  { %vm1376_vm11 = vcmp.eq.s32.totalorder %v3715_v29, %v1175_v62 }
 0x49b   :  { %2927 = vmatmul.msk.f32.gmra.mxu3 %vm1376_vm11, %v3305_v11 }
 0x49c   :  { %v1185_v61 = vpop.xlane.xlu1 %1184 }
 0x49d   :  { %v1186_v24 = vcvt.f32.s32 %v1185_v61 }
 0x49e   :  { %v1841_v27 = vpop.f32.mrf.mxu0 }
 0x49f   :  { %v1189_v16 = vadd.s32 %v1188_v32, %v1186_v24  ;;  %v1842_v41 = vadd.f32 %v4158_v44, %v1841_v27 }
 0x4a1   :  { %vm1377_vm12 = vcmp.eq.s32.totalorder %v3715_v29, %v1189_v16  ;;  %v1903_v8 = vmax.f32 %v1842_v41, 0.0 }
 0x4a2   :  { %v4570_v26 = vpop.xlane.xlu0 %1264  ;;  %vm2991_vm13 = vmpackc.low %vm1377_vm12, %vm1376_vm11 }
 0x4a3   :  { %2928 = vmatmul.msk.f32.gmra.mxu3 %vm1377_vm12, %v3305_v11  ;;  %v1523_v35 = vpop.f32.mrf.mxu3  ;;  %vm1266_vm14 = vcmp.eq.f32.partialorder %v4387_v30, %v4570_v26  ;;  %2992 = vmatmul.msk.bf16.gmra.mxu0 %vm2991_vm13, %v3306_v21  ;;  %v1274_v30 = vand.u32 65535, %v4414_v15  ;;  %v1215_v15 = vcvt.f32.s32 %v4432_v34  ;;  %v3283_v34 = vld [vmem:[%s4998_s8 + $0x68] sm:$0xff] }
 0x4a4   :  { %1595 = vst [vmem:[%s5002_s9 + $0x60] sm:$0xff] %v1523_v35  ;;  %v1627_v17 = vsub.f32 %v1523_v35, %v3281_v23  ;;  %v1267_v18 = vsel %vm1266_vm14, %v1262_v25, inf  ;;  %v843_v31 = vpop.xlane.xlu1 %842  ;;  %v1302_v23 = vand.u32 65535, %v4470_v52  ;;  %v1230_v52 = vshll.u32 %v1229_v4, 16 }
 0x4a5   :  { %1268 = vmin.xlane.f32.xlu0 %v1267_v18  ;;  %vm876_vm15 = vcmp.le.f32.partialorder %v4399_v50, %v843_v31  ;;  %v1276_v56 = vcvt.s32.f32 %v1274_v30  ;;  %v1216_v42 = vshll.u32 %v1215_v15, 16  ;;  %v1243_v15 = vcvt.f32.s32 %v4497_v7 }
 0x4a6   :  { %v1659_v55 = vmul.f32 %v1627_v17, %v1627_v17  ;;  %v4587_v48 = vsel %vm876_vm15, %v3715_v29, 128  ;;  %v1843_v51 = vpop.f32.mrf.mxu0 }
 0x4a7   :  { %v1844_v44 = vadd.f32 %v4593_v40, %v1843_v51  ;;  %v1331_v50 = vshra.s32 %v4587_v48, 16 }
 0x4a8   :  { %v1690_v59 = vadd.f32 %v1689_v12, %v1659_v55 }
 0x4a9   :  { %v1904_v57 = vmax.f32 %v1844_v44, 0.0  ;;  %v4598_v43 = vcvt.s32.f32 %v1331_v50  ;;  %v4600_v63 = vpop.xlane.xlu2 %1278 }
 0x4aa   :  { %v1199_v0 = vpop.xlane.xlu0 %1198  ;;  %vm1280_vm0 = vcmp.eq.f32.partialorder %v4430_v3, %v4600_v63  ;;  %v1288_v3 = vand.u32 65535, %v4447_v60 }
 0x4ab   :  { %v1929_v19 = vpack.c.bf16 %v1904_v57, %v1903_v8  ;;  %v1200_v6 = vcvt.f32.s32 %v1199_v0  ;;  %v1526_v38 = vpop.f32.mrf.mxu3  ;;  %1334 = vmin.xlane.f32.xlu1 %v4598_v43  ;;  %v1281_v14 = vsel %vm1280_vm0, %v1276_v56, inf }
 0x4ac   :  { %1596 = vst [vmem:[%s5002_s9 + $0x68] sm:$0xff] %v1526_v38  ;;  %v1628_v33 = vsub.f32 %v1526_v38, %v3283_v34  ;;  %v2028_v10 = vpop.f32.mrf.mxu1  ;;  %v1213_v9 = vpop.xlane.xlu1 %1212  ;;  %v1290_v27 = vcvt.s32.f32 %v1288_v3 }
 0x4ad   :  { %v1203_v39 = vadd.s32 %v1202_v1, %v1200_v6  ;;  %1282 = vmin.xlane.f32.xlu0 %v1281_v14  ;;  %v2029_v62 = vadd.f32 %v4404_v47, %v2028_v10  ;;  %v1214_v37 = vcvt.f32.s32 %v1213_v9  ;;  %2042 = vmatmul.bf16.gmra.mxu1 %v1929_v19  ;;  %v1316_v19 = vand.u32 65535, %v4505_v49  ;;  %v3285_v49 = vld [vmem:[%s4998_s8 + $0x78] sm:$0xff] }
 0x4ae   :  { %v1660_v61 = vmul.f32 %v1628_v33, %v1628_v33 }
 0x4af   :  { %v3043_v32 = vmul.f32 -1.442695, %v2029_v62  ;;  %v1217_v24 = vadd.s32 %v1216_v42, %v1214_v37  ;;  %vm1378_vm1 = vcmp.eq.s32.totalorder %v3715_v29, %v1203_v39  ;;  %v1244_v42 = vshll.u32 %v1243_v15, 16 }
 0x4b0   :  { %v1691_v58 = vadd.f32 %v1690_v59, %v1660_v61  ;;  %2929 = vmatmul.msk.f32.gmra.mxu3 %vm1378_vm1, %v3305_v11  ;;  %v1304_v59 = vcvt.s32.f32 %v1302_v23  ;;  %v1318_v37 = vcvt.s32.f32 %v1316_v19 }
 0x4b1   :  { %3164 = vpow2.f32 %v3043_v32  ;;  %vm1379_vm2 = vcmp.eq.s32.totalorder %v3715_v29, %v1217_v24 }
 0x4b2   :  { %v4616_v36 = vpop.xlane.xlu0 %1292  ;;  %v1846_v20 = vpop.f32.mrf.mxu0  ;;  %vm2993_vm3 = vmpackc.low %vm1379_vm2, %vm1378_vm1 }
 0x4b3   :  { %vm1294_vm4 = vcmp.eq.f32.partialorder %v4458_v45, %v4616_v36  ;;  %2994 = vmatmul.msk.bf16.gmra.mxu0 %vm2993_vm3, %v3306_v21  ;;  %v3284_v45 = vld [vmem:[%s4998_s8 + $0x70] sm:$0xff]  ;;  %v1847_v12 = vadd.f32 %v4593_v40, %v1846_v20  ;;  %v1257_v20 = vcvt.f32.s32 %v4525_v5 }
 0x4b4   :  { %v1295_v60 = vsel %vm1294_vm4, %v1290_v27, inf  ;;  %v2030_v16 = vpop.f32.mrf.mxu1 }
 0x4b5   :  { %1296 = vmin.xlane.f32.xlu1 %v1295_v60  ;;  %v2031_v25 = vadd.f32 %v4404_v47, %v2030_v16  ;;  %v1905_v8 = vmax.f32 %v1847_v12, 0.0 }
 0x4b6   :  { %v1227_v18 = vpop.xlane.xlu1 %1226 }
 0x4b7   :  { %v3165_v35 = vpop.eup %3164  ;;  %v3044_v17 = vmul.f32 -1.442695, %v2031_v25  ;;  %v1529_v31 = vpop.f32.mrf.mxu3  ;;  %v1228_v30 = vcvt.f32.s32 %v1227_v18  ;;  %v1258_v18 = vshll.u32 %v1257_v20, 16 }
 0x4b8   :  { %v4626_v41 = vadd.f32 1.0, %v3165_v35  ;;  %2930 = vmatmul.msk.f32.gmra.mxu3 %vm1379_vm2, %v3305_v11  ;;  %1597 = vst [vmem:[%s5002_s9 + $0x70] sm:$0xff] %v1529_v31  ;;  %v1629_v22 = vsub.f32 %v1529_v31, %v3284_v45 }
 0x4b9   :  { %3166 = vpow2.f32 %v3044_v17  ;;  %v1231_v51 = vadd.s32 %v1230_v52, %v1228_v30 }
 0x4ba   :  { %3168 = vrcp.f32 %v4626_v41  ;;  %v1848_v55 = vpop.f32.mrf.mxu0  ;;  %v1661_v2 = vmul.f32 %v1629_v22, %v1629_v22  ;;  %v4639_v44 = vpop.xlane.xlu0 %1306  ;;  %v2320_v27 = vand.u32 2147483647, %v4626_v41  ;;  %v2322_v60 = vand.u32 2147483648, %v4626_v41 }
 0x4bb   :  { %v1849_v50 = vadd.f32 %v4593_v40, %v1848_v55  ;;  %vm1308_vm5 = vcmp.eq.f32.partialorder %v4489_v46, %v4639_v44  ;;  %vm1380_vm6 = vcmp.eq.s32.totalorder %v3715_v29, %v1231_v51  ;;  %vm2316_vm11 = vweird.f32 %v4626_v41 }
 0x4bc   :  { %v1692_v57 = vadd.f32 %v1691_v58, %v1661_v2  ;;  %v1309_v56 = vsel %vm1308_vm5, %v1304_v59, inf  ;;  %v1241_v46 = vpop.xlane.xlu2 %1240  ;;  %vm2321_vm13 = vcmp.eq.f32.partialorder %v2320_v27, 8.507059e+37 }
 0x4bd   :  { %v1906_v0 = vmax.f32 %v1849_v50, 0.0  ;;  %v2033_v1 = vpop.f32.mrf.mxu1  ;;  %1310 = vmin.xlane.f32.xlu2 %v1309_v56  ;;  %v1242_v62 = vcvt.f32.s32 %v1241_v46  ;;  %v3286_v50 = vld [vmem:[%s4998_s8 + $0x80] sm:$0xff] }
 0x4be   :  { %v2034_v6 = vadd.f32 %v4404_v47, %v2033_v1 }
 0x4bf   :  { %v3167_v38 = vpop.eup %3166  ;;  %v1930_v34 = vpack.c.bf16 %v1906_v0, %v1905_v8  ;;  %v1532_v33 = vpop.f32.mrf.mxu3  ;;  %v1245_v61 = vadd.s32 %v1244_v42, %v1242_v62 }
 0x4c0   :  { %v3169_v14 = vpop.eup %3168  ;;  %v4648_v7 = vadd.f32 1.0, %v3167_v38  ;;  %v3045_v10 = vmul.f32 -1.442695, %v2034_v6  ;;  %2931 = vmatmul.msk.f32.gmra.mxu3 %vm1380_vm6, %v3305_v11  ;;  %1598 = vst [vmem:[%s5002_s9 + $0x78] sm:$0xff] %v1532_v33  ;;  %v1630_v9 = vsub.f32 %v1532_v33, %v3285_v49 }
 0x4c1   :  { %v2312_v39 = vmul.f32 %v3169_v14, %v4626_v41  ;;  %2047 = vmatmul.bf16.gmra.mxu1 %v1930_v34  ;;  %vm2317_vm7 = vweird.f32 %v3169_v14  ;;  %vm1381_vm9 = vcmp.eq.s32.totalorder %v3715_v29, %v1245_v61 }
 0x4c2   :  { %3170 = vrcp.f32 %v4648_v7  ;;  %v1662_v32 = vmul.f32 %v1630_v9, %v1630_v9  ;;  %v4661_v24 = vpop.xlane.xlu1 %1320  ;;  %v1851_v58 = vpop.f32.mrf.mxu0  ;;  %vm2995_vm10 = vmpackc.low %vm1381_vm9, %vm1380_vm6  ;;  %v2335_v0 = vand.u32 2147483647, %v4648_v7  ;;  %v2337_v56 = vand.u32 2147483648, %v4648_v7 }
 0x4c3   :  { %v2313_v3 = vsub.f32 1.0, %v2312_v39  ;;  %3172 = vpow2.f32 %v3045_v10  ;;  %vm1322_vm8 = vcmp.eq.f32.partialorder %v4521_v13, %v4661_v24  ;;  %2996 = vmatmul.msk.bf16.gmra.mxu0 %vm2995_vm10, %v3306_v21  ;;  %vm2318_vm12 = vmor %vm2316_vm11, %vm2317_vm7  ;;  %v2323_v13 = vor.u32 1.1754944e-38, %v2322_v60 }
 0x4c4   :  { %v1693_v4 = vadd.f32 %v1692_v57, %v1662_v32  ;;  %v1323_v35 = vsel %vm1322_vm8, %v1318_v37, inf  ;;  %v1852_v12 = vadd.f32 %v4593_v40, %v1851_v58  ;;  %vm2331_vm15 = vweird.f32 %v4648_v7 }
 0x4c5   :  { %v2314_v16 = vmul.f32 %v3169_v14, %v2313_v3  ;;  %v2035_v25 = vpop.f32.mrf.mxu1  ;;  %1324 = vmin.xlane.f32.xlu0 %v1323_v35  ;;  %v1344_v9 = vand.u32 65535, %v4541_v53  ;;  %v2338_v42 = vor.u32 1.1754944e-38, %v2337_v56  ;;  %vm2336_vm2 = vcmp.eq.f32.partialorder %v2335_v0, 8.507059e+37 }
 0x4c6   :  { %v2036_v5 = vadd.f32 %v4404_v47, %v2035_v25  ;;  %v1255_v30 = vpop.xlane.xlu2 %1254  ;;  %v1907_v34 = vmax.f32 %v1852_v12, 0.0 }
 0x4c7   :  { %v2315_v23 = vadd.f32 %v3169_v14, %v2314_v16  ;;  %v1535_v45 = vpop.f32.mrf.mxu3  ;;  %v1256_v55 = vcvt.f32.s32 %v1255_v30  ;;  %v1346_v27 = vcvt.s32.f32 %v1344_v9 }
 0x4c8   :  { %v3171_v17 = vpop.eup %3170  ;;  %v3046_v31 = vmul.f32 -1.442695, %v2036_v5  ;;  %2932 = vmatmul.msk.f32.gmra.mxu3 %vm1381_vm9, %v3305_v11  ;;  %1599 = vst [vmem:[%s5002_s9 + $0x80] sm:$0xff] %v1535_v45  ;;  %v1631_v59 = vsub.f32 %v1535_v45, %v3286_v50 }
 0x4c9   :  { %v3173_v22 = vpop.eup %3172  ;;  %v2319_v52 = vsel %vm2318_vm12, %v3169_v14, %v2315_v23  ;;  %v2327_v41 = vmul.f32 %v3171_v17, %v4648_v7  ;;  %v4693_v8 = vadd.s32 %v1258_v18, %v1256_v55  ;;  %vm2332_vm14 = vweird.f32 %v3171_v17 }
 0x4ca   :  { %v2324_v51 = vsel %vm2321_vm13, %v2323_v13, %v2319_v52  ;;  %v4685_v2 = vadd.f32 1.0, %v3173_v22  ;;  %3174 = vpow2.f32 %v3046_v31  ;;  %v1853_v57 = vpop.f32.mrf.mxu0  ;;  %v1663_v19 = vmul.f32 %v1631_v59, %v1631_v59  ;;  %vm2333_vm1 = vmor %vm2331_vm15, %vm2332_vm14 }
 0x4cb   :  { %2707 = vst [vmem:[%s5003_s10 + $0x30] sm:$0xff] %v2324_v51  ;;  %v2328_v15 = vsub.f32 1.0, %v2327_v41  ;;  %v1854_v6 = vadd.f32 %v4593_v40, %v1853_v57  ;;  %vm1382_vm0 = vcmp.eq.s32.totalorder %v3715_v29, %v4693_v8 }
 0x4cc   :  { %3176 = vrcp.f32 %v4685_v2  ;;  %v4701_v10 = vadd.f32 %v1693_v4, %v1663_v19  ;;  %v2350_v16 = vand.u32 2147483647, %v4685_v2  ;;  %v2352_v4 = vand.u32 2147483648, %v4685_v2 }
 0x4cd   :  { %v2329_v1 = vmul.f32 %v3171_v17, %v2328_v15  ;;  %v2038_v38 = vpop.f32.mrf.mxu1  ;;  %v1908_v46 = vmax.f32 %v1854_v6, 0.0  ;;  %vm2346_vm5 = vweird.f32 %v4685_v2 }
 0x4ce   :  { %v2039_v33 = vadd.f32 %v4404_v47, %v2038_v38  ;;  %vm2351_vm7 = vcmp.eq.f32.partialorder %v2350_v16, 8.507059e+37 }
 0x4cf   :  { %v2330_v14 = vadd.f32 %v3171_v17, %v2329_v1  ;;  %v4710_v7 = vpop.f32.mrf.mxu3  ;;  %v1931_v3 = vpack.c.bf16 %v1908_v46, %v1907_v34 }
 0x4d0   :  { %v3175_v49 = vpop.eup %3174  ;;  %v3047_v39 = vmul.f32 -1.442695, %v2039_v33  ;;  %2933 = vmatmul.msk.f32.gmra.mxu3 %vm1382_vm0, %v3305_v11  ;;  %1600 = vst [vmem:[%s5002_s9 + $0x88] sm:$0xff] %v4710_v7 }
 0x4d1   :  { %v2334_v62 = vsel %vm2333_vm1, %v3171_v17, %v2330_v14  ;;  %v2198_v37 = vadd.f32 1.0, %v3175_v49  ;;  %2052 = vmatmul.bf16.gmra.mxu1 %v1931_v3 }
 0x4d2   :  { %v3177_v53 = vpop.eup %3176  ;;  %v2339_v61 = vsel %vm2336_vm2, %v2338_v42, %v2334_v62  ;;  %3178 = vpow2.f32 %v3047_v39  ;;  %v4720_v58 = vpop.xlane.xlu2 %1348 }
 0x4d3   :  { %2708 = vst [vmem:[%s5003_s10 + $0x38] sm:$0xff] %v2339_v61  ;;  %v2342_v32 = vmul.f32 %v3177_v53, %v4685_v2  ;;  %3180 = vrcp.f32 %v2198_v37  ;;  %vm1350_vm3 = vcmp.eq.f32.partialorder %v4545_v54, %v4720_v58  ;;  %vm2347_vm4 = vweird.f32 %v3177_v53 }
 0x4d4   :  { %v1351_v35 = vsel %vm1350_vm3, %v1346_v27, inf  ;;  %vm2348_vm6 = vmor %vm2346_vm5, %vm2347_vm4  ;;  %v2353_v54 = vor.u32 1.1754944e-38, %v2352_v4  ;;  %v2365_v12 = vand.u32 2147483647, %v2198_v37  ;;  %vm2361_vm9 = vweird.f32 %v2198_v37 }
 0x4d5   :  { %v2343_v20 = vsub.f32 1.0, %v2342_v32  ;;  %v2040_v60 = vpop.f32.mrf.mxu1  ;;  %1352 = vmin.xlane.f32.xlu2 %v1351_v35  ;;  %v1271_v32 = vcvt.f32.s32 %v4570_v26 }
 0x4d6   :  { %v2041_v5 = vadd.f32 %v4404_v47, %v2040_v60  ;;  %v2367_v47 = vand.u32 2147483648, %v2198_v37  ;;  %vm2366_vm11 = vcmp.eq.f32.partialorder %v2365_v12, 8.507059e+37  ;;  %v3287_v60 = vld [vmem:[%s4998_s8 + $0x88] sm:$0xff] }
 0x4d7   :  { %v2344_v25 = vmul.f32 %v3177_v53, %v2343_v20  ;;  %v1272_v27 = vshll.u32 %v1271_v32, 16  ;;  %v1632_v16 = vsub.f32 %v4710_v7, %v3287_v60 }
 0x4d8   :  { %v3179_v23 = vpop.eup %3178  ;;  %v3048_v31 = vmul.f32 -1.442695, %v2041_v5  ;;  %v2368_v2 = vor.u32 1.1754944e-38, %v2367_v47  ;;  %v1285_v5 = vcvt.f32.s32 %v4600_v63  ;;  %v1299_v47 = vcvt.f32.s32 %v4616_v36 }
 0x4d9   :  { %v3181_v17 = vpop.eup %3180  ;;  %v2345_v18 = vadd.f32 %v3177_v53, %v2344_v25  ;;  %v2199_v13 = vadd.f32 1.0, %v3179_v23  ;;  %v1330_v25 = vand.u32 65535, %v4587_v48  ;;  %v1664_v23 = vmul.f32 %v1632_v16, %v1632_v16  ;;  %v3288_v48 = vld [vmem:[%s4998_s8 + $0x90] sm:$0xff] }
 0x4da   :  { %v2357_v30 = vmul.f32 %v3181_v17, %v2198_v37  ;;  %vm2362_vm8 = vweird.f32 %v3181_v17 }
 0x4db   :  { %v2349_v45 = vsel %vm2348_vm6, %v3177_v53, %v2345_v18  ;;  %3182 = vrcp.f32 %v2199_v13  ;;  %vm2363_vm10 = vmor %vm2361_vm9, %vm2362_vm8  ;;  %v2382_v1 = vand.u32 2147483648, %v2199_v13  ;;  %v2380_v6 = vand.u32 2147483647, %v2199_v13 }
 0x4dc   :  { %v2354_v22 = vsel %vm2351_vm7, %v2353_v54, %v2349_v45  ;;  %v2358_v52 = vsub.f32 1.0, %v2357_v30  ;;  %3184 = vpow2.f32 %v3048_v31  ;;  %vm2376_vm13 = vweird.f32 %v2199_v13 }
 0x4dd   :  { %2709 = vst [vmem:[%s5003_s10 + $0x40] sm:$0xff] %v2354_v22  ;;  %v2383_v34 = vor.u32 1.1754944e-38, %v2382_v1  ;;  %vm2381_vm15 = vcmp.eq.f32.partialorder %v2380_v6, 8.507059e+37  ;;  %v1332_v18 = vcvt.s32.f32 %v1330_v25  ;;  %v1286_v31 = vshll.u32 %v1285_v5, 16 }
 0x4de   :  { %v2359_v41 = vmul.f32 %v3181_v17, %v2358_v52  ;;  %v1695_v54 = vadd.f32 %v4701_v10, %v1664_v23  ;;  %v3289_v10 = vld [vmem:[%s4998_s8 + $0x98] sm:$0xff] }
 0x4e0   :  { %v2360_v55 = vadd.f32 %v3181_v17, %v2359_v41 }
 0x4e1   :  { %v3183_v51 = vpop.eup %3182 }
 0x4e2   :  { %v3185_v50 = vpop.eup %3184  ;;  %v2364_v59 = vsel %vm2363_vm10, %v3181_v17, %v2360_v55  ;;  %v2372_v15 = vmul.f32 %v3183_v51, %v2199_v13  ;;  %vm2377_vm12 = vweird.f32 %v3183_v51 }
 0x4e3   :  { %v2369_v57 = vsel %vm2366_vm11, %v2368_v2, %v2364_v59  ;;  %v2200_v0 = vadd.f32 1.0, %v3185_v50  ;;  %vm2378_vm14 = vmor %vm2376_vm13, %vm2377_vm12 }
 0x4e4   :  { %2710 = vst [vmem:[%s5003_s10 + $0x48] sm:$0xff] %v2369_v57  ;;  %v2373_v56 = vsub.f32 1.0, %v2372_v15 }
 0x4e5   :  { %3186 = vrcp.f32 %v2200_v0  ;;  %v2397_v42 = vand.u32 2147483648, %v2200_v0  ;;  %v2395_v62 = vand.u32 2147483647, %v2200_v0  ;;  %vm2391_vm2 = vweird.f32 %v2200_v0 }
 0x4e6   :  { %v2374_v19 = vmul.f32 %v3183_v51, %v2373_v56 }
 0x4e7   :  { %v2398_v3 = vor.u32 1.1754944e-38, %v2397_v42  ;;  %vm2396_vm4 = vcmp.eq.f32.partialorder %v2395_v62, 8.507059e+37 }
 0x4e8   :  { %v2375_v38 = vadd.f32 %v3183_v51, %v2374_v19  ;;  %v4780_v19 = vld [vmem:[%s4994_s7 + $0x3] ss:$0 sm:$0xff] }
 0x4ea   :  { %v2379_v33 = vsel %vm2378_vm14, %v3183_v51, %v2375_v38  ;;  %v1300_v51 = vshll.u32 %v1299_v47, 16 }
 0x4eb   :  { %v3187_v14 = vpop.eup %3186  ;;  %v2384_v46 = vsel %vm2381_vm15, %v2383_v34, %v2379_v33  ;;  %v1313_v33 = vcvt.f32.s32 %v4639_v44  ;;  %v3291_v44 = vld [vmem:[%s4998_s8 + $0xa0] sm:$0xff] }
 0x4ec   :  { %2711 = vst [vmem:[%s5003_s10 + $0x50] sm:$0xff] %v2384_v46  ;;  %v2387_v49 = vmul.f32 %v3187_v14, %v2200_v0  ;;  %vm2392_vm1 = vweird.f32 %v3187_v14 }
 0x4ed   :  { %vm2393_vm3 = vmor %vm2391_vm2, %vm2392_vm1 }
 0x4ee   :  { %v2388_v9 = vsub.f32 1.0, %v2387_v49  ;;  %v1314_v49 = vshll.u32 %v1313_v33, 16 }
 0x4f0   :  { %v2389_v39 = vmul.f32 %v3187_v14, %v2388_v9 }
 0x4f2   :  { %v2390_v37 = vadd.f32 %v3187_v14, %v2389_v39 }
 0x4f4   :  { %v2394_v53 = vsel %vm2393_vm3, %v3187_v14, %v2390_v37 }
 0x4f5   :  { %v2399_v61 = vsel %vm2396_vm4, %v2398_v3, %v2394_v53 }
 0x4f6   :  { %2712 = vst [vmem:[%s5003_s10 + $0x58] sm:$0xff] %v2399_v61 }
 0x518   :  { %v1269_v20 = vpop.xlane.xlu0 %1268 }
 0x519   :  { %v1270_v4 = vcvt.f32.s32 %v1269_v20 }
 0x51b   :  { %v1273_v35 = vadd.s32 %v1272_v27, %v1270_v4  ;;  %v1327_v27 = vcvt.f32.s32 %v4661_v24  ;;  %v3292_v24 = vld [vmem:[%s4998_s8 + $0xa8] sm:$0xff] }
 0x51d   :  { %vm1383_vm5 = vcmp.eq.s32.totalorder %v3715_v29, %v1273_v35  ;;  %v1328_v5 = vshll.u32 %v1327_v27, 16 }
 0x51e   :  { %2934 = vmatmul.msk.f32.gmra.mxu3 %vm1383_vm5, %v3305_v11  ;;  %v1541_v26 = vpop.f32.mrf.mxu3  ;;  %vm2997_vm6 = vmpackc.low %vm1383_vm5, %vm1382_vm0  ;;  %v4752_v17 = vpop.xlane.xlu1 %1334 }
 0x51f   :  { %1601 = vst [vmem:[%s5002_s9 + $0x90] sm:$0xff] %v1541_v26  ;;  %v1633_v63 = vsub.f32 %v1541_v26, %v3288_v48  ;;  %2998 = vmatmul.msk.bf16.gmra.mxu0 %vm2997_vm6, %v3306_v21  ;;  %vm1336_vm7 = vcmp.eq.f32.partialorder %v4598_v43, %v4752_v17 }
 0x520   :  { %v1283_v7 = vpop.xlane.xlu0 %1282  ;;  %v1856_v8 = vpop.f32.mrf.mxu0  ;;  %v1337_v13 = vsel %vm1336_vm7, %v1332_v18, inf }
 0x521   :  { %v1665_v30 = vmul.f32 %v1633_v63, %v1633_v63  ;;  %v1284_v45 = vcvt.f32.s32 %v1283_v7  ;;  %1338 = vmin.xlane.f32.xlu1 %v1337_v13  ;;  %v1857_v41 = vadd.f32 %v4593_v40, %v1856_v8 }
 0x523   :  { %v1696_v22 = vadd.f32 %v1695_v54, %v1665_v30  ;;  %v1287_v52 = vadd.s32 %v1286_v31, %v1284_v45  ;;  %v1909_v15 = vmax.f32 %v1857_v41, 0.0 }
 0x525   :  { %vm1384_vm0 = vcmp.eq.s32.totalorder %v3715_v29, %v1287_v52 }
 0x526   :  { %2935 = vmatmul.msk.f32.gmra.mxu3 %vm1384_vm0, %v3305_v11  ;;  %v1544_v43 = vpop.f32.mrf.mxu3 }
 0x527   :  { %1602 = vst [vmem:[%s5002_s9 + $0x98] sm:$0xff] %v1544_v43  ;;  %v1634_v12 = vsub.f32 %v1544_v43, %v3289_v10 }
 0x528   :  { %v1297_v55 = vpop.xlane.xlu1 %1296  ;;  %v1858_v36 = vpop.f32.mrf.mxu0 }
 0x529   :  { %v1666_v2 = vmul.f32 %v1634_v12, %v1634_v12  ;;  %v1298_v50 = vcvt.f32.s32 %v1297_v55  ;;  %v1859_v59 = vadd.f32 %v4593_v40, %v1858_v36 }
 0x52a   :  { %v2043_v57 = vpop.f32.mrf.mxu1 }
 0x52b   :  { %v1697_v0 = vadd.f32 %v1696_v22, %v1666_v2  ;;  %v1301_v56 = vadd.s32 %v1300_v51, %v1298_v50  ;;  %v1910_v1 = vmax.f32 %v1859_v59, 0.0  ;;  %v2044_v6 = vadd.f32 %v4780_v19, %v2043_v57  ;;  %v3293_v2 = vld [vmem:[%s4998_s8 + $0xb0] sm:$0xff] }
 0x52d   :  { %v1932_v38 = vpack.c.bf16 %v1910_v1, %v1909_v15  ;;  %v3049_v34 = vmul.f32 -1.442695, %v2044_v6  ;;  %vm1385_vm8 = vcmp.eq.s32.totalorder %v3715_v29, %v1301_v56 }
 0x52e   :  { %2936 = vmatmul.msk.f32.gmra.mxu3 %vm1385_vm8, %v3305_v11  ;;  %vm2999_vm9 = vmpackc.low %vm1385_vm8, %vm1384_vm0 }
 0x52f   :  { %3188 = vpow2.f32 %v3049_v34  ;;  %3000 = vmatmul.msk.bf16.gmra.mxu0 %vm2999_vm9, %v3306_v21  ;;  %2057 = vmatmul.bf16.gmra.mxu1 %v1932_v38 }
 0x530   :  { %v1861_v14 = vpop.f32.mrf.mxu0  ;;  %v1311_v46 = vpop.xlane.xlu2 %1310 }
 0x531   :  { %v1312_v9 = vcvt.f32.s32 %v1311_v46  ;;  %v1862_v60 = vadd.f32 %v4593_v40, %v1861_v14 }
 0x532   :  { %v2045_v42 = vpop.f32.mrf.mxu1 }
 0x533   :  { %v1547_v39 = vpop.f32.mrf.mxu3  ;;  %v2046_v62 = vadd.f32 %v4780_v19, %v2045_v42  ;;  %v1315_v37 = vadd.s32 %v1314_v49, %v1312_v9  ;;  %v1911_v23 = vmax.f32 %v1862_v60, 0.0 }
 0x534   :  { %1603 = vst [vmem:[%s5002_s9 + $0xa0] sm:$0xff] %v1547_v39  ;;  %v1635_v3 = vsub.f32 %v1547_v39, %v3291_v44 }
 0x535   :  { %v3189_v53 = vpop.eup %3188  ;;  %v3050_v61 = vmul.f32 -1.442695, %v2046_v62  ;;  %vm1386_vm10 = vcmp.eq.s32.totalorder %v3715_v29, %v1315_v37 }
 0x536   :  { %v2201_v32 = vadd.f32 1.0, %v3189_v53  ;;  %v1667_v20 = vmul.f32 %v1635_v3, %v1635_v3  ;;  %2937 = vmatmul.msk.f32.gmra.mxu3 %vm1386_vm10, %v3305_v11 }
 0x537   :  { %3190 = vpow2.f32 %v3050_v61 }
 0x538   :  { %3192 = vrcp.f32 %v2201_v32  ;;  %v1863_v16 = vpop.f32.mrf.mxu0  ;;  %v1698_v4 = vadd.f32 %v1697_v0, %v1667_v20  ;;  %v1325_v35 = vpop.xlane.xlu0 %1324  ;;  %v2412_v10 = vand.u32 2147483648, %v2201_v32  ;;  %v2410_v55 = vand.u32 2147483647, %v2201_v32  ;;  %v3294_v20 = vld [vmem:[%s4998_s8 + $0xb8] sm:$0xff] }
 0x539   :  { %v1864_v25 = vadd.f32 %v4593_v40, %v1863_v16  ;;  %v1326_v26 = vcvt.f32.s32 %v1325_v35  ;;  %vm2406_vm14 = vweird.f32 %v2201_v32 }
 0x53a   :  { %v2413_v57 = vor.u32 1.1754944e-38, %v2412_v10  ;;  %vm2411_vm1 = vcmp.eq.f32.partialorder %v2410_v55, 8.507059e+37 }
 0x53b   :  { %v1912_v18 = vmax.f32 %v1864_v25, 0.0  ;;  %v1550_v48 = vpop.f32.mrf.mxu3  ;;  %v1329_v8 = vadd.s32 %v1328_v5, %v1326_v26 }
 0x53c   :  { %1604 = vst [vmem:[%s5002_s9 + $0xa8] sm:$0xff] %v1550_v48  ;;  %v1636_v63 = vsub.f32 %v1550_v48, %v3292_v24 }
 0x53d   :  { %v3191_v7 = vpop.eup %3190  ;;  %v1933_v13 = vpack.c.bf16 %v1912_v18, %v1911_v23  ;;  %vm1387_vm11 = vcmp.eq.s32.totalorder %v3715_v29, %v1329_v8 }
 0x53e   :  { %v3193_v31 = vpop.eup %3192  ;;  %v2202_v54 = vadd.f32 1.0, %v3191_v7  ;;  %v1668_v30 = vmul.f32 %v1636_v63, %v1636_v63  ;;  %v2048_v45 = vpop.f32.mrf.mxu1  ;;  %2938 = vmatmul.msk.f32.gmra.mxu3 %vm1387_vm11, %v3305_v11  ;;  %vm3001_vm12 = vmpackc.low %vm1387_vm11, %vm1386_vm10 }
 0x53f   :  { %v2402_v22 = vmul.f32 %v3193_v31, %v2201_v32  ;;  %v2049_v52 = vadd.f32 %v4780_v19, %v2048_v45  ;;  %2062 = vmatmul.bf16.gmra.mxu1 %v1933_v13  ;;  %3002 = vmatmul.msk.bf16.gmra.mxu0 %vm3001_vm12, %v3306_v21  ;;  %vm2407_vm13 = vweird.f32 %v3193_v31 }
 0x540   :  { %3194 = vrcp.f32 %v2202_v54  ;;  %v1699_v41 = vadd.f32 %v1698_v4, %v1668_v30  ;;  %v1866_v51 = vpop.f32.mrf.mxu0  ;;  %vm2408_vm15 = vmor %vm2406_vm14, %vm2407_vm13  ;;  %v2427_v49 = vand.u32 2147483648, %v2202_v54  ;;  %v2425_v62 = vand.u32 2147483647, %v2202_v54 }
 0x541   :  { %v2403_v47 = vsub.f32 1.0, %v2402_v22  ;;  %v3051_v43 = vmul.f32 -1.442695, %v2049_v52  ;;  %v1867_v37 = vadd.f32 %v4593_v40, %v1866_v51  ;;  %vm2421_vm3 = vweird.f32 %v2202_v54 }
 0x542   :  { %v2428_v32 = vor.u32 1.1754944e-38, %v2427_v49  ;;  %vm2426_vm5 = vcmp.eq.f32.partialorder %v2425_v62, 8.507059e+37 }
 0x543   :  { %v2404_v12 = vmul.f32 %v3193_v31, %v2403_v47  ;;  %3196 = vpow2.f32 %v3051_v43  ;;  %v1553_v36 = vpop.f32.mrf.mxu3  ;;  %v1913_v16 = vmax.f32 %v1867_v37, 0.0 }
 0x544   :  { %1605 = vst [vmem:[%s5002_s9 + $0xb0] sm:$0xff] %v1553_v36  ;;  %v1637_v50 = vsub.f32 %v1553_v36, %v3293_v2 }
 0x545   :  { %v2405_v59 = vadd.f32 %v3193_v31, %v2404_v12 }
 0x546   :  { %v3195_v15 = vpop.eup %3194  ;;  %v1669_v0 = vmul.f32 %v1637_v50, %v1637_v50  ;;  %v2050_v56 = vpop.f32.mrf.mxu1 }
 0x547   :  { %v2409_v1 = vsel %vm2408_vm15, %v3193_v31, %v2405_v59  ;;  %v2417_v6 = vmul.f32 %v3195_v15, %v2202_v54  ;;  %v2051_v33 = vadd.f32 %v4780_v19, %v2050_v56  ;;  %vm2422_vm2 = vweird.f32 %v3195_v15 }
 0x548   :  { %v2414_v38 = vsel %vm2411_vm1, %v2413_v57, %v2409_v1  ;;  %v1700_v34 = vadd.f32 %v1699_v41, %v1669_v0  ;;  %v1868_v3 = vpop.f32.mrf.mxu0  ;;  %vm2423_vm4 = vmor %vm2421_vm3, %vm2422_vm2 }
 0x549   :  { %v3197_v14 = vpop.eup %3196  ;;  %2713 = vst [vmem:[%s5003_s10 + $0x60] sm:$0xff] %v2414_v38  ;;  %v2418_v46 = vsub.f32 1.0, %v2417_v6  ;;  %v3052_v42 = vmul.f32 -1.442695, %v2051_v33  ;;  %v1869_v61 = vadd.f32 %v4593_v40, %v1868_v3 }
 0x54a   :  { %v2203_v9 = vadd.f32 1.0, %v3197_v14 }
 0x54b   :  { %v2419_v39 = vmul.f32 %v3195_v15, %v2418_v46  ;;  %v1556_v44 = vpop.f32.mrf.mxu3  ;;  %v1914_v4 = vmax.f32 %v1869_v61, 0.0 }
 0x54c   :  { %3198 = vrcp.f32 %v2203_v9  ;;  %1606 = vst [vmem:[%s5002_s9 + $0xb8] sm:$0xff] %v1556_v44  ;;  %v1638_v27 = vsub.f32 %v1556_v44, %v3294_v20  ;;  %v2442_v54 = vand.u32 2147483648, %v2203_v9  ;;  %v2440_v45 = vand.u32 2147483647, %v2203_v9 }
 0x54d   :  { %v2420_v53 = vadd.f32 %v3195_v15, %v2419_v39  ;;  %3200 = vpow2.f32 %v3052_v42  ;;  %v1934_v23 = vpack.c.bf16 %v1914_v4, %v1913_v16  ;;  %vm2436_vm7 = vweird.f32 %v2203_v9 }
 0x54e   :  { %v1670_v35 = vmul.f32 %v1638_v27, %v1638_v27  ;;  %v2053_v5 = vpop.f32.mrf.mxu1  ;;  %v2443_v41 = vor.u32 1.1754944e-38, %v2442_v54  ;;  %vm2441_vm8 = vcmp.eq.f32.partialorder %v2440_v45, 8.507059e+37 }
 0x54f   :  { %v2424_v60 = vsel %vm2423_vm4, %v3195_v15, %v2420_v53  ;;  %v2054_v26 = vadd.f32 %v4780_v19, %v2053_v5  ;;  %2067 = vmatmul.bf16.gmra.mxu1 %v1934_v23  ;;  %v1355_v5 = vcvt.f32.s32 %v4720_v58  ;;  %v1341_v23 = vcvt.f32.s32 %v4752_v17  ;;  %v3295_v58 = vld [vmem:[%s4998_s8 + $0xc0] sm:$0xff] }
 0x550   :  { %v2429_v25 = vsel %vm2426_vm5, %v2428_v32, %v2424_v60  ;;  %v4837_v48 = vadd.f32 %v1700_v34, %v1670_v35  ;;  %v1353_v35 = vpop.xlane.xlu2 %1352 }
 0x551   :  { %2714 = vst [vmem:[%s5003_s10 + $0x68] sm:$0xff] %v2429_v25  ;;  %v3053_v7 = vmul.f32 -1.442695, %v2054_v26  ;;  %v1354_v26 = vcvt.f32.s32 %v1353_v35 }
 0x552   :  { %v3199_v18 = vpop.eup %3198 }
 0x553   :  { %v3201_v24 = vpop.eup %3200  ;;  %v2432_v63 = vmul.f32 %v3199_v18, %v2203_v9  ;;  %v4839_v8 = vpop.f32.mrf.mxu3  ;;  %3202 = vpow2.f32 %v3053_v7  ;;  %vm2437_vm6 = vweird.f32 %v3199_v18 }
 0x554   :  { %v2204_v13 = vadd.f32 1.0, %v3201_v24  ;;  %1607 = vst [vmem:[%s5002_s9 + $0xc0] sm:$0xff] %v4839_v8  ;;  %vm2438_vm0 = vmor %vm2436_vm7, %vm2437_vm6  ;;  %v1639_v17 = vsub.f32 %v4839_v8, %v3295_v58 }
 0x555   :  { %v2433_v31 = vsub.f32 1.0, %v2432_v63  ;;  %v1342_v63 = vshll.u32 %v1341_v23, 16 }
 0x556   :  { %3204 = vrcp.f32 %v2204_v13  ;;  %v2055_v22 = vpop.f32.mrf.mxu1  ;;  %v2457_v59 = vand.u32 2147483648, %v2204_v13  ;;  %v2455_v57 = vand.u32 2147483647, %v2204_v13  ;;  %vm2451_vm10 = vweird.f32 %v2204_v13 }
 0x557   :  { %v2434_v30 = vmul.f32 %v3199_v18, %v2433_v31  ;;  %v2056_v47 = vadd.f32 %v4780_v19, %v2055_v22 }
 0x558   :  { %v2458_v6 = vor.u32 1.1754944e-38, %v2457_v59  ;;  %vm2456_vm12 = vcmp.eq.f32.partialorder %v2455_v57, 8.507059e+37 }
 0x559   :  { %v2435_v52 = vadd.f32 %v3199_v18, %v2434_v30  ;;  %v3203_v43 = vpop.eup %3202  ;;  %v3054_v12 = vmul.f32 -1.442695, %v2056_v47  ;;  %v1671_v30 = vmul.f32 %v1639_v17, %v1639_v17 }
 0x55a   :  { %v2205_v51 = vadd.f32 1.0, %v3203_v43 }
 0x55b   :  { %v2439_v10 = vsel %vm2438_vm0, %v3199_v18, %v2435_v52  ;;  %3206 = vpow2.f32 %v3054_v12  ;;  %v1356_v18 = vshll.u32 %v1355_v5, 16  ;;  %v1702_v52 = vadd.f32 %v4837_v48, %v1671_v30 }
 0x55c   :  { %v3205_v55 = vpop.eup %3204  ;;  %v2444_v36 = vsel %vm2441_vm8, %v2443_v41, %v2439_v10  ;;  %3208 = vrcp.f32 %v2205_v51  ;;  %v2472_v49 = vand.u32 2147483648, %v2205_v51  ;;  %v2470_v42 = vand.u32 2147483647, %v2205_v51 }
 0x55d   :  { %2715 = vst [vmem:[%s5003_s10 + $0x70] sm:$0xff] %v2444_v36  ;;  %v2447_v2 = vmul.f32 %v3205_v55, %v2204_v13  ;;  %vm2452_vm9 = vweird.f32 %v3205_v55  ;;  %vm2466_vm14 = vweird.f32 %v2205_v51  ;;  %v1357_v7 = vadd.s32 %v1356_v18, %v1354_v26 }
 0x55e   :  { %vm2453_vm11 = vmor %vm2451_vm10, %vm2452_vm9  ;;  %v2473_v37 = vor.u32 1.1754944e-38, %v2472_v49  ;;  %vm2471_vm1 = vcmp.eq.f32.partialorder %v2470_v42, 8.507059e+37 }
 0x55f   :  { %v2448_v50 = vsub.f32 1.0, %v2447_v2  ;;  %vm1389_vm6 = vcmp.eq.s32.totalorder %v3715_v29, %v1357_v7 }
 0x561   :  { %v2449_v15 = vmul.f32 %v3205_v55, %v2448_v50  ;;  %v3207_v0 = vpop.eup %3206 }
 0x562   :  { %v3209_v1 = vpop.eup %3208  ;;  %v2206_v38 = vadd.f32 1.0, %v3207_v0  ;;  %v3298_v0 = vld [vmem:[%s4998_s8 + $0xd8] sm:$0xff] }
 0x563   :  { %v2450_v56 = vadd.f32 %v3205_v55, %v2449_v15  ;;  %v2462_v33 = vmul.f32 %v3209_v1, %v2205_v51  ;;  %vm2467_vm13 = vweird.f32 %v3209_v1 }
 0x564   :  { %3210 = vrcp.f32 %v2206_v38  ;;  %vm2468_vm15 = vmor %vm2466_vm14, %vm2467_vm13  ;;  %v2487_v32 = vand.u32 2147483648, %v2206_v38  ;;  %v2485_v27 = vand.u32 2147483647, %v2206_v38  ;;  %vm2481_vm3 = vweird.f32 %v2206_v38 }
 0x565   :  { %v2454_v34 = vsel %vm2453_vm11, %v3205_v55, %v2450_v56  ;;  %v2463_v46 = vsub.f32 1.0, %v2462_v33 }
 0x566   :  { %v2459_v14 = vsel %vm2456_vm12, %v2458_v6, %v2454_v34  ;;  %v2488_v16 = vor.u32 1.1754944e-38, %v2487_v32  ;;  %vm2486_vm5 = vcmp.eq.f32.partialorder %v2485_v27, 8.507059e+37 }
 0x567   :  { %2716 = vst [vmem:[%s5003_s10 + $0x78] sm:$0xff] %v2459_v14  ;;  %v2464_v9 = vmul.f32 %v3209_v1, %v2463_v46 }
 0x569   :  { %v2465_v39 = vadd.f32 %v3209_v1, %v2464_v9 }
 0x56a   :  { %v3211_v62 = vpop.eup %3210 }
 0x56b   :  { %v2469_v44 = vsel %vm2468_vm15, %v3209_v1, %v2465_v39  ;;  %v2477_v3 = vmul.f32 %v3211_v62, %v2206_v38  ;;  %vm2482_vm2 = vweird.f32 %v3211_v62  ;;  %v4894_v1 = vld [vmem:[%s4994_s7 + $0x2] ss:$0 sm:$0xff] }
 0x56c   :  { %v2474_v53 = vsel %vm2471_vm1, %v2473_v37, %v2469_v44  ;;  %vm2483_vm4 = vmor %vm2481_vm3, %vm2482_vm2 }
 0x56d   :  { %2717 = vst [vmem:[%s5003_s10 + $0x80] sm:$0xff] %v2474_v53  ;;  %v2478_v61 = vsub.f32 1.0, %v2477_v3  ;;  %v3300_v53 = vld [vmem:[%s4998_s8 + $0xe0] sm:$0xff] }
 0x56f   :  { %v2479_v20 = vmul.f32 %v3211_v62, %v2478_v61 }
 0x571   :  { %v2480_v60 = vadd.f32 %v3211_v62, %v2479_v20 }
 0x573   :  { %v2484_v4 = vsel %vm2483_vm4, %v3211_v62, %v2480_v60 }
 0x574   :  { %v2489_v25 = vsel %vm2486_vm5, %v2488_v16, %v2484_v4 }
 0x575   :  { %2718 = vst [vmem:[%s5003_s10 + $0x88] sm:$0xff] %v2489_v25 }
 0x594   :  { %v1339_v24 = vpop.xlane.xlu1 %1338 }
 0x595   :  { %v1340_v13 = vcvt.f32.s32 %v1339_v24 }
 0x597   :  { %v1343_v31 = vadd.s32 %v1342_v63, %v1340_v13 }
 0x599   :  { %vm1388_vm7 = vcmp.eq.s32.totalorder %v3715_v29, %v1343_v31  ;;  %v3296_v29 = vld [vmem:[%s4998_s8 + $0xc8] sm:$0xff] }
 0x59a   :  { %2939 = vmatmul.msk.f32.gmra.mxu3 %vm1388_vm7, %v3305_v11  ;;  %vm3003_vm0 = vmpackc.low %vm1389_vm6, %vm1388_vm7 }
 0x59b   :  { %3004 = vmatmul.msk.bf16.gmra.mxu0 %vm3003_vm0, %v3306_v21 }
 0x59c   :  { %v1871_v54 = vpop.f32.mrf.mxu0 }
 0x59d   :  { %v1872_v21 = vadd.f32 %v4593_v40, %v1871_v54 }
 0x59f   :  { %v1915_v10 = vmax.f32 %v1872_v21, 0.0 }
 0x5a1   :  { %v1562_v45 = vpop.f32.mrf.mxu3 }
 0x5a2   :  { %1608 = vst [vmem:[%s5002_s9 + $0xc8] sm:$0xff] %v1562_v45  ;;  %v1640_v22 = vsub.f32 %v1562_v45, %v3296_v29  ;;  %2940 = vmatmul.msk.f32.gmra.mxu3 %vm1389_vm6, %v3305_v11  ;;  %v3297_v11 = vld [vmem:[%s4998_s8 + $0xd0] sm:$0xff] }
 0x5a4   :  { %v1672_v47 = vmul.f32 %v1640_v22, %v1640_v22  ;;  %v1873_v8 = vpop.f32.mrf.mxu0 }
 0x5a5   :  { %v1874_v41 = vadd.f32 %v4593_v40, %v1873_v8 }
 0x5a6   :  { %v1703_v43 = vadd.f32 %v1702_v52, %v1672_v47 }
 0x5a7   :  { %v1916_v12 = vmax.f32 %v1874_v41, 0.0 }
 0x5a9   :  { %v1935_v55 = vpack.c.bf16 %v1916_v12, %v1915_v10  ;;  %v1565_v36 = vpop.f32.mrf.mxu3 }
 0x5aa   :  { %1609 = vst [vmem:[%s5002_s9 + $0xd0] sm:$0xff] %v1565_v36  ;;  %v1641_v51 = vsub.f32 %v1565_v36, %v3297_v11 }
 0x5ab   :  { %2072 = vmatmul.bf16.gmra.mxu1 %v1935_v55 }
 0x5ac   :  { %v1673_v48 = vmul.f32 %v1641_v51, %v1641_v51  ;;  %v1876_v2 = vpop.f32.mrf.mxu0  ;;  %v2058_v50 = vpop.f32.mrf.mxu1 }
 0x5ad   :  { %v2059_v40 = vadd.f32 %v4780_v19, %v2058_v50  ;;  %v1877_v6 = vadd.f32 %v4894_v1, %v1876_v2 }
 0x5ae   :  { %v1704_v59 = vadd.f32 %v1703_v43, %v1673_v48 }
 0x5af   :  { %v3055_v15 = vmul.f32 -1.442695, %v2059_v40  ;;  %v1917_v42 = vmax.f32 %v1877_v6, 0.0 }
 0x5b1   :  { %3212 = vpow2.f32 %v3055_v15  ;;  %v1568_v57 = vpop.f32.mrf.mxu3 }
 0x5b2   :  { %1610 = vst [vmem:[%s5002_s9 + $0xd8] sm:$0xff] %v1568_v57  ;;  %v1642_v56 = vsub.f32 %v1568_v57, %v3298_v0 }
 0x5b4   :  { %v1674_v38 = vmul.f32 %v1642_v56, %v1642_v56  ;;  %v1878_v34 = vpop.f32.mrf.mxu0  ;;  %v2060_v33 = vpop.f32.mrf.mxu1 }
 0x5b5   :  { %v1879_v14 = vadd.f32 %v4894_v1, %v1878_v34  ;;  %v2061_v46 = vadd.f32 %v4780_v19, %v2060_v33 }
 0x5b6   :  { %v1705_v49 = vadd.f32 %v1704_v59, %v1674_v38 }
 0x5b7   :  { %v3213_v9 = vpop.eup %3212  ;;  %v1918_v39 = vmax.f32 %v1879_v14, 0.0  ;;  %v3056_v62 = vmul.f32 -1.442695, %v2061_v46 }
 0x5b8   :  { %v2207_v37 = vadd.f32 1.0, %v3213_v9 }
 0x5b9   :  { %v1936_v44 = vpack.c.bf16 %v1918_v39, %v1917_v42  ;;  %3214 = vpow2.f32 %v3056_v62  ;;  %v1571_v3 = vpop.f32.mrf.mxu3 }
 0x5ba   :  { %3216 = vrcp.f32 %v2207_v37  ;;  %1611 = vst [vmem:[%s5002_s9 + $0xe0] sm:$0xff] %v1571_v3  ;;  %v1643_v61 = vsub.f32 %v1571_v3, %v3300_v53  ;;  %v2502_v24 = vand.u32 2147483648, %v2207_v37  ;;  %v2500_v13 = vand.u32 2147483647, %v2207_v37 }
 0x5bb   :  { %2077 = vmatmul.bf16.gmra.mxu1 %v1936_v44  ;;  %vm2496_vm9 = vweird.f32 %v2207_v37 }
 0x5bc   :  { %v2063_v32 = vpop.f32.mrf.mxu1  ;;  %v1675_v20 = vmul.f32 %v1643_v61, %v1643_v61  ;;  %v1881_v4 = vpop.f32.mrf.mxu0  ;;  %v2503_v22 = vor.u32 1.1754944e-38, %v2502_v24  ;;  %vm2501_vm11 = vcmp.eq.f32.partialorder %v2500_v13, 8.507059e+37 }
 0x5bd   :  { %v2064_v27 = vadd.f32 %v4780_v19, %v2063_v32  ;;  %v1882_v54 = vadd.f32 %v4894_v1, %v1881_v4 }
 0x5be   :  { %v4906_v16 = vadd.f32 %v1705_v49, %v1675_v20 }
 0x5bf   :  { %v3215_v60 = vpop.eup %3214  ;;  %v3057_v25 = vmul.f32 -1.442695, %v2064_v27  ;;  %v1919_v10 = vmax.f32 %v1882_v54, 0.0 }
 0x5c0   :  { %v3217_v35 = vpop.eup %3216  ;;  %v2208_v5 = vadd.f32 1.0, %v3215_v60 }
 0x5c1   :  { %v2492_v23 = vmul.f32 %v3217_v35, %v2207_v37  ;;  %3218 = vpow2.f32 %v3057_v25  ;;  %v4908_v18 = vpop.f32.mrf.mxu3  ;;  %vm2497_vm8 = vweird.f32 %v3217_v35 }
 0x5c2   :  { %3220 = vrcp.f32 %v2208_v5  ;;  %1612 = vst [vmem:[%s5002_s9 + $0xe8] sm:$0xff] %v4908_v18  ;;  %vm2498_vm10 = vmor %vm2496_vm9, %vm2497_vm8  ;;  %v2517_v55 = vand.u32 2147483648, %v2208_v5  ;;  %v2515_v11 = vand.u32 2147483647, %v2208_v5  ;;  %vm2511_vm13 = vweird.f32 %v2208_v5 }
 0x5c3   :  { %v2493_v26 = vsub.f32 1.0, %v2492_v23 }
 0x5c4   :  { %v2065_v63 = vpop.f32.mrf.mxu1  ;;  %v1883_v30 = vpop.f32.mrf.mxu0  ;;  %v2518_v40 = vor.u32 1.1754944e-38, %v2517_v55  ;;  %vm2516_vm15 = vcmp.eq.f32.partialorder %v2515_v11, 8.507059e+37 }
 0x5c5   :  { %v2494_v7 = vmul.f32 %v3217_v35, %v2493_v26  ;;  %v2066_v31 = vadd.f32 %v4780_v19, %v2065_v63  ;;  %v1884_v52 = vadd.f32 %v4894_v1, %v1883_v30 }
 0x5c7   :  { %v3219_v58 = vpop.eup %3218  ;;  %v2495_v17 = vadd.f32 %v3217_v35, %v2494_v7  ;;  %v3058_v45 = vmul.f32 -1.442695, %v2066_v31  ;;  %v1920_v12 = vmax.f32 %v1884_v52, 0.0 }
 0x5c8   :  { %v3221_v29 = vpop.eup %3220  ;;  %v2209_v21 = vadd.f32 1.0, %v3219_v58 }
 0x5c9   :  { %v2499_v47 = vsel %vm2498_vm10, %v3217_v35, %v2495_v17  ;;  %v2507_v8 = vmul.f32 %v3221_v29, %v2208_v5  ;;  %3222 = vpow2.f32 %v3058_v45  ;;  %vm2512_vm12 = vweird.f32 %v3221_v29 }
 0x5ca   :  { %v2504_v41 = vsel %vm2501_vm11, %v2503_v22, %v2499_v47  ;;  %3224 = vrcp.f32 %v2209_v21  ;;  %v1937_v51 = vpack.c.bf16 %v1920_v12, %v1919_v10  ;;  %vm2513_vm14 = vmor %vm2511_vm13, %vm2512_vm12  ;;  %v2532_v33 = vand.u32 2147483648, %v2209_v21 }
 0x5cb   :  { %2719 = vst [vmem:[%s5003_s10 + $0x90] sm:$0xff] %v2504_v41  ;;  %v2508_v43 = vsub.f32 1.0, %v2507_v8  ;;  %v2530_v46 = vand.u32 2147483647, %v2209_v21  ;;  %vm2526_vm2 = vweird.f32 %v2209_v21 }
 0x5cc   :  { %2082 = vmatmul.bf16.gmra.mxu1 %v1937_v51  ;;  %v2068_v15 = vpop.f32.mrf.mxu1  ;;  %v2533_v42 = vor.u32 1.1754944e-38, %v2532_v33  ;;  %v3301_v51 = vld [vmem:[%s4998_s8 + $0xe8] sm:$0xff]  ;;  %v3303_v33 = vld [vmem:[%s4998_s8 + $0xf8] sm:$0xff] }
 0x5cd   :  { %v2509_v36 = vmul.f32 %v3221_v29, %v2508_v43  ;;  %v2069_v56 = vadd.f32 %v4780_v19, %v2068_v15  ;;  %vm2531_vm4 = vcmp.eq.f32.partialorder %v2530_v46, 8.507059e+37 }
 0x5cf   :  { %v3223_v48 = vpop.eup %3222  ;;  %v2510_v2 = vadd.f32 %v3221_v29, %v2509_v36  ;;  %v3059_v34 = vmul.f32 -1.442695, %v2069_v56 }
 0x5d0   :  { %v3225_v50 = vpop.eup %3224  ;;  %v2210_v59 = vadd.f32 1.0, %v3223_v48  ;;  %v1644_v48 = vsub.f32 %v4908_v18, %v3301_v51 }
 0x5d1   :  { %v2514_v57 = vsel %vm2513_vm14, %v3221_v29, %v2510_v2  ;;  %v2522_v0 = vmul.f32 %v3225_v50, %v2209_v21  ;;  %vm2527_vm1 = vweird.f32 %v3225_v50 }
 0x5d2   :  { %v2519_v6 = vsel %vm2516_vm15, %v2518_v40, %v2514_v57  ;;  %3226 = vrcp.f32 %v2210_v59  ;;  %vm2528_vm3 = vmor %vm2526_vm2, %vm2527_vm1  ;;  %v2547_v20 = vand.u32 2147483648, %v2210_v59  ;;  %v2545_v4 = vand.u32 2147483647, %v2210_v59 }
 0x5d3   :  { %2720 = vst [vmem:[%s5003_s10 + $0x98] sm:$0xff] %v2519_v6  ;;  %v2523_v38 = vsub.f32 1.0, %v2522_v0  ;;  %3228 = vpow2.f32 %v3059_v34  ;;  %vm2541_vm6 = vweird.f32 %v2210_v59  ;;  %v1676_v57 = vmul.f32 %v1644_v48, %v1644_v48 }
 0x5d4   :  { %v2070_v39 = vpop.f32.mrf.mxu1  ;;  %v2548_v35 = vor.u32 1.1754944e-38, %v2547_v20  ;;  %vm2546_vm0 = vcmp.eq.f32.partialorder %v2545_v4, 8.507059e+37 }
 0x5d5   :  { %v2524_v14 = vmul.f32 %v3225_v50, %v2523_v38  ;;  %v2071_v44 = vadd.f32 %v4780_v19, %v2070_v39  ;;  %v1707_v34 = vadd.f32 %v4906_v16, %v1676_v57 }
 0x5d7   :  { %v2525_v49 = vadd.f32 %v3225_v50, %v2524_v14  ;;  %v3060_v32 = vmul.f32 -1.442695, %v2071_v44 }
 0x5d8   :  { %v3227_v9 = vpop.eup %3226 }
 0x5d9   :  { %v2529_v62 = vsel %vm2528_vm3, %v3225_v50, %v2525_v49  ;;  %v2537_v37 = vmul.f32 %v3227_v9, %v2210_v59  ;;  %v3229_v53 = vpop.eup %3228  ;;  %vm2542_vm5 = vweird.f32 %v3227_v9  ;;  %3230 = vpow2.f32 %v3060_v32  ;;  %v3302_v50 = vld [vmem:[%s4998_s8 + $0xf0] sm:$0xff] }
 0x5da   :  { %v2534_v3 = vsel %vm2531_vm4, %v2533_v42, %v2529_v62  ;;  %v2211_v27 = vadd.f32 1.0, %v3229_v53  ;;  %vm2543_vm7 = vmor %vm2541_vm6, %vm2542_vm5 }
 0x5db   :  { %2721 = vst [vmem:[%s5003_s10 + $0xa0] sm:$0xff] %v2534_v3  ;;  %v2538_v61 = vsub.f32 1.0, %v2537_v37  ;;  %v1717_v3 = vshrl.u32 %v780_v28, 7 }
 0x5dc   :  { %3232 = vrcp.f32 %v2211_v27  ;;  %v2562_v31 = vand.u32 2147483648, %v2211_v27  ;;  %v2560_v17 = vand.u32 2147483647, %v2211_v27  ;;  %vm2556_vm9 = vweird.f32 %v2211_v27 }
 0x5dd   :  { %v2539_v60 = vmul.f32 %v3227_v9, %v2538_v61  ;;  %vm1718_vm1 = vcmp.eq.s32.totalorder %v1717_v3, 0 }
 0x5de   :  { %v2563_v45 = vor.u32 1.1754944e-38, %v2562_v31  ;;  %vm2561_vm11 = vcmp.eq.f32.partialorder %v2560_v17, 8.507059e+37 }
 0x5df   :  { %v2540_v25 = vadd.f32 %v3227_v9, %v2539_v60  ;;  %v3231_v26 = vpop.eup %3230 }
 0x5e0   :  { %v2212_v63 = vadd.f32 1.0, %v3231_v26 }
 0x5e1   :  { %v2544_v5 = vsel %vm2543_vm7, %v3227_v9, %v2540_v25 }
 0x5e2   :  { %v2549_v23 = vsel %vm2546_vm0, %v2548_v35, %v2544_v5  ;;  %v3233_v24 = vpop.eup %3232  ;;  %3234 = vrcp.f32 %v2212_v63  ;;  %v2577_v47 = vand.u32 2147483648, %v2212_v63  ;;  %v2575_v41 = vand.u32 2147483647, %v2212_v63 }
 0x5e3   :  { %2722 = vst [vmem:[%s5003_s10 + $0xa8] sm:$0xff] %v2549_v23  ;;  %v2552_v7 = vmul.f32 %v3233_v24, %v2211_v27  ;;  %vm2557_vm8 = vweird.f32 %v3233_v24  ;;  %vm2571_vm13 = vweird.f32 %v2212_v63 }
 0x5e4   :  { %vm2558_vm10 = vmor %vm2556_vm9, %vm2557_vm8  ;;  %v2578_v10 = vor.u32 1.1754944e-38, %v2577_v47  ;;  %vm2576_vm15 = vcmp.eq.f32.partialorder %v2575_v41, 8.507059e+37 }
 0x5e5   :  { %v2553_v13 = vsub.f32 1.0, %v2552_v7 }
 0x5e7   :  { %v2554_v58 = vmul.f32 %v3233_v24, %v2553_v13 }
 0x5e8   :  { %v3235_v30 = vpop.eup %3234 }
 0x5e9   :  { %v2555_v54 = vadd.f32 %v3233_v24, %v2554_v58  ;;  %v2567_v22 = vmul.f32 %v3235_v30, %v2212_v63  ;;  %vm2572_vm12 = vweird.f32 %v3235_v30 }
 0x5ea   :  { %vm2573_vm14 = vmor %vm2571_vm13, %vm2572_vm12 }
 0x5eb   :  { %v2559_v29 = vsel %vm2558_vm10, %v3233_v24, %v2555_v54  ;;  %v2568_v52 = vsub.f32 1.0, %v2567_v22 }
 0x5ec   :  { %v2564_v21 = vsel %vm2561_vm11, %v2563_v45, %v2559_v29 }
 0x5ed   :  { %2723 = vst [vmem:[%s5003_s10 + $0xb0] sm:$0xff] %v2564_v21  ;;  %v2569_v8 = vmul.f32 %v3235_v30, %v2568_v52 }
 0x5ef   :  { %v2570_v43 = vadd.f32 %v3235_v30, %v2569_v8 }
 0x5f1   :  { %v2574_v12 = vsel %vm2573_vm14, %v3235_v30, %v2570_v43 }
 0x5f2   :  { %v2579_v55 = vsel %vm2576_vm15, %v2578_v10, %v2574_v12 }
 0x5f3   :  { %2724 = vst [vmem:[%s5003_s10 + $0xb8] sm:$0xff] %v2579_v55 }
 0x618   :  { %v1886_v36 = vpop.f32.mrf.mxu0 }
 0x619   :  { %v1887_v2 = vadd.f32 %v4894_v1, %v1886_v36 }
 0x61b   :  { %v1921_v0 = vmax.f32 %v1887_v2, 0.0 }
 0x61d   :  { %v1577_v11 = vpop.f32.mrf.mxu3 }
 0x61e   :  { %1613 = vst [vmem:[%s5002_s9 + $0xf0] sm:$0xff] %v1577_v11  ;;  %v1645_v40 = vsub.f32 %v1577_v11, %v3302_v50 }
 0x620   :  { %v1888_v59 = vpop.f32.mrf.mxu0  ;;  %v1677_v6 = vmul.f32 %v1645_v40, %v1645_v40 }
 0x621   :  { %v1889_v15 = vadd.f32 %v4894_v1, %v1888_v59 }
 0x622   :  { %v1708_v46 = vadd.f32 %v1707_v34, %v1677_v6 }
 0x623   :  { %v1922_v56 = vmax.f32 %v1889_v15, 0.0 }
 0x625   :  { %v1938_v38 = vpack.c.bf16 %v1922_v56, %v1921_v0  ;;  %v1580_v18 = vpop.f32.mrf.mxu3 }
 0x626   :  { %1614 = vst [vmem:[%s5002_s9 + $0xf8] sm:$0xff] %v1580_v18  ;;  %v1646_v14 = vsub.f32 %v1580_v18, %v3303_v33 }
 0x627   :  { %2087 = vmatmul.bf16.gmra.mxu1 %v1938_v38 }
 0x628   :  { %v1678_v1 = vmul.f32 %v1646_v14, %v1646_v14  ;;  %v2073_v49 = vpop.f32.mrf.mxu1 }
 0x629   :  { %v2074_v9 = vadd.f32 %v4780_v19, %v2073_v49 }
 0x62a   :  { %v1709_v42 = vadd.f32 %v1708_v46, %v1678_v1 }
 0x62b   :  { %v3061_v39 = vmul.f32 -1.442695, %v2074_v9 }
 0x62c   :  { %v1710_v62 = vrot.slane %v1709_v42, 4 }
 0x62d   :  { %3236 = vpow2.f32 %v3061_v39 }
 0x62e   :  { %v1711_v16 = vadd.f32 %v1710_v62, %v1709_v42 }
 0x630   :  { %v1712_v37 = vrot.slane %v1711_v16, 2  ;;  %v2075_v44 = vpop.f32.mrf.mxu1 }
 0x631   :  { %v2076_v53 = vadd.f32 %v4780_v19, %v2075_v44 }
 0x632   :  { %v1713_v61 = vadd.f32 %v1712_v37, %v1711_v16 }
 0x633   :  { %v3237_v32 = vpop.eup %3236  ;;  %v3062_v20 = vmul.f32 -1.442695, %v2076_v53 }
 0x634   :  { %v1714_v27 = vrot.slane %v1713_v61, 1  ;;  %v2213_v60 = vadd.f32 1.0, %v3237_v32 }
 0x635   :  { %3238 = vpow2.f32 %v3062_v20 }
 0x636   :  { %v1715_v4 = vadd.f32 %v1714_v27, %v1713_v61  ;;  %3240 = vrcp.f32 %v2213_v60  ;;  %v2592_v13 = vand.u32 2147483648, %v2213_v60  ;;  %v2590_v17 = vand.u32 2147483647, %v2213_v60 }
 0x637   :  { %vm2586_vm3 = vweird.f32 %v2213_v60 }
 0x638   :  { %v1719_v25 = vsel %vm1718_vm1, %v1715_v4, 0.0  ;;  %v2078_v35 = vpop.f32.mrf.mxu1  ;;  %v2593_v21 = vor.u32 1.1754944e-38, %v2592_v13  ;;  %vm2591_vm5 = vcmp.eq.f32.partialorder %v2590_v17, 8.507059e+37 }
 0x639   :  { %1720 = vst [vmem:[%s5004_s11] sm:$0xff] %v1719_v25  ;;  %v2079_v5 = vadd.f32 %v4780_v19, %v2078_v35 }
 0x63b   :  { %v3239_v28 = vpop.eup %3238  ;;  %v3063_v23 = vmul.f32 -1.442695, %v2079_v5 }
 0x63c   :  { %v3241_v26 = vpop.eup %3240  ;;  %v2214_v24 = vadd.f32 1.0, %v3239_v28 }
 0x63d   :  { %v2582_v63 = vmul.f32 %v3241_v26, %v2213_v60  ;;  %3242 = vpow2.f32 %v3063_v23  ;;  %vm2587_vm2 = vweird.f32 %v3241_v26 }
 0x63e   :  { %3244 = vrcp.f32 %v2214_v24  ;;  %vm2588_vm4 = vmor %vm2586_vm3, %vm2587_vm2  ;;  %v2607_v10 = vand.u32 2147483648, %v2214_v24  ;;  %v2605_v55 = vand.u32 2147483647, %v2214_v24  ;;  %vm2601_vm7 = vweird.f32 %v2214_v24 }
 0x63f   :  { %v2583_v7 = vsub.f32 1.0, %v2582_v63 }
 0x640   :  { %v2080_v31 = vpop.f32.mrf.mxu1  ;;  %v2608_v48 = vor.u32 1.1754944e-38, %v2607_v10  ;;  %vm2606_vm8 = vcmp.eq.f32.partialorder %v2605_v55, 8.507059e+37 }
 0x641   :  { %v2584_v58 = vmul.f32 %v3241_v26, %v2583_v7  ;;  %v2081_v54 = vadd.f32 %v4780_v19, %v2080_v31 }
 0x643   :  { %v3243_v30 = vpop.eup %3242  ;;  %v2585_v45 = vadd.f32 %v3241_v26, %v2584_v58  ;;  %v3064_v29 = vmul.f32 -1.442695, %v2081_v54 }
 0x644   :  { %v3245_v22 = vpop.eup %3244  ;;  %v2215_v52 = vadd.f32 1.0, %v3243_v30 }
 0x645   :  { %v2589_v47 = vsel %vm2588_vm4, %v3241_v26, %v2585_v45  ;;  %v2597_v8 = vmul.f32 %v3245_v22, %v2214_v24  ;;  %3246 = vpow2.f32 %v3064_v29  ;;  %vm2602_vm6 = vweird.f32 %v3245_v22 }
 0x646   :  { %v2594_v41 = vsel %vm2591_vm5, %v2593_v21, %v2589_v47  ;;  %3248 = vrcp.f32 %v2215_v52  ;;  %vm2603_vm0 = vmor %vm2601_vm7, %vm2602_vm6  ;;  %v2622_v6 = vand.u32 2147483648, %v2215_v52  ;;  %v2620_v18 = vand.u32 2147483647, %v2215_v52  ;;  %v3304_v47 = vld [vmem:[%s4994_s7 + $0x3] ss:$0 sm:$0xff] }
 0x647   :  { %2725 = vst [vmem:[%s5003_s10 + $0xc0] sm:$0xff] %v2594_v41  ;;  %v2598_v43 = vsub.f32 1.0, %v2597_v8  ;;  %vm2616_vm10 = vweird.f32 %v2215_v52 }
 0x648   :  { %v2623_v14 = vor.u32 1.1754944e-38, %v2622_v6  ;;  %vm2621_vm12 = vcmp.eq.f32.partialorder %v2620_v18, 8.507059e+37 }
 0x649   :  { %v2599_v12 = vmul.f32 %v3245_v22, %v2598_v43  ;;  %v2083_v50 = vpop.f32.mrf.mxu1 }
 0x64a   :  { %v2084_v15 = vadd.f32 %v4780_v19, %v2083_v50 }
 0x64b   :  { %v3247_v36 = vpop.eup %3246  ;;  %v2600_v11 = vadd.f32 %v3245_v22, %v2599_v12 }
 0x64c   :  { %v3249_v51 = vpop.eup %3248  ;;  %v2216_v2 = vadd.f32 1.0, %v3247_v36  ;;  %v3065_v56 = vmul.f32 -1.442695, %v2084_v15 }
 0x64d   :  { %v2604_v40 = vsel %vm2603_vm0, %v3245_v22, %v2600_v11  ;;  %v2612_v59 = vmul.f32 %v3249_v51, %v2215_v52  ;;  %vm2617_vm9 = vweird.f32 %v3249_v51 }
 0x64e   :  { %v2609_v57 = vsel %vm2606_vm8, %v2608_v48, %v2604_v40  ;;  %3250 = vrcp.f32 %v2216_v2  ;;  %vm2618_vm11 = vmor %vm2616_vm10, %vm2617_vm9  ;;  %v2637_v37 = vand.u32 2147483648, %v2216_v2  ;;  %v2635_v53 = vand.u32 2147483647, %v2216_v2 }
 0x64f   :  { %2726 = vst [vmem:[%s5003_s10 + $0xc8] sm:$0xff] %v2609_v57  ;;  %v2613_v0 = vsub.f32 1.0, %v2612_v59  ;;  %3252 = vpow2.f32 %v3065_v56  ;;  %vm2631_vm14 = vweird.f32 %v2216_v2 }
 0x650   :  { %v2638_v32 = vor.u32 1.1754944e-38, %v2637_v37  ;;  %vm2636_vm1 = vcmp.eq.f32.partialorder %v2635_v53, 8.507059e+37 }
 0x651   :  { %v2614_v38 = vmul.f32 %v3249_v51, %v2613_v0  ;;  %v2085_v46 = vpop.f32.mrf.mxu1 }
 0x652   :  { %v2086_v9 = vadd.f32 %v4780_v19, %v2085_v46 }
 0x653   :  { %v2615_v34 = vadd.f32 %v3249_v51, %v2614_v38 }
 0x654   :  { %v3251_v33 = vpop.eup %3250  ;;  %v3066_v16 = vmul.f32 -1.442695, %v2086_v9 }
 0x655   :  { %v2619_v1 = vsel %vm2618_vm11, %v3249_v51, %v2615_v34  ;;  %v2627_v49 = vmul.f32 %v3251_v33, %v2216_v2  ;;  %v3253_v39 = vpop.eup %3252  ;;  %vm2632_vm13 = vweird.f32 %v3251_v33 }
 0x656   :  { %v2624_v42 = vsel %vm2621_vm12, %v2623_v14, %v2619_v1  ;;  %v2217_v44 = vadd.f32 1.0, %v3253_v39  ;;  %3254 = vpow2.f32 %v3066_v16  ;;  %vm2633_vm15 = vmor %vm2631_vm14, %vm2632_vm13 }
 0x657   :  { %2727 = vst [vmem:[%s5003_s10 + $0xd0] sm:$0xff] %v2624_v42  ;;  %v2628_v62 = vsub.f32 1.0, %v2627_v49 }
 0x658   :  { %3256 = vrcp.f32 %v2217_v44  ;;  %v2652_v5 = vand.u32 2147483648, %v2217_v44  ;;  %v2650_v23 = vand.u32 2147483647, %v2217_v44  ;;  %vm2646_vm3 = vweird.f32 %v2217_v44 }
 0x659   :  { %v2629_v3 = vmul.f32 %v3251_v33, %v2628_v62 }
 0x65a   :  { %v2653_v63 = vor.u32 1.1754944e-38, %v2652_v5  ;;  %vm2651_vm5 = vcmp.eq.f32.partialorder %v2650_v23, 8.507059e+37 }
 0x65b   :  { %v2630_v61 = vadd.f32 %v3251_v33, %v2629_v3 }
 0x65c   :  { %v3255_v27 = vpop.eup %3254 }
 0x65d   :  { %v2634_v19 = vsel %vm2633_vm15, %v3251_v33, %v2630_v61  ;;  %v2218_v4 = vadd.f32 1.0, %v3255_v27 }
 0x65e   :  { %v2639_v20 = vsel %vm2636_vm1, %v2638_v32, %v2634_v19  ;;  %v3257_v60 = vpop.eup %3256 }
 0x65f   :  { %2728 = vst [vmem:[%s5003_s10 + $0xd8] sm:$0xff] %v2639_v20  ;;  %v2642_v25 = vmul.f32 %v3257_v60, %v2217_v44  ;;  %3258 = vrcp.f32 %v2218_v4  ;;  %vm2647_vm2 = vweird.f32 %v3257_v60  ;;  %v2667_v17 = vand.u32 2147483648, %v2218_v4 }
 0x660   :  { %vm2648_vm4 = vmor %vm2646_vm3, %vm2647_vm2  ;;  %v2665_v30 = vand.u32 2147483647, %v2218_v4  ;;  %vm2661_vm7 = vweird.f32 %v2218_v4 }
 0x661   :  { %v2643_v35 = vsub.f32 1.0, %v2642_v25  ;;  %v2668_v29 = vor.u32 1.1754944e-38, %v2667_v17 }
 0x662   :  { %vm2666_vm8 = vcmp.eq.f32.partialorder %v2665_v30, 8.507059e+37 }
 0x663   :  { %v2644_v28 = vmul.f32 %v3257_v60, %v2643_v35 }
 0x665   :  { %v2645_v26 = vadd.f32 %v3257_v60, %v2644_v28  ;;  %v3259_v24 = vpop.eup %3258 }
 0x666   :  { %v2657_v13 = vmul.f32 %v3259_v24, %v2218_v4  ;;  %vm2662_vm6 = vweird.f32 %v3259_v24 }
 0x667   :  { %v2649_v7 = vsel %vm2648_vm4, %v3257_v60, %v2645_v26  ;;  %vm2663_vm0 = vmor %vm2661_vm7, %vm2662_vm6 }
 0x668   :  { %v2654_v31 = vsel %vm2651_vm5, %v2653_v63, %v2649_v7  ;;  %v2658_v58 = vsub.f32 1.0, %v2657_v13 }
 0x669   :  { %2729 = vst [vmem:[%s5003_s10 + $0xe0] sm:$0xff] %v2654_v31 }
 0x66a   :  { %v2659_v54 = vmul.f32 %v3259_v24, %v2658_v58 }
 0x66c   :  { %v2660_v45 = vadd.f32 %v3259_v24, %v2659_v54 }
 0x66e   :  { %v2664_v22 = vsel %vm2663_vm0, %v3259_v24, %v2660_v45 }
 0x66f   :  { %v2669_v21 = vsel %vm2666_vm8, %v2668_v29, %v2664_v22 }
 0x670   :  { %2730 = vst [vmem:[%s5003_s10 + $0xe8] sm:$0xff] %v2669_v21 }
 0x6a4   :  { %v2088_v52 = vpop.f32.mrf.mxu1 }
 0x6a5   :  { %v2089_v8 = vadd.f32 %v3304_v47, %v2088_v52 }
 0x6a7   :  { %v3067_v41 = vmul.f32 -1.442695, %v2089_v8 }
 0x6a9   :  { %3260 = vpow2.f32 %v3067_v41 }
 0x6ac   :  { %v2090_v43 = vpop.f32.mrf.mxu1 }
 0x6ad   :  { %v2091_v10 = vadd.f32 %v3304_v47, %v2090_v43 }
 0x6af   :  { %v3261_v12 = vpop.eup %3260  ;;  %v3068_v55 = vmul.f32 -1.442695, %v2091_v10 }
 0x6b0   :  { %v2219_v36 = vadd.f32 1.0, %v3261_v12 }
 0x6b1   :  { %3262 = vpow2.f32 %v3068_v55 }
 0x6b2   :  { %3264 = vrcp.f32 %v2219_v36  ;;  %v2682_v40 = vand.u32 2147483648, %v2219_v36  ;;  %v2680_v15 = vand.u32 2147483647, %v2219_v36  ;;  %vm2676_vm10 = vweird.f32 %v2219_v36 }
 0x6b4   :  { %v2683_v56 = vor.u32 1.1754944e-38, %v2682_v40  ;;  %vm2681_vm12 = vcmp.eq.f32.partialorder %v2680_v15, 8.507059e+37 }
 0x6b7   :  { %v3263_v11 = vpop.eup %3262 }
 0x6b8   :  { %v3265_v51 = vpop.eup %3264  ;;  %v2220_v48 = vadd.f32 1.0, %v3263_v11 }
 0x6b9   :  { %v2672_v2 = vmul.f32 %v3265_v51, %v2219_v36  ;;  %vm2677_vm9 = vweird.f32 %v3265_v51 }
 0x6ba   :  { %3266 = vrcp.f32 %v2220_v48  ;;  %vm2678_vm11 = vmor %vm2676_vm10, %vm2677_vm9  ;;  %v2697_v33 = vand.u32 2147483648, %v2220_v48  ;;  %v2695_v46 = vand.u32 2147483647, %v2220_v48  ;;  %vm2691_vm14 = vweird.f32 %v2220_v48 }
 0x6bb   :  { %v2673_v50 = vsub.f32 1.0, %v2672_v2 }
 0x6bc   :  { %v2698_v49 = vor.u32 1.1754944e-38, %v2697_v33  ;;  %vm2696_vm1 = vcmp.eq.f32.partialorder %v2695_v46, 8.507059e+37 }
 0x6bd   :  { %v2674_v59 = vmul.f32 %v3265_v51, %v2673_v50 }
 0x6bf   :  { %v2675_v57 = vadd.f32 %v3265_v51, %v2674_v59 }
 0x6c0   :  { %v3267_v0 = vpop.eup %3266 }
 0x6c1   :  { %v2679_v6 = vsel %vm2678_vm11, %v3265_v51, %v2675_v57  ;;  %v2687_v38 = vmul.f32 %v3267_v0, %v2220_v48  ;;  %vm2692_vm13 = vweird.f32 %v3267_v0 }
 0x6c2   :  { %v2684_v18 = vsel %vm2681_vm12, %v2683_v56, %v2679_v6  ;;  %vm2693_vm15 = vmor %vm2691_vm14, %vm2692_vm13 }
 0x6c3   :  { %2731 = vst [vmem:[%s5003_s10 + $0xf0] sm:$0xff] %v2684_v18  ;;  %v2688_v34 = vsub.f32 1.0, %v2687_v38 }
 0x6c5   :  { %v2689_v14 = vmul.f32 %v3267_v0, %v2688_v34 }
 0x6c7   :  { %v2690_v1 = vadd.f32 %v3267_v0, %v2689_v14 }
 0x6c9   :  { %v2694_v9 = vsel %vm2693_vm15, %v3267_v0, %v2690_v1 }
 0x6ca   :  { %v2699_v42 = vsel %vm2696_vm1, %v2698_v49, %v2694_v9 }
 0x6cb   :  { %2732 = vst [vmem:[%s5003_s10 + $0xf8] sm:$0xff] %v2699_v42 }

</bundles_post_ra>
